<compile_context>
chip_gen: v7x
topology: tpu7x:2x2x1
jax: 0.10.0
libtpu: 0.0.40
codegen_flags: <defaults>
</compile_context>

<pallas_src>
import functools

import jax
import jax.numpy as jnp
from jax import lax
from jax.experimental import pallas as pl
from jax.experimental.pallas import tpu as pltpu


def _attention_tile_kernel(xr_ref, xc_ref, wc_ref, b_ref, rel_ref, wstat_ref,
                           out_ref, *, alpha):
    i = pl.program_id(0)
    j = pl.program_id(1)
    tm, tn = out_ref.shape

    # Tiny fused GEMV per tile: f = x_tile @ Wc + [b1, b2]   (Wc fused in wrapper).
    f_rows = jnp.dot(xr_ref[...], wc_ref[...],
                     preferred_element_type=jnp.float32) + b_ref[...]   # (tm, 2)
    f_cols = jnp.dot(xc_ref[...], wc_ref[...],
                     preferred_element_type=jnp.float32) + b_ref[...]   # (tn, 2)
    f1 = f_rows[:, 0:1]                                                 # (tm, 1)
    f2 = f_cols[:, 1:2]                                                 # (tn, 1)

    # logits[i, j] = f1[i] + f2[j]  (rank-1 add), plus the static-relation term.
    logits = f1 + f2.T                                                  # (tm, tn)
    logits = logits + rel_ref[...] * wstat_ref[...]

    # LeakyReLU
    coefs = jnp.where(logits > 0, logits, alpha * logits)

    # coef_revise = ones - eye  -> zero the diagonal (global indices under tiling).
    rows = lax.broadcasted_iota(jnp.int32, (tm, tn), 0) + i * tm
    cols = lax.broadcasted_iota(jnp.int32, (tm, tn), 1) + j * tn
    out_ref[...] = jnp.where(rows == cols, jnp.zeros_like(coefs), coefs)


def attention_forward(x, Wr, wf1, b1, wf2, b2, W_static, relation_static, alpha,
                      *, tm_pref=256, tn_pref=512):
    """x: (N, Cin). Conv weights pre-transposed: Wr (Cin, Cout), wf* (Cout, 1),
    b* (1, 1). relation_static / W_static: (N, N)."""
    N, Cin = x.shape
    x = x.astype(jnp.float32)

    # Fuse the 1x1 convs:  x @ Wr @ wf + b  ==  x @ (Wr @ wf) + b.
    Wc = jnp.concatenate([Wr @ wf1, Wr @ wf2], axis=1).astype(jnp.float32)  # (Cin, 2)
    b = jnp.concatenate([b1, b2], axis=1).astype(jnp.float32)               # (1, 2)

    # Lane-dense tiles when N divides them; otherwise fall back to full extent
    # (keeps the tiny-N case, e.g. N == num_company == 8, legal).
    tm = tm_pref if (N % tm_pref == 0) else N
    tn = tn_pref if (N % tn_pref == 0) else N
    gi, gj = N // tm, N // tn

    kernel = functools.partial(_attention_tile_kernel, alpha=alpha)

    flops = gi * gj * (2 * (tm + tn) * Cin * 2 + 5 * tm * tn)
    bytes_accessed = 3 * N * N * 4 + gi * gj * (tm + tn) * Cin * 4

    return pl.pallas_call(
        kernel,
        out_shape=jax.ShapeDtypeStruct((N, N), jnp.float32),
        grid=(gi, gj),
        in_specs=[
            pl.BlockSpec((tm, Cin), lambda i, j: (i, 0)),   # x row-tile
            pl.BlockSpec((tn, Cin), lambda i, j: (j, 0)),   # x "col"-tile
            pl.BlockSpec((Cin, 2), lambda i, j: (0, 0)),    # fused Wc (resident)
            pl.BlockSpec((1, 2), lambda i, j: (0, 0)),      # fused bias (resident)
            pl.BlockSpec((tm, tn), lambda i, j: (i, j)),    # relation_static
            pl.BlockSpec((tm, tn), lambda i, j: (i, j)),    # W_static
        ],
        out_specs=pl.BlockSpec((tm, tn), lambda i, j: (i, j)),
        compiler_params=pltpu.CompilerParams(
            dimension_semantics=("parallel", "parallel")),
        cost_estimate=pl.CostEstimate(
            flops=flops, transcendentals=0, bytes_accessed=bytes_accessed),
    )(x, x, Wc, b, relation_static, W_static)


def reference_forward(x, Wr, wf1, b1, wf2, b2, W_static, relation_static, alpha):
    # Unfused reference, mirroring the PyTorch forward exactly.
    seq_fts = x @ Wr
    f1 = seq_fts @ wf1 + b1           # (N, 1)
    f2 = seq_fts @ wf2 + b2           # (N, 1)
    logits = f1 + f2.T
    logits = logits + relation_static * W_static
    coefs = jnp.where(logits > 0, logits, alpha * logits)
    n = x.shape[0]
    return coefs * (1.0 - jnp.eye(n, dtype=coefs.dtype))


if __name__ == "__main__":
    # num_stock == num_company = 1024, in_features = 32, out_features = 16.
    # Tiles: (256, 512) -> grid (4, 2), lane-dense output blocks.
    N, C_IN, C_OUT = 1024, 32, 16
    ALPHA = 0.2

    key = jax.random.PRNGKey(0)
    k_x, k_wr, k_wf1, k_b1, k_wf2, k_b2, k_rel, k_ws = jax.random.split(key, 8)

    x = jax.random.normal(k_x, (N, C_IN), dtype=jnp.float32)

    # Conv1d(in, out, k=1, bias=False) weight (out, in, 1) -> stored as (in, out).
    Wr = jax.random.normal(k_wr, (C_IN, C_OUT), dtype=jnp.float32) * 0.1
    # Conv1d(out, 1, k=1) weight (1, out, 1) -> (out, 1); bias (1,) -> (1, 1).
    wf1 = jax.random.normal(k_wf1, (C_OUT, 1), dtype=jnp.float32) * 0.1
    b1 = jax.random.normal(k_b1, (1, 1), dtype=jnp.float32) * 0.1
    wf2 = jax.random.normal(k_wf2, (C_OUT, 1), dtype=jnp.float32) * 0.1
    b2 = jax.random.normal(k_b2, (1, 1), dtype=jnp.float32) * 0.1

    # The module zero-initializes W_static; use random values here purely to
    # exercise the `relation_static` branch of the kernel.
    W_static = jax.random.normal(k_ws, (N, N), dtype=jnp.float32) * 0.1
    relation_static = jax.random.normal(k_rel, (N, N), dtype=jnp.float32)

    # NOTE: self.w_1 / self.w_2 convs are defined in __init__ but unused in
    # forward, so they are intentionally not materialized here.

    out = attention_forward(x, Wr, wf1, b1, wf2, b2,
                            W_static, relation_static, ALPHA)
    out = jax.block_until_ready(out)

    ref = reference_forward(x, Wr, wf1, b1, wf2, b2,
                            W_static, relation_static, ALPHA)
    assert out.shape == (N, N)
    assert jnp.allclose(out, ref, atol=1e-4, rtol=1e-4), (
        float(jnp.max(jnp.abs(out - ref))))
    # diagonal must be exactly zeroed
    assert jnp.all(jnp.diagonal(out) == 0.0)

    print("KERNEL_OK")
</pallas_src>

<mosaic_0001>
module attributes {stable_mosaic.version = 11 : i64} {
  func.func @_attention_tile_kernel(%arg0: i32, %arg1: i32, %arg2: memref<256x32xf32, #tpu.memory_space<vmem>>, %arg3: memref<512x32xf32, #tpu.memory_space<vmem>>, %arg4: memref<32x2xf32, #tpu.memory_space<vmem>>, %arg5: memref<1x2xf32, #tpu.memory_space<vmem>>, %arg6: memref<256x512xf32, #tpu.memory_space<vmem>>, %arg7: memref<256x512xf32, #tpu.memory_space<vmem>>, %arg8: memref<256x512xf32, #tpu.memory_space<vmem>>) attributes {dimension_semantics = [#tpu.dimension_semantics<parallel>, #tpu.dimension_semantics<parallel>], iteration_bounds = array<i64: 4, 2>, scalar_prefetch = 0 : i64, scratch_operands = 0 : i64, tpu.core_type = #tpu.core_type<tc>, window_params = [{transform_indices = @transform_0, window_bounds = array<i64: 256, 32>}, {transform_indices = @transform_1, window_bounds = array<i64: 512, 32>}, {pipeline_mode = #tpu.pipeline_mode<synchronous>, transform_indices = @transform_2, window_bounds = array<i64: 32, 2>}, {pipeline_mode = #tpu.pipeline_mode<synchronous>, transform_indices = @transform_3, window_bounds = array<i64: 1, 2>}, {transform_indices = @transform_4, window_bounds = array<i64: 256, 512>}, {transform_indices = @transform_5, window_bounds = array<i64: 256, 512>}, {transform_indices = @transform_6, window_bounds = array<i64: 256, 512>}]} {
    %c0 = arith.constant 0 : index
    %c0_0 = arith.constant 0 : index
    %0 = vector.load %arg2[%c0, %c0_0] : memref<256x32xf32, #tpu.memory_space<vmem>>, vector<256x32xf32>
    %c0_1 = arith.constant 0 : index
    %c0_2 = arith.constant 0 : index
    %1 = vector.load %arg4[%c0_1, %c0_2] : memref<32x2xf32, #tpu.memory_space<vmem>>, vector<32x2xf32>
    %cst = arith.constant dense<0.000000e+00> : vector<256x2xf32>
    %2 = tpu.matmul %0, %1, %cst {dimension_numbers = #tpu.dot_dimension_numbers<[1], [0], [0], [1], [0, 0, 1, 1], [], []>} : vector<256x32xf32>, vector<32x2xf32>, vector<256x2xf32> -> vector<256x2xf32>
    %c0_3 = arith.constant 0 : index
    %c0_4 = arith.constant 0 : index
    %3 = vector.load %arg5[%c0_3, %c0_4] : memref<1x2xf32, #tpu.memory_space<vmem>>, vector<1x2xf32>
    %4 = vector.broadcast %3 : vector<1x2xf32> to vector<256x2xf32>
    %5 = arith.addf %2, %4 : vector<256x2xf32>
    %c0_5 = arith.constant 0 : index
    %c0_6 = arith.constant 0 : index
    %6 = vector.load %arg3[%c0_5, %c0_6] : memref<512x32xf32, #tpu.memory_space<vmem>>, vector<512x32xf32>
    %c0_7 = arith.constant 0 : index
    %c0_8 = arith.constant 0 : index
    %7 = vector.load %arg4[%c0_7, %c0_8] : memref<32x2xf32, #tpu.memory_space<vmem>>, vector<32x2xf32>
    %cst_9 = arith.constant dense<0.000000e+00> : vector<512x2xf32>
    %8 = tpu.matmul %6, %7, %cst_9 {dimension_numbers = #tpu.dot_dimension_numbers<[1], [0], [0], [1], [0, 0, 1, 1], [], []>} : vector<512x32xf32>, vector<32x2xf32>, vector<512x2xf32> -> vector<512x2xf32>
    %c0_10 = arith.constant 0 : index
    %c0_11 = arith.constant 0 : index
    %9 = vector.load %arg5[%c0_10, %c0_11] : memref<1x2xf32, #tpu.memory_space<vmem>>, vector<1x2xf32>
    %10 = vector.broadcast %9 : vector<1x2xf32> to vector<512x2xf32>
    %11 = arith.addf %8, %10 : vector<512x2xf32>
    %12 = vector.extract_strided_slice %5 {offsets = [0, 0], sizes = [256, 1], strides = [1, 1]} : vector<256x2xf32> to vector<256x1xf32>
    %13 = vector.extract_strided_slice %11 {offsets = [0, 1], sizes = [512, 1], strides = [1, 1]} : vector<512x2xf32> to vector<512x1xf32>
    %14 = tpu.transpose %13, [1, 0] : vector<512x1xf32> -> vector<1x512xf32>
    %15 = vector.broadcast %12 : vector<256x1xf32> to vector<256x512xf32>
    %16 = vector.broadcast %14 : vector<1x512xf32> to vector<256x512xf32>
    %17 = arith.addf %15, %16 : vector<256x512xf32>
    %c0_12 = arith.constant 0 : index
    %c0_13 = arith.constant 0 : index
    %18 = vector.load %arg6[%c0_12, %c0_13] : memref<256x512xf32, #tpu.memory_space<vmem>>, vector<256x512xf32>
    %c0_14 = arith.constant 0 : index
    %c0_15 = arith.constant 0 : index
    %19 = vector.load %arg7[%c0_14, %c0_15] : memref<256x512xf32, #tpu.memory_space<vmem>>, vector<256x512xf32>
    %20 = arith.mulf %18, %19 : vector<256x512xf32>
    %21 = arith.addf %17, %20 : vector<256x512xf32>
    %cst_16 = arith.constant 0.000000e+00 : f32
    %22 = vector.broadcast %cst_16 : f32 to vector<256x512xf32>
    %23 = arith.cmpf ogt, %21, %22 : vector<256x512xf32>
    %cst_17 = arith.constant 2.000000e-01 : f32
    %24 = vector.broadcast %cst_17 : f32 to vector<256x512xf32>
    %25 = arith.mulf %24, %21 : vector<256x512xf32>
    %26 = arith.select %23, %21, %25 : vector<256x512xi1>, vector<256x512xf32>
    %27 = tpu.iota {dimensions = array<i32: 0>} : vector<256x512xi32>
    %c256_i32 = arith.constant 256 : i32
    %28 = arith.muli %arg0, %c256_i32 : i32
    %29 = vector.broadcast %28 : i32 to vector<256x512xi32>
    %30 = arith.addi %27, %29 : vector<256x512xi32>
    %31 = tpu.iota {dimensions = array<i32: 1>} : vector<256x512xi32>
    %c512_i32 = arith.constant 512 : i32
    %32 = arith.muli %arg1, %c512_i32 : i32
    %33 = vector.broadcast %32 : i32 to vector<256x512xi32>
    %34 = arith.addi %31, %33 : vector<256x512xi32>
    %35 = arith.cmpi eq, %30, %34 : vector<256x512xi32>
    %cst_18 = arith.constant 0.000000e+00 : f32
    %36 = vector.broadcast %cst_18 : f32 to vector<256x512xf32>
    %37 = arith.select %35, %36, %26 : vector<256x512xi1>, vector<256x512xf32>
    %c0_19 = arith.constant 0 : index
    %c0_20 = arith.constant 0 : index
    %38 = vector.load %arg8[%c0_19, %c0_20] : memref<256x512xf32, #tpu.memory_space<vmem>>, vector<256x512xf32>
    tpu.vector_store %arg8[%c0_19, %c0_20], %37 {strides = array<i32>} : memref<256x512xf32, #tpu.memory_space<vmem>>, vector<256x512xf32>,
    return
  }
  func.func @transform_0(%arg0: i32, %arg1: i32) -> (i32, i32) {
    %c0_i32 = arith.constant 0 : i32
    %c0_i32_0 = arith.constant 0 : i32
    return %arg0, %c0_i32 : i32, i32
  }
  func.func @transform_1(%arg0: i32, %arg1: i32) -> (i32, i32) {
    %c0_i32 = arith.constant 0 : i32
    %c0_i32_0 = arith.constant 0 : i32
    return %arg1, %c0_i32 : i32, i32
  }
  func.func @transform_2(%arg0: i32, %arg1: i32) -> (i32, i32) {
    %c0_i32 = arith.constant 0 : i32
    %c0_i32_0 = arith.constant 0 : i32
    %c0_i32_1 = arith.constant 0 : i32
    return %c0_i32, %c0_i32_0 : i32, i32
  }
  func.func @transform_3(%arg0: i32, %arg1: i32) -> (i32, i32) {
    %c0_i32 = arith.constant 0 : i32
    %c0_i32_0 = arith.constant 0 : i32
    %c0_i32_1 = arith.constant 0 : i32
    return %c0_i32, %c0_i32_0 : i32, i32
  }
  func.func @transform_4(%arg0: i32, %arg1: i32) -> (i32, i32) {
    %c0_i32 = arith.constant 0 : i32
    return %arg0, %arg1 : i32, i32
  }
  func.func @transform_5(%arg0: i32, %arg1: i32) -> (i32, i32) {
    %c0_i32 = arith.constant 0 : i32
    return %arg0, %arg1 : i32, i32
  }
  func.func @transform_6(%arg0: i32, %arg1: i32) -> (i32, i32) {
    %c0_i32 = arith.constant 0 : i32
    return %arg0, %arg1 : i32, i32
  }
}

</mosaic_0001>

<bundles_post_ra>
// kernel: tpu_custom_call.1
= control target key start
LH: loop header
LB: loop body
LE: loop exit
PB: predicated region body
PF: predicated region fallthrough
CT: control target
= control target key end

     0   :  { %s8665_s0 = inlined_call_operand.vmem [shape: f32[1024,32], index: 0, kind: input, shape index: {}]   ;;  %s8666_s1 = inlined_call_operand.vmem [shape: f32[1024,32], index: 1, kind: input, shape index: {}]   ;;  %s8667_s2 = inlined_call_operand.vmem [shape: f32[32,2], index: 2, kind: input, shape index: {}]   ;;  %s8668_s3 = inlined_call_operand.hbm [shape: f32[1,2], index: 3, kind: input, shape index: {}]   ;;  %s8669_s4 = inlined_call_operand.hbm [shape: f32[1024,1024], index: 4, kind: input, shape index: {}]   ;;  %s8670_s5 = inlined_call_operand.hbm [shape: f32[1024,1024], index: 5, kind: input, shape index: {}]   ;;  %s8671_s6 = inlined_call_operand.hbm [shape: f32[1024,1024], index: 6, kind: output, shape index: {}]  }
   0x1   :  { %8877 = sst [smem:[#allocation189_spill]] %s8669_s4 }
   0x2   :  { %8878 = sst [smem:[#allocation190_spill]] %s8670_s5 }
   0x3   :  { %11 = vsyncpa [#allocation3], 0 }
   0x4   :  { %12 = vsyncpa [#allocation6], 0 }
   0x5   :  { %14 = vsyncpa [#allocation6 + $0x1], 0 }
   0x6   :  { %15 = vsyncpa [#allocation4], 0 }
   0x7   :  { %17 = vsyncpa [#allocation4 + $0x1], 0  ;;  %s4373_s21 = smov 0   ;;  %s4375_s22 = smov 0  }
   0x8   :  { %s4377_s23 = smov 0   ;;  %s4379_s24 = smov 0  }
   0x9   :  { %s4381_s25 = smov 0   ;;  %s4383_s26 = smov 0  }
   0xa   :  { %s4385_s27 = smov 0   ;;  %s4387_s28 = smov 0  }
   0xb LB: > { %8879 = sst [smem:[#allocation12_spill]] %s4320_s27  ;;  %s32_s29 = sadd.s32 1, %s4316_s26  ;;  %s4324_s28 = sphi %s4387_s28, %s23_s28   ;;  %s4320_s27 = sphi %s4385_s27, %s9847_s27   ;;  %s4316_s26 = sphi %s4383_s26, %s9852_s26   ;;  %s4312_s25 = sphi %s4381_s25, %s9845_s25   ;;  %s4308_s24 = sphi %s4379_s24, %s9851_s24   ;;  %s4304_s23 = sphi %s4377_s23, %s9850_s23   ;;  %s4300_s22 = sphi %s4375_s22, %s9849_s22   ;;  %s4296_s21 = sphi %s4373_s21, %s9848_s21  }
   0xc   : > { %s35_s30 = sadd.s32 1, %s4320_s27  ;;  %p33_p0 = scmp.ge.s32.totalorder %s32_s29, 2 }
   0xd   : > { %s138_s7 = sadd.s32 1, %s4304_s23  ;;  %p145_p1 = scmp.ne.s32.totalorder %s4304_s23, %s4300_s22 }
   0xe   : > { %p146_p2 = scmp.eq.s32.totalorder %s4324_s28, 0  ;;  %s9854_s29 = smov (%p33_p0, %s32_s29), 0 }
   0xf   : > { %8880 = sst [smem:[#allocation13_spill]] %s9854_s29  ;;  %s9856_s30 = smov (!%p33_p0, %s35_s30), %s4320_s27 }
  0x10   : > { %s134_s8 = ssub.s32 %s4316_s26, %s9854_s29  ;;  %p4427_p3 = por %p146_p2, %p145_p1 }
  0x11   : > { %p37_p4 = scmp.ge.s32.totalorder %s9856_s30, 4  ;;  %p4055_p5 = scmp.lt.s32.totalorder %s4324_s28, 8 }
  0x12   : > { %s263_s10 = sand.u32 1, %s4324_s28   ;;  %s265_s11 = sand.u32 1, %s4304_s23  }
  0x13   : > { %s9858_s30 = smov (%p37_p4, %s9856_s30), 0  ;;  %s4438_s13 = sshll.u32 %s265_s11, 10 }
  0x14   : > { %8882 = sst [smem:[#allocation14_spill]] %s9858_s30  ;;  %s133_s12 = ssub.s32 %s4320_s27, %s9858_s30 }
  0x15   : > { %s135_s14 = sor.u32 %s134_s8, %s133_s12  ;;  %s3619_s15 = sshll.u32 %s4316_s26, 2 }
  0x16   : > { %p136_p6 = scmp.eq.s32.totalorder %s135_s14, 0  ;;  %s3742_s16 = sshll.u32 %s4320_s27, 8 }
  0x17   : > { %s267_s17 = scalar_lea.vmem [#allocation5], %s4438_s13  ;;  %s4446_s20 = sadd.s32 %s3742_s16, %s3619_s15 }
  0x18   : > { %s277_s18 = sshll.u32 %s267_s17, 4  ;;  %s3621_s29 = sshll.u32 %s4446_s20, 7  ;;  %s4448_s18 = int_to_ptr.vmem [resolvable:$true] %s277_s18 }
  0x19   : > { %s4444_s19 = scalar_select %p136_p6, %s4304_s23, %s138_s7  }
  0x1a   : > { %p4455_p7 = pnand %p4055_p5, %p4427_p3  ;;  %s8884_s4 = sld [smem:[#allocation189_spill]] }
  0x1b   : > { %s4466_s14 = scalar_lea.sflag [#allocation6], %s263_s10 }
  0x1c   : > { %p4136_p9 = pneg %p4455_p7 }
  0x20   : > { %s4464_s7 = scalar_lea.hbm %s8884_s4, %s3621_s29  ;;  %s4139_s17 = scalar_lea.hbm %s8884_s4, 131072 }
  0x21   : > { %s4134_s9 = scalar_lea.hbm %s4464_s7, 16384  ;;  %p4140_p12 = scmp.lt.u32.totalorder %s4464_s7, %s8884_s4 }
  0x22   : > { %p4135_p8 = scmp.ne.s32.totalorder %s4464_s7, %s4134_s9  ;;  %p4141_p13 = scmp.lt.u32.totalorder %s4139_s17, %s4134_s9 }
  0x23   : > { %p4143_p2 = scmp.lt.u32.totalorder %s4134_s9, %s4464_s7 }
  0x24   : > { %p4137_p10 = pnand %p4136_p9, %p4135_p8  ;;  %p4142_p0 = por %p4141_p13, %p4140_p12 }
  0x26   : > { %p4138_p11 = pneg %p4137_p10  ;;  %p4144_p3 = por %p4143_p2, %p4142_p0 }
  0x28   : > { %p4145_p4 = pnand %p4144_p3, %p4138_p11 }
  0x2a   : > { %4148 = shalt.err (!%p4145_p4)
}
  0x2b   : > { %s4149_s10 = scalar_lea.vmem %s4448_s18, 16384  ;;  %s4326_s15 = smov [#allocation5]  }
  0x2c   : > { %p4150_p5 = scmp.ne.s32.totalorder %s4448_s18, %s4149_s10  ;;  %s4154_s16 = sshll.u32 %s4326_s15, 4  ;;  %s4155_s16 = int_to_ptr.vmem [resolvable:$false] %s4154_s16 }
  0x2d   : > { %s4156_s8 = scalar_lea.vmem %s4155_s16, 32768  ;;  %p4157_p10 = scmp.lt.s32.totalorder %s4448_s18, %s4155_s16 }
  0x2e   : > { %p4152_p6 = pnand %p4150_p5, %p4136_p9  ;;  %p4158_p12 = scmp.lt.s32.totalorder %s4156_s8, %s4149_s10 }
  0x30   : > { %p4153_p8 = pneg %p4152_p6  ;;  %p4159_p13 = por %p4158_p12, %p4157_p10 }
  0x32   : > { %p4160_p0 = pnand %p4159_p13, %p4153_p8 }
  0x34   : > { %4163 = shalt.err (!%p4160_p0)
}
  0x35   : > { %s8675_s9 = smov 1024   ;;  %s8676_s17 = smov 512  }
  0x36   : > { %s8677_s12 = smov 32   ;;  %s8885_s5 = sld [smem:[#allocation190_spill]] }
  0x37   : > { %4046 = dma.hbm_to_vmem [thread:$0]  (!%p4455_p7), %s4464_s7, 16384, %s4448_s18, %s4466_s14, %s8675_s9, %s8676_s17, %s8677_s12  }
  0x38   : > { %s291_s8 = scalar_lea.vmem [#allocation7], %s4438_s13  ;;  %s4506_s30 = sadd.s32 4294967295, %s4324_s28  }
  0x39   : > { %s301_s4 = sshll.u32 %s291_s8, 4  ;;  %s3613_s27 = sadd.s32 4294967294, %s4324_s28   ;;  %s4532_s4 = int_to_ptr.vmem [resolvable:$true] %s301_s4 }
  0x3a   : > { %p151_p11 = scmp.ne.s32.totalorder %s4300_s22, %s4296_s21  ;;  %p8678_p2 = scmp.eq.s32.totalorder %s4506_s30, 0 }
  0x3b   : > { %p205_p3 = scmp.eq.s32.totalorder %s4506_s30, 7  ;;  %p211_p4 = scmp.eq.s32.totalorder %s3613_s27, 7 }
  0x3c   : > { %s4502_s16 = scalar_lea.hbm %s8885_s5, %s3621_s29  ;;  %p3614_p5 = scmp.ge.s32.totalorder %s4324_s28, 1 }
  0x3d   : > { %p4516_p6 = por %p8678_p2, %p151_p11  ;;  %p4523_p8 = por %p205_p3, %p145_p1 }
  0x3e   : > { %p4527_p10 = por %p211_p4, %p151_p11  ;;  %p218_p12 = scmp.lt.s32.totalorder %s4324_s28, 9 }
  0x3f   : > { %s8886_s29 = scalar_select %p4516_p6, 1, 0 }
  0x40   : > { %s8887_s13 = scalar_select %p4523_p8, 1, 0 }
  0x41   : > { %s8888_s18 = scalar_select %p4527_p10, 1, 0 }
  0x42   : > { %p4534_p13 = pnand %p3614_p5, %p218_p12  ;;  %s4330_s20 = smov [#allocation2]  }
  0x43   : > { %s4538_s7 = sshll.u32 %s4330_s20, 4  ;;  %s4164_s10 = scalar_lea.hbm %s4502_s16, 16384  ;;  %s235_s7 = int_to_ptr.vmem [resolvable:$true] %s4538_s7 }
  0x44   : > { %s8889_s27 = scalar_select %p4534_p13, 1, 0 }
  0x45   : > { %p4165_p0 = scmp.ne.s32.totalorder %s4502_s16, %s4164_s10  ;;  %s4169_s9 = scalar_lea.hbm %s8885_s5, 131072 }
  0x46   : > { %p4170_p4 = scmp.lt.u32.totalorder %s4502_s16, %s8885_s5  ;;  %p4171_p5 = scmp.lt.u32.totalorder %s4169_s9, %s4164_s10 }
  0x47   : > { %p4167_p11 = pnand %p4165_p0, %p4136_p9  ;;  %p4173_p2 = scmp.lt.u32.totalorder %s4164_s10, %s4502_s16 }
  0x48   : > { %p4172_p12 = por %p4171_p5, %p4170_p4 }
  0x49   : > { %p4168_p3 = pneg %p4167_p11 }
  0x4a   : > { %p4174_p10 = por %p4173_p2, %p4172_p12 }
  0x4c   : > { %p4175_p8 = pnand %p4174_p10, %p4168_p3 }
  0x4e   : > { %4178 = shalt.err (!%p4175_p8)
}
  0x4f   : > { %s4179_s20 = scalar_lea.vmem %s4532_s4, 16384  ;;  %s4331_s15 = smov [#allocation7]  }
  0x50   : > { %p4180_p0 = scmp.ne.s32.totalorder %s4532_s4, %s4179_s20  ;;  %s4184_s8 = sshll.u32 %s4331_s15, 4  ;;  %s4185_s8 = int_to_ptr.vmem [resolvable:$false] %s4184_s8 }
  0x51   : > { %s4186_s17 = scalar_lea.vmem %s4185_s8, 32768  ;;  %p4187_p6 = scmp.lt.s32.totalorder %s4532_s4, %s4185_s8 }
  0x52   : > { %p4182_p11 = pnand %p4180_p0, %p4136_p9  ;;  %p4188_p4 = scmp.lt.s32.totalorder %s4186_s17, %s4179_s20 }
  0x54   : > { %p4183_p1 = pneg %p4182_p11  ;;  %p4189_p5 = por %p4188_p4, %p4187_p6 }
  0x56   : > { %p4190_p2 = pnand %p4189_p5, %p4183_p1 }
  0x58   : > { %4193 = shalt.err (!%p4190_p2)
}
  0x59   : > { %s8890_s9 = smov 32   ;;  %s8891_s12 = smov 512  }
  0x5a   : > { %s8892_s10 = smov 1024   ;;  %p8893_p9 = scmp.eq.s32.totalorder %s4506_s30, 0 }
  0x5b   : > { %4049 = dma.hbm_to_vmem [thread:$0]  (!%p4455_p7), %s4502_s16, 16384, %s4532_s4, %s4466_s14, %s8892_s10, %s8891_s12, %s8890_s9  }
  0x5c   : > { %p8894_p8 = pneg %p4534_p13  ;;  %s4194_s8 = scalar_lea.hbm %s8668_s3, 16 }
  0x5d   : > { %p4195_p6 = scmp.ne.s32.totalorder %s8668_s3, %s4194_s8  ;;  %p4201_p12 = scmp.lt.u32.totalorder %s4194_s8, %s8668_s3 }
  0x5e   : > { %p4575_p10 = pnand %p8894_p8, %p8893_p9 }
  0x60   : > { %p4196_p1 = pneg %p4575_p10 }
  0x62   : > { %p4197_p7 = pnand %p4196_p1, %p4195_p6 }
  0x64   : > { %p4198_p3 = pneg %p4197_p7 }
  0x66   : > { %p4203_p0 = pnand %p4201_p12, %p4198_p3 }
  0x68   : > { %4206 = shalt.err (!%p4203_p0)
}
  0x69   : > { %s4207_s16 = scalar_lea.vmem %s235_s7, 16  ;;  %s4214_s9 = scalar_lea.vmem %s235_s7, 32 }
  0x6a   : > { %p4208_p11 = scmp.ne.s32.totalorder %s235_s7, %s4207_s16  ;;  %p4215_p2 = scmp.lt.s32.totalorder %s235_s7, %s235_s7 }
  0x6b   : > { %p4216_p9 = scmp.lt.s32.totalorder %s4214_s9, %s4207_s16 }
  0x6c   : > { %p4210_p4 = pnand %p4208_p11, %p4196_p1 }
  0x6d   : > { %p4217_p8 = por %p4216_p9, %p4215_p2 }
  0x6e   : > { %p4211_p5 = pneg %p4210_p4 }
  0x70   : > { %p4218_p13 = pnand %p4217_p8, %p4211_p5 }
  0x72   : > { %4221 = shalt.err (!%p4218_p13)
}
  0x73   : > { %4042 = dma.hbm_to_vmem [thread:$0]  (!%p4575_p10), %s8668_s3, 16, %s235_s7, [#allocation3]  }
  0x74   : > { %p8896_p6 = scmp.ne.s32.totalorder %s8889_s27, 0 }
  0x76   : > { %313 = sbr.rel (%p8896_p6) target bundleno = 1037 (0x40d), region = 44 }
  0x7d   : > { %p8897_p7 = scmp.eq.s32.totalorder %s4506_s30, 0 }
  0x7f   : > { %4283 = dma.done.wait (%p8897_p7), [#allocation3], 16   ;;  %p8898_p1 = pmov %p8897_p7 }
  0x80   : > { %s319_s10 = sand.u32 1, %s4506_s30   ;;  %s8682_s15 = sand.u32 1, %s4300_s22  }
  0x81   : > { %4285 = vsyncadd (%p8898_p1), [#allocation3], 4294967280  ;;  %s4605_s20 = sshll.u32 %s8682_s15, 10  ;;  %s320_s7 = scalar_lea.sflag [#allocation6], %s319_s10 }
  0x82   : > { %s4608_s11 = scalar_lea.vmem [#allocation5], %s4605_s20  ;;  %p8899_p13 = scmp.ne.s32.totalorder %s8886_s29, 0 }
  0x84   : > { %4287 = dma.done.wait (%p8899_p13), %s320_s7, 32768  }
  0x85   : > { %4289 = vsyncadd (%p8899_p13), %s320_s7, 4294934528  ;;  %s3634_s27 = sshll.u32 %s4308_s24, 6  ;;  %s3632_s8 = sshll.u32 %s4312_s25, 5  ;;  %vm437_vm0 = vcmask 261120   ;;  %v426_v0 = vld [vmem:[%s8667_s2] sm:$0xff]  ;;  %v427_v1 = vld [vmem:[%s8667_s2 + $0x8] sm:$0xff] }
  0x86   : > { %p383_p10 = scmp.lt.s32.totalorder %s3634_s27, 127  ;;  %p377_p3 = scmp.lt.s32.totalorder %s3632_s8, 127  ;;  %v428_v2 = vld [vmem:[%s8667_s2 + $0x10] sm:$0xff]  ;;  %v4009_v3 = vpack.c.bf16 %v427_v1, %v426_v0  ;;  %v429_v4 = vld [vmem:[%s8667_s2 + $0x18] sm:$0xff] }
  0x87   : > { %v4013_v6 = vpack.c.bf16 %v429_v4, %v428_v2  ;;  %s4333_s15 = smov 127   ;;  %s3733_s4 = sshll.u32 %s4312_s25, 8 }
  0x88   : > { %s9860_s27 = smov (!%p383_p10, %s3634_s27), 127  ;;  %s9862_s8 = smov (!%p377_p3, %s3632_s8), 127  ;;  %4025 = vmatprep.subr.bf16.mxu1 %v4009_v3  ;;  %4010 = vmatprep.subr.bf16.mxu0 %v4009_v3 }
  0x89   : > { %s3635_s30 = sshll.u32 %s9860_s27, 3  ;;  %s3633_s16 = sshll.u32 %s9862_s8, 3  ;;  %4027 = vmatpush3.bf16.msra.mxu1 %v4009_v3  ;;  %4012 = vmatpush3.bf16.msra.mxu0 %v4009_v3 }
  0x8a   : > { %s4619_s14 = scalar_lea.vmem %s8666_s1, %s3635_s30  ;;  %s4633_s30 = scalar_lea.vmem %s8665_s0, %s3633_s16  ;;  %4026 = vmatprep.subr.bf16.mxu1 %v4013_v6  ;;  %4014 = vmatprep.subr.bf16.mxu0 %v4013_v6 }
  0x8b   : > { %v775_v5 = vld [vmem:[%s4619_s14 + $0x80] sm:$0xff]  ;;  %v776_v8 = vld [vmem:[%s4619_s14 + $0x88] sm:$0xff]  ;;  %v777_v10 = vld [vmem:[%s4619_s14 + $0x90] sm:$0xff]  ;;  %s5583_s16 = scalar_lea.vmem [#allocation7], %s4605_s20  ;;  %s6434_s9 = scalar_lea.vmem [#allocation8], %s4605_s20 }
  0x8c   : > { %3937 = vmatprep.mubr.msk.f32.mxu1 %vm437_vm0, %v775_v5  ;;  %v394_v7 = vld [vmem:[%s4633_s30] sm:$0xff]  ;;  %v395_v9 = vld [vmem:[%s4633_s30 + $0x8] sm:$0xff]  ;;  %v396_v11 = vld [vmem:[%s4633_s30 + $0x10] sm:$0xff]  ;;  %s3737_s20 = sshll.u32 %s4308_s24, 2  ;;  %s3463_s25 = sshll.u32 %s6434_s9, 4  ;;  %s8555_s25 = int_to_ptr.vmem [resolvable:$true] %s3463_s25 }
  0x8d   : > { %3857 = vmatprep.mubr.msk.f32.mxu0 %vm437_vm0, %v394_v7  ;;  %4028 = vmatpush3.bf16.msra.mxu1 %v4013_v6  ;;  %v778_v12 = vld [vmem:[%s4619_s14 + $0x98] sm:$0xff]  ;;  %v779_v14 = vld [vmem:[%s4619_s14 + $0xa0] sm:$0xff]  ;;  %v780_v16 = vld [vmem:[%s4619_s14 + $0xa8] sm:$0xff]  ;;  %s9842_s10 = sand.u32 1, %s4300_s22   ;;  %s4222_s27 = scalar_lea.vmem %s8555_s25, 16384 }
  0x8e   : > { %4016 = vmatpush3.bf16.msra.mxu0 %v4013_v6  ;;  %v397_v13 = vld [vmem:[%s4633_s30 + $0x18] sm:$0xff]  ;;  %v398_v15 = vld [vmem:[%s4633_s30 + $0x20] sm:$0xff]  ;;  %v399_v17 = vld [vmem:[%s4633_s30 + $0x28] sm:$0xff]  ;;  %s8613_s7 = scalar_lea.sflag [#allocation4], %s9842_s10  ;;  %p4223_p12 = scmp.ne.s32.totalorder %s8555_s25, %s4222_s27 }
  0x8f   : > { %4018 = vmatprep.subr.bf16.mxu0 %v4009_v3  ;;  %v781_v18 = vld [vmem:[%s4619_s14 + $0xb0] sm:$0xff]  ;;  %v782_v20 = vld [vmem:[%s4619_s14 + $0xb8] sm:$0xff]  ;;  %v783_v22 = vld [vmem:[%s4619_s14 + $0xc0] sm:$0xff]  ;;  %p9843_p0 = scmp.ne.s32.totalorder %s8887_s13, 0 }
  0x90   : > { %3938 = vmatmul.mubr.msk.f32.vlgmr.msra.gmra.mrb[0].mxu1 %vm437_vm0, %v776_v8  ;;  %v400_v19 = vld [vmem:[%s4633_s30 + $0x30] sm:$0xff]  ;;  %v401_v21 = vld [vmem:[%s4633_s30 + $0x38] sm:$0xff]  ;;  %v402_v23 = vld [vmem:[%s4633_s30 + $0x40] sm:$0xff] }
  0x91   : > { %3858 = vmatmul.mubr.msk.f32.vlgmr.msra.gmra.mrb[0].mxu0 %vm437_vm0, %v395_v9  ;;  %3940 = vmatprep.mubr.msk.f32.mxu1 %vm437_vm0, %v777_v10  ;;  %v784_v24 = vld [vmem:[%s4619_s14 + $0xc8] sm:$0xff]  ;;  %v785_v26 = vld [vmem:[%s4619_s14 + $0xd0] sm:$0xff]  ;;  %v786_v28 = vld [vmem:[%s4619_s14 + $0xd8] sm:$0xff]  ;;  %p4224_p11 = pnand %p4223_p12, %p9843_p0 }
  0x92   : > { %3860 = vmatprep.mubr.msk.f32.mxu0 %vm437_vm0, %v396_v11  ;;  %4020 = vmatpush3.bf16.msra.mxu0 %v4009_v3  ;;  %v403_v25 = vld [vmem:[%s4633_s30 + $0x48] sm:$0xff]  ;;  %v404_v27 = vld [vmem:[%s4633_s30 + $0x50] sm:$0xff]  ;;  %v405_v29 = vld [vmem:[%s4633_s30 + $0x58] sm:$0xff] }
  0x93   : > { %4022 = vmatprep.subr.bf16.mxu0 %v4013_v6  ;;  %v787_v30 = vld [vmem:[%s4619_s14 + $0xe0] sm:$0xff]  ;;  %v788_v32 = vld [vmem:[%s4619_s14 + $0xe8] sm:$0xff]  ;;  %v789_v34 = vld [vmem:[%s4619_s14 + $0xf0] sm:$0xff]  ;;  %p4225_p4 = pneg %p4224_p11 }
  0x94   : > { %3941 = vmatmul.mubr.msk.f32.gmra.mrb[2].mxu1 %vm437_vm0, %v778_v12  ;;  %v406_v31 = vld [vmem:[%s4633_s30 + $0x60] sm:$0xff]  ;;  %v407_v33 = vld [vmem:[%s4633_s30 + $0x68] sm:$0xff]  ;;  %v408_v35 = vld [vmem:[%s4633_s30 + $0x70] sm:$0xff] }
  0x95   : > { %3861 = vmatmul.mubr.msk.f32.gmra.mrb[2].mxu0 %vm437_vm0, %v397_v13  ;;  %3943 = vmatprep.mubr.msk.f32.mxu1 %vm437_vm0, %v779_v14  ;;  %v790_v36 = vld [vmem:[%s4619_s14 + $0xf8] sm:$0xff]  ;;  %v791_v38 = vld [vmem:[%s4619_s14 + $0x100] sm:$0xff]  ;;  %v792_v40 = vld [vmem:[%s4619_s14 + $0x108] sm:$0xff] }
  0x96   : > { %3863 = vmatprep.mubr.msk.f32.mxu0 %vm437_vm0, %v398_v15  ;;  %4024 = vmatpush3.bf16.msra.mxu0 %v4013_v6  ;;  %v409_v37 = vld [vmem:[%s4633_s30 + $0x78] sm:$0xff]  ;;  %v410_v39 = vld [vmem:[%s4633_s30 + $0x80] sm:$0xff]  ;;  %v411_v41 = vld [vmem:[%s4633_s30 + $0x88] sm:$0xff] }
  0x97   : > { %v793_v42 = vld [vmem:[%s4619_s14 + $0x110] sm:$0xff]  ;;  %v794_v44 = vld [vmem:[%s4619_s14 + $0x118] sm:$0xff]  ;;  %v795_v46 = vld [vmem:[%s4619_s14 + $0x120] sm:$0xff] }
  0x98   : > { %3944 = vmatmul.mubr.msk.f32.gmra.mrb[4].mxu1 %vm437_vm0, %v780_v16  ;;  %v412_v43 = vld [vmem:[%s4633_s30 + $0x90] sm:$0xff]  ;;  %v413_v45 = vld [vmem:[%s4633_s30 + $0x98] sm:$0xff]  ;;  %v414_v47 = vld [vmem:[%s4633_s30 + $0xa0] sm:$0xff] }
  0x99   : > { %3864 = vmatmul.mubr.msk.f32.gmra.mrb[4].mxu0 %vm437_vm0, %v399_v17  ;;  %3946 = vmatprep.mubr.msk.f32.mxu1 %vm437_vm0, %v781_v18  ;;  %v796_v48 = vld [vmem:[%s4619_s14 + $0x128] sm:$0xff]  ;;  %v797_v50 = vld [vmem:[%s4619_s14 + $0x130] sm:$0xff]  ;;  %v798_v52 = vld [vmem:[%s4619_s14 + $0x138] sm:$0xff] }
  0x9a   : > { %3866 = vmatprep.mubr.msk.f32.mxu0 %vm437_vm0, %v400_v19  ;;  %v415_v49 = vld [vmem:[%s4633_s30 + $0xa8] sm:$0xff]  ;;  %v416_v51 = vld [vmem:[%s4633_s30 + $0xb0] sm:$0xff]  ;;  %v417_v53 = vld [vmem:[%s4633_s30 + $0xb8] sm:$0xff] }
  0x9b   : > { %v799_v54 = vld [vmem:[%s4619_s14 + $0x140] sm:$0xff]  ;;  %v800_v56 = vld [vmem:[%s4619_s14 + $0x148] sm:$0xff]  ;;  %v801_v58 = vld [vmem:[%s4619_s14 + $0x150] sm:$0xff] }
  0x9c   : > { %3947 = vmatmul.mubr.msk.f32.gmra.mrb[6].mxu1 %vm437_vm0, %v782_v20  ;;  %v418_v55 = vld [vmem:[%s4633_s30 + $0xc0] sm:$0xff]  ;;  %v419_v57 = vld [vmem:[%s4633_s30 + $0xc8] sm:$0xff]  ;;  %v420_v59 = vld [vmem:[%s4633_s30 + $0xd0] sm:$0xff] }
  0x9d   : > { %3867 = vmatmul.mubr.msk.f32.gmra.mrb[6].mxu0 %vm437_vm0, %v401_v21  ;;  %3949 = vmatprep.mubr.msk.f32.mxu1 %vm437_vm0, %v783_v22  ;;  %v802_v60 = vld [vmem:[%s4619_s14 + $0x158] sm:$0xff]  ;;  %v803_v62 = vld [vmem:[%s4619_s14 + $0x160] sm:$0xff]  ;;  %v804_v0 = vld [vmem:[%s4619_s14 + $0x168] sm:$0xff] }
  0x9e   : > { %3869 = vmatprep.mubr.msk.f32.mxu0 %vm437_vm0, %v402_v23  ;;  %v421_v61 = vld [vmem:[%s4633_s30 + $0xd8] sm:$0xff]  ;;  %v422_v63 = vld [vmem:[%s4633_s30 + $0xe0] sm:$0xff]  ;;  %v423_v1 = vld [vmem:[%s4633_s30 + $0xe8] sm:$0xff] }
  0x9f   : > { %v805_v2 = vld [vmem:[%s4619_s14 + $0x170] sm:$0xff]  ;;  %v806_v4 = vld [vmem:[%s4619_s14 + $0x178] sm:$0xff]  ;;  %v759_v6 = vld [vmem:[%s4619_s14] sm:$0xff] }
  0xa0   : > { %3950 = vmatmul.mubr.msk.f32.gmra.mrb[8].mxu1 %vm437_vm0, %v784_v24  ;;  %v424_v3 = vld [vmem:[%s4633_s30 + $0xf0] sm:$0xff]  ;;  %v425_v5 = vld [vmem:[%s4633_s30 + $0xf8] sm:$0xff]  ;;  %v807_v7 = vld [vmem:[%s4619_s14 + $0x180] sm:$0xff]  ;;  %s4334_s30 = smov [#allocation8]  }
  0xa1   : > { %3870 = vmatmul.mubr.msk.f32.gmra.mrb[8].mxu0 %vm437_vm0, %v403_v25  ;;  %3952 = vmatprep.mubr.msk.f32.mxu1 %vm437_vm0, %v785_v26  ;;  %v760_v8 = vld [vmem:[%s4619_s14 + $0x8] sm:$0xff]  ;;  %v761_v10 = vld [vmem:[%s4619_s14 + $0x10] sm:$0xff]  ;;  %v762_v12 = vld [vmem:[%s4619_s14 + $0x18] sm:$0xff]  ;;  %s4226_s8 = sshll.u32 %s4334_s30, 4  ;;  %s4227_s8 = int_to_ptr.vmem [resolvable:$false] %s4226_s8 }
  0xa2   : > { %3872 = vmatprep.mubr.msk.f32.mxu0 %vm437_vm0, %v404_v27  ;;  %v808_v9 = vld [vmem:[%s4619_s14 + $0x188] sm:$0xff]  ;;  %v809_v11 = vld [vmem:[%s4619_s14 + $0x190] sm:$0xff]  ;;  %v810_v13 = vld [vmem:[%s4619_s14 + $0x198] sm:$0xff]  ;;  %s4228_s17 = scalar_lea.vmem %s4227_s8, 32768  ;;  %p4229_p5 = scmp.lt.s32.totalorder %s8555_s25, %s4227_s8 }
  0xa3   : > { %v763_v14 = vld [vmem:[%s4619_s14 + $0x20] sm:$0xff]  ;;  %v764_v16 = vld [vmem:[%s4619_s14 + $0x28] sm:$0xff]  ;;  %v765_v18 = vld [vmem:[%s4619_s14 + $0x30] sm:$0xff]  ;;  %p4230_p2 = scmp.lt.s32.totalorder %s4228_s17, %s4222_s27 }
  0xa4   : > { %3953 = vmatmul.mubr.msk.f32.gmra.mrb[10].mxu1 %vm437_vm0, %v786_v28  ;;  %v811_v15 = vld [vmem:[%s4619_s14 + $0x1a0] sm:$0xff]  ;;  %v812_v17 = vld [vmem:[%s4619_s14 + $0x1a8] sm:$0xff]  ;;  %v813_v19 = vld [vmem:[%s4619_s14 + $0x1b0] sm:$0xff] }
  0xa5   : > { %3873 = vmatmul.mubr.msk.f32.gmra.mrb[10].mxu0 %vm437_vm0, %v405_v29  ;;  %3955 = vmatprep.mubr.msk.f32.mxu1 %vm437_vm0, %v787_v30  ;;  %v766_v20 = vld [vmem:[%s4619_s14 + $0x38] sm:$0xff]  ;;  %v767_v22 = vld [vmem:[%s4619_s14 + $0x40] sm:$0xff]  ;;  %v768_v24 = vld [vmem:[%s4619_s14 + $0x48] sm:$0xff]  ;;  %p4231_p9 = por %p4230_p2, %p4229_p5 }
  0xa6   : > { %3875 = vmatprep.mubr.msk.f32.mxu0 %vm437_vm0, %v406_v31  ;;  %v814_v21 = vld [vmem:[%s4619_s14 + $0x1b8] sm:$0xff]  ;;  %v815_v23 = vld [vmem:[%s4619_s14 + $0x1c0] sm:$0xff]  ;;  %v816_v25 = vld [vmem:[%s4619_s14 + $0x1c8] sm:$0xff] }
  0xa7   : > { %v769_v26 = vld [vmem:[%s4619_s14 + $0x50] sm:$0xff]  ;;  %v770_v28 = vld [vmem:[%s4619_s14 + $0x58] sm:$0xff]  ;;  %v771_v30 = vld [vmem:[%s4619_s14 + $0x60] sm:$0xff]  ;;  %p4232_p8 = pnand %p4231_p9, %p4225_p4 }
  0xa8   : > { %3956 = vmatmul.mubr.msk.f32.gmra.mrb[12].mxu1 %vm437_vm0, %v788_v32  ;;  %v817_v27 = vld [vmem:[%s4619_s14 + $0x1d0] sm:$0xff]  ;;  %v818_v29 = vld [vmem:[%s4619_s14 + $0x1d8] sm:$0xff]  ;;  %v819_v31 = vld [vmem:[%s4619_s14 + $0x1e0] sm:$0xff] }
  0xa9   : > { %3876 = vmatmul.mubr.msk.f32.gmra.mrb[12].mxu0 %vm437_vm0, %v407_v33  ;;  %3958 = vmatprep.mubr.msk.f32.mxu1 %vm437_vm0, %v789_v34  ;;  %v772_v32 = vld [vmem:[%s4619_s14 + $0x68] sm:$0xff]  ;;  %v773_v34 = vld [vmem:[%s4619_s14 + $0x70] sm:$0xff] }
  0xaa   : > { %3878 = vmatprep.mubr.msk.f32.mxu0 %vm437_vm0, %v408_v35  ;;  %v820_v33 = vld [vmem:[%s4619_s14 + $0x1e8] sm:$0xff]  ;;  %v821_v35 = vld [vmem:[%s4619_s14 + $0x1f0] sm:$0xff] }
  0xac   : > { %3959 = vmatmul.mubr.msk.f32.gmra.mrb[14].mxu1 %vm437_vm0, %v790_v36  ;;  %v774_v36 = vld [vmem:[%s4619_s14 + $0x78] sm:$0xff] }
  0xad   : > { %3879 = vmatmul.mubr.msk.f32.gmra.mrb[14].mxu0 %vm437_vm0, %v409_v37  ;;  %3961 = vmatprep.mubr.msk.f32.mxu1 %vm437_vm0, %v791_v38  ;;  %v822_v37 = vld [vmem:[%s4619_s14 + $0x1f8] sm:$0xff]  ;;  %v4332_v38 = vmov 0   ;;  %s3734_s14 = sshll.u32 %s4308_s24, 9  ;;  %s8451_s24 = sadd.s32 %s3737_s20, %s3733_s4 }
  0xae   : > { %3881 = vmatprep.mubr.msk.f32.mxu0 %vm437_vm0, %v410_v39  ;;  %4131 = vset.pattern.permute.xlu1 %v4332_v38  ;;  %v4830_v39 = vld [vmem:[#allocation2] ss:$0 sm:$0xff] }
  0xaf   : > { %4132 = vset.pattern.permute.xlu0 %v4332_v38 }
  0xb0   : > { %3962 = vmatmul.mubr.msk.f32.gmra.mrb[16].mxu1 %vm437_vm0, %v792_v40 }
  0xb1   : > { %3882 = vmatmul.mubr.msk.f32.gmra.mrb[16].mxu0 %vm437_vm0, %v411_v41  ;;  %3964 = vmatprep.mubr.msk.f32.mxu1 %vm437_vm0, %v793_v42 }
  0xb2   : > { %3884 = vmatprep.mubr.msk.f32.mxu0 %vm437_vm0, %v412_v43 }
  0xb4   : > { %3965 = vmatmul.mubr.msk.f32.gmra.mrb[18].mxu1 %vm437_vm0, %v794_v44 }
  0xb5   : > { %3885 = vmatmul.mubr.msk.f32.gmra.mrb[18].mxu0 %vm437_vm0, %v413_v45  ;;  %3967 = vmatprep.mubr.msk.f32.mxu1 %vm437_vm0, %v795_v46 }
  0xb6   : > { %3887 = vmatprep.mubr.msk.f32.mxu0 %vm437_vm0, %v414_v47 }
  0xb8   : > { %3968 = vmatmul.mubr.msk.f32.gmra.mrb[20].mxu1 %vm437_vm0, %v796_v48 }
  0xb9   : > { %3888 = vmatmul.mubr.msk.f32.gmra.mrb[20].mxu0 %vm437_vm0, %v415_v49  ;;  %3970 = vmatprep.mubr.msk.f32.mxu1 %vm437_vm0, %v797_v50  ;;  %v1944_v50 = vlaneseq }
  0xba   : > { %3890 = vmatprep.mubr.msk.f32.mxu0 %vm437_vm0, %v416_v51 }
  0xbc   : > { %3971 = vmatmul.mubr.msk.f32.gmra.mrb[22].mxu1 %vm437_vm0, %v798_v52 }
  0xbd   : > { %3891 = vmatmul.mubr.msk.f32.gmra.mrb[22].mxu0 %vm437_vm0, %v417_v53  ;;  %3973 = vmatprep.mubr.msk.f32.mxu1 %vm437_vm0, %v799_v54  ;;  %v4838_v53 = vshrl.u32 %v1944_v50, 7 }
  0xbe   : > { %3893 = vmatprep.mubr.msk.f32.mxu0 %vm437_vm0, %v418_v55 }
  0xbf   : > { %8900 = vst [vmem:[#allocation15_spill] sm:$0xff] %v4838_v53 }
  0xc0   : > { %3974 = vmatmul.mubr.msk.f32.gmra.mrb[24].mxu1 %vm437_vm0, %v800_v56 }
  0xc1   : > { %3894 = vmatmul.mubr.msk.f32.gmra.mrb[24].mxu0 %vm437_vm0, %v419_v57  ;;  %3976 = vmatprep.mubr.msk.f32.mxu1 %vm437_vm0, %v801_v58  ;;  %v2986_v58 = vadd.s32 8, %v4838_v53 }
  0xc2   : > { %3896 = vmatprep.mubr.msk.f32.mxu0 %vm437_vm0, %v420_v59 }
  0xc4   : > { %3977 = vmatmul.mubr.msk.f32.gmra.mrb[26].mxu1 %vm437_vm0, %v802_v60 }
  0xc5   : > { %3897 = vmatmul.mubr.msk.f32.gmra.mrb[26].mxu0 %vm437_vm0, %v421_v61  ;;  %3979 = vmatprep.mubr.msk.f32.mxu1 %vm437_vm0, %v803_v62  ;;  %v4847_v61 = vstv %s3733_s4  ;;  %v4849_v62 = vand.u32 127, %v1944_v50  ;;  %v2991_v50 = vadd.s32 48, %v4838_v53 }
  0xc6   : > { %3899 = vmatprep.mubr.msk.f32.mxu0 %vm437_vm0, %v422_v63  ;;  %8901 = vst [vmem:[#allocation16_spill] sm:$0xff] %v4847_v61  ;;  %v4851_v63 = vstv %s3734_s14 }
  0xc8   : > { %3980 = vmatmul.mubr.msk.f32.gmra.mrb[28].mxu1 %vm437_vm0, %v804_v0 }
  0xc9   : > { %3900 = vmatmul.mubr.msk.f32.gmra.mrb[28].mxu0 %vm437_vm0, %v423_v1  ;;  %3982 = vmatprep.mubr.msk.f32.mxu1 %vm437_vm0, %v805_v2  ;;  %v3055_v1 = vadd.s32 384, %v4849_v62  ;;  %v4858_v2 = vadd.s32 %v4851_v63, %v4849_v62 }
  0xca   : > { %3902 = vmatprep.mubr.msk.f32.mxu0 %vm437_vm0, %v424_v3 }
  0xcb   : > { %8902 = vst [vmem:[#allocation17_spill] sm:$0xff] %v4858_v2 }
  0xcc   : > { %3983 = vmatmul.mubr.msk.f32.gmra.mrb[30].mxu1 %vm437_vm0, %v806_v4 }
  0xcd   : > { %3903 = vmatmul.mubr.msk.f32.gmra.mrb[30].mxu0 %vm437_vm0, %v425_v5  ;;  %3985 = vmatprep.mubr.msk.f32.mxu1 %vm437_vm0, %v807_v7 }
  0xce   : > { %3913 = vmatprep.mubr.msk.f32.mxu0 %vm437_vm0, %v759_v6  ;;  %v4863_v6 = vadd.s32 %v4847_v61, %v2986_v58  ;;  %v4972_v58 = vadd.s32 %v4847_v61, %v2991_v50 }
  0xd0   : > { %3986 = vmatmul.mubr.msk.f32.gmra.mrb[32].mxu1 %vm437_vm0, %v808_v9  ;;  %8903 = vst [vmem:[#allocation18_spill] sm:$0xff] %v4863_v6  ;;  %v4866_v9 = vadd.s32 %v4851_v63, %v3055_v1  ;;  %8911 = vst [vmem:[#allocation26_spill] sm:$0xff] %v4972_v58  ;;  %v3003_v58 = vadd.s32 144, %v4838_v53 }
  0xd1   : > { %3914 = vmatmul.mubr.msk.f32.vlgmr.msra.gmra.mrb[32].mxu0 %vm437_vm0, %v760_v8  ;;  %3988 = vmatprep.mubr.msk.f32.mxu1 %vm437_vm0, %v809_v11  ;;  %v2988_v11 = vadd.s32 24, %v4838_v53 }
  0xd2   : > { %3916 = vmatprep.mubr.msk.f32.mxu0 %vm437_vm0, %v761_v10  ;;  %8904 = vst [vmem:[#allocation19_spill] sm:$0xff] %v4866_v9  ;;  %v4870_v10 = vadd.s32 %v4847_v61, %v4838_v53 }
  0xd4   : > { %3989 = vmatmul.mubr.msk.f32.gmra.mrb[34].mxu1 %vm437_vm0, %v810_v13  ;;  %8905 = vst [vmem:[#allocation20_spill] sm:$0xff] %v4870_v10  ;;  %v2096_v10 = vld [vmem:[%s4608_s11 + $0x40] sm:$0xff] }
  0xd5   : > { %3917 = vmatmul.mubr.msk.f32.gmra.mrb[34].mxu0 %vm437_vm0, %v762_v12  ;;  %3991 = vmatprep.mubr.msk.f32.mxu1 %vm437_vm0, %v811_v15 }
  0xd6   : > { %3919 = vmatprep.mubr.msk.f32.mxu0 %vm437_vm0, %v763_v14 }
  0xd8   : > { %3992 = vmatmul.mubr.msk.f32.gmra.mrb[36].mxu1 %vm437_vm0, %v812_v17 }
  0xd9   : > { %3920 = vmatmul.mubr.msk.f32.gmra.mrb[36].mxu0 %vm437_vm0, %v764_v16  ;;  %3994 = vmatprep.mubr.msk.f32.mxu1 %vm437_vm0, %v813_v19 }
  0xda   : > { %3922 = vmatprep.mubr.msk.f32.mxu0 %vm437_vm0, %v765_v18  ;;  %v4884_v18 = vadd.s32 %v4847_v61, %v2988_v11 }
  0xdc   : > { %3995 = vmatmul.mubr.msk.f32.gmra.mrb[38].mxu1 %vm437_vm0, %v814_v21  ;;  %8906 = vst [vmem:[#allocation21_spill] sm:$0xff] %v4884_v18 }
  0xdd   : > { %3923 = vmatmul.mubr.msk.f32.gmra.mrb[38].mxu0 %vm437_vm0, %v766_v20  ;;  %3997 = vmatprep.mubr.msk.f32.mxu1 %vm437_vm0, %v815_v23  ;;  %v2987_v20 = vadd.s32 16, %v4838_v53 }
  0xde   : > { %3925 = vmatprep.mubr.msk.f32.mxu0 %vm437_vm0, %v767_v22 }
  0xe0   : > { %3998 = vmatmul.mubr.msk.f32.gmra.mrb[40].mxu1 %vm437_vm0, %v816_v25 }
  0xe1   : > { %3926 = vmatmul.mubr.msk.f32.gmra.mrb[40].mxu0 %vm437_vm0, %v768_v24  ;;  %4000 = vmatprep.mubr.msk.f32.mxu1 %vm437_vm0, %v817_v27  ;;  %v2990_v27 = vadd.s32 40, %v4838_v53 }
  0xe2   : > { %3928 = vmatprep.mubr.msk.f32.mxu0 %vm437_vm0, %v769_v26  ;;  %v4900_v26 = vadd.s32 %v4847_v61, %v2987_v20 }
  0xe4   : > { %4001 = vmatmul.mubr.msk.f32.gmra.mrb[42].mxu1 %vm437_vm0, %v818_v29  ;;  %8907 = vst [vmem:[#allocation22_spill] sm:$0xff] %v4900_v26  ;;  %v3005_v26 = vadd.s32 160, %v4838_v53 }
  0xe5   : > { %3929 = vmatmul.mubr.msk.f32.gmra.mrb[42].mxu0 %vm437_vm0, %v770_v28  ;;  %4003 = vmatprep.mubr.msk.f32.mxu1 %vm437_vm0, %v819_v31 }
  0xe6   : > { %3931 = vmatprep.mubr.msk.f32.mxu0 %vm437_vm0, %v771_v30 }
  0xe8   : > { %4004 = vmatmul.mubr.msk.f32.gmra.mrb[44].mxu1 %vm437_vm0, %v820_v33  ;;  %v2989_v33 = vadd.s32 32, %v4838_v53 }
  0xe9   : > { %3932 = vmatmul.mubr.msk.f32.gmra.mrb[44].mxu0 %vm437_vm0, %v772_v32  ;;  %4006 = vmatprep.mubr.msk.f32.mxu1 %vm437_vm0, %v821_v35  ;;  %v4914_v32 = vadd.s32 %v4847_v61, %v2990_v27 }
  0xea   : > { %3934 = vmatprep.mubr.msk.f32.mxu0 %vm437_vm0, %v773_v34 }
  0xeb   : > { %8908 = vst [vmem:[#allocation23_spill] sm:$0xff] %v4914_v32 }
  0xec   : > { %4007 = vmatmul.mubr.msk.f32.gmra.mrb[46].mxu1 %vm437_vm0, %v822_v37 }
  0xed   : > { %3935 = vmatmul.mubr.msk.f32.gmra.mrb[46].mxu0 %vm437_vm0, %v774_v36 }
 0x163   : > { %v3939_v40 = vpop.f32.mrb[0].mxu1 }
 0x164   : > { %v3859_v41 = vpop.f32.mrb[0].mxu0  ;;  %v1167_v42 = vadd.f32 %v3939_v40, %v4830_v39  ;;  %v1161_v43 = vpop.f32.mrb[1].mxu1 }
 0x165   : > { %v600_v44 = vpop.f32.mrb[1].mxu0  ;;  %v1162_v45 = vadd.f32 %v4830_v39, %v1161_v43  ;;  %v606_v46 = vadd.f32 %v3859_v41, %v4830_v39  ;;  %v4934_v41 = vadd.s32 %v4847_v61, %v2989_v33 }
 0x166   : > { %1498 = vrot.lane.b32.xlu1 %v1167_v42, %s4333_s15  ;;  %v601_v47 = vadd.f32 %v4830_v39, %v600_v44  ;;  %v2992_v42 = vadd.s32 56, %v4838_v53 }
 0x167   : > { %1496 = vrot.lane.b32.xlu0 %v1162_v45, %s4333_s15  ;;  %v3942_v48 = vpop.f32.mrb[2].mxu1  ;;  %8909 = vst [vmem:[#allocation24_spill] sm:$0xff] %v4934_v41 }
 0x168   : > { %v3862_v49 = vpop.f32.mrb[2].mxu0  ;;  %v1171_v51 = vpop.f32.mrb[3].mxu1  ;;  %v1177_v54 = vadd.f32 %v3942_v48, %v4830_v39 }
 0x169   : > { %v610_v52 = vpop.f32.mrb[3].mxu0  ;;  %v1172_v55 = vadd.f32 %v4830_v39, %v1171_v51  ;;  %v616_v0 = vadd.f32 %v3862_v49, %v4830_v39  ;;  %v4952_v49 = vadd.s32 %v4847_v61, %v2992_v42 }
 0x16a   : > { %1791 = vperm.xlu1 %4131, %v606_v46   ;;  %v611_v3 = vadd.f32 %v4830_v39, %v610_v52 }
 0x16b   : > { %1786 = vperm.xlu0 %4132, %v601_v47   ;;  %v3945_v56 = vpop.f32.mrb[4].mxu1  ;;  %8910 = vst [vmem:[#allocation25_spill] sm:$0xff] %v4952_v49 }
 0x16c   : > { %v3865_v57 = vpop.f32.mrb[4].mxu0  ;;  %v1181_v59 = vpop.f32.mrb[5].mxu1  ;;  %v1187_v12 = vadd.f32 %v3945_v56, %v4830_v39 }
 0x16d   : > { %v620_v60 = vpop.f32.mrb[5].mxu0  ;;  %v1182_v13 = vadd.f32 %v4830_v39, %v1181_v59  ;;  %v626_v19 = vadd.f32 %v3865_v57, %v4830_v39  ;;  %v2994_v59 = vadd.s32 72, %v4838_v53 }
 0x16e   : > { %1502 = vrot.lane.b32.xlu1 %v1177_v54, %s4333_s15  ;;  %v621_v21 = vadd.f32 %v4830_v39, %v620_v60 }
 0x16f   : > { %1500 = vrot.lane.b32.xlu0 %v1172_v55, %s4333_s15  ;;  %v3948_v4 = vpop.f32.mrb[6].mxu1 }
 0x170   : > { %v3868_v5 = vpop.f32.mrb[6].mxu0  ;;  %v1191_v7 = vpop.f32.mrb[7].mxu1  ;;  %v1197_v28 = vadd.f32 %v3948_v4, %v4830_v39 }
 0x171   : > { %v630_v8 = vpop.f32.mrb[7].mxu0  ;;  %v1192_v29 = vadd.f32 %v4830_v39, %v1191_v7  ;;  %v636_v36 = vadd.f32 %v3868_v5, %v4830_v39  ;;  %v4990_v7 = vadd.s32 %v4847_v61, %v2994_v59 }
 0x172   : > { %1801 = vperm.xlu1 %4131, %v616_v0   ;;  %v631_v37 = vadd.f32 %v4830_v39, %v630_v8  ;;  %v2993_v8 = vadd.s32 64, %v4838_v53 }
 0x173   : > { %1796 = vperm.xlu0 %4132, %v611_v3   ;;  %v3951_v14 = vpop.f32.mrb[8].mxu1  ;;  %8912 = vst [vmem:[#allocation27_spill] sm:$0xff] %v4990_v7 }
 0x174   : > { %v3871_v15 = vpop.f32.mrb[8].mxu0  ;;  %v1201_v16 = vpop.f32.mrb[9].mxu1  ;;  %v1207_v45 = vadd.f32 %v3951_v14, %v4830_v39 }
 0x175   : > { %v640_v17 = vpop.f32.mrb[9].mxu0  ;;  %v1202_v46 = vadd.f32 %v4830_v39, %v1201_v16  ;;  %v646_v54 = vadd.f32 %v3871_v15, %v4830_v39 }
 0x176   : > { %1506 = vrot.lane.b32.xlu1 %v1187_v12, %s4333_s15  ;;  %v641_v55 = vadd.f32 %v4830_v39, %v640_v17  ;;  %v5012_v17 = vadd.s32 %v4847_v61, %v2993_v8 }
 0x177   : > { %1504 = vrot.lane.b32.xlu0 %v1182_v13, %s4333_s15  ;;  %v3954_v22 = vpop.f32.mrb[10].mxu1 }
 0x178   : > { %v4891_v23 = vpop.f32.mrb[10].mxu0  ;;  %v1211_v24 = vpop.f32.mrb[11].mxu1  ;;  %v1217_v1 = vadd.f32 %v3954_v22, %v4830_v39  ;;  %8913 = vst [vmem:[#allocation28_spill] sm:$0xff] %v5012_v17 }
 0x179   : > { %v4897_v25 = vpop.f32.mrb[11].mxu0  ;;  %v1212_v3 = vadd.f32 %v4830_v39, %v1211_v24  ;;  %v656_v13 = vadd.f32 %v4891_v23, %v4830_v39 }
 0x17a   : > { %1811 = vperm.xlu1 %4131, %v626_v19   ;;  %v651_v14 = vadd.f32 %v4830_v39, %v4897_v25  ;;  %v2996_v19 = vadd.s32 88, %v4838_v53 }
 0x17b   : > { %1806 = vperm.xlu0 %4132, %v621_v21   ;;  %v4909_v30 = vpop.f32.mrb[12].mxu1 }
 0x17c   : > { %v4911_v31 = vpop.f32.mrb[12].mxu0  ;;  %v4917_v34 = vpop.f32.mrb[13].mxu1  ;;  %v1227_v22 = vadd.f32 %v4909_v30, %v4830_v39  ;;  %v5032_v27 = vadd.s32 %v4847_v61, %v2996_v19 }
 0x17d   : > { %v4919_v35 = vpop.f32.mrb[13].mxu0  ;;  %v1222_v23 = vadd.f32 %v4830_v39, %v4917_v34  ;;  %v666_v33 = vadd.f32 %v4911_v31, %v4830_v39 }
 0x17e   : > { %1510 = vrot.lane.b32.xlu1 %v1197_v28, %s4333_s15  ;;  %8914 = vst [vmem:[#allocation29_spill] sm:$0xff] %v5032_v27  ;;  %v2995_v28 = vadd.s32 80, %v4838_v53  ;;  %v661_v34 = vadd.f32 %v4830_v39, %v4919_v35 }
 0x17f   : > { %1508 = vrot.lane.b32.xlu0 %v1192_v29, %s4333_s15  ;;  %v4929_v38 = vpop.f32.mrb[14].mxu1 }
 0x180   : > { %v4931_v40 = vpop.f32.mrb[14].mxu0  ;;  %v4937_v43 = vpop.f32.mrb[15].mxu1  ;;  %v5054_v42 = vadd.s32 %v4847_v61, %v2995_v28  ;;  %v1237_v35 = vadd.f32 %v4929_v38, %v4830_v39 }
 0x181   : > { %v4939_v44 = vpop.f32.mrb[15].mxu0  ;;  %v1232_v50 = vadd.f32 %v4830_v39, %v4937_v43  ;;  %v676_v43 = vadd.f32 %v4931_v40, %v4830_v39 }
 0x182   : > { %1821 = vperm.xlu1 %4131, %v636_v36   ;;  %8915 = vst [vmem:[#allocation30_spill] sm:$0xff] %v5054_v42  ;;  %v671_v8 = vadd.f32 %v4830_v39, %v4939_v44  ;;  %v3001_v42 = vadd.s32 128, %v4838_v53 }
 0x183   : > { %1816 = vperm.xlu0 %4132, %v631_v37   ;;  %v4947_v47 = vpop.f32.mrb[16].mxu1 }
 0x184   : > { %v4949_v48 = vpop.f32.mrb[16].mxu0  ;;  %v4955_v51 = vpop.f32.mrb[17].mxu1  ;;  %v1247_v44 = vadd.f32 %v4947_v47, %v4830_v39 }
 0x185   : > { %v4957_v52 = vpop.f32.mrb[17].mxu0  ;;  %v1242_v28 = vadd.f32 %v4830_v39, %v4955_v51  ;;  %v686_v51 = vadd.f32 %v4949_v48, %v4830_v39 }
 0x186   : > { %1514 = vrot.lane.b32.xlu1 %v1207_v45, %s4333_s15  ;;  %v2998_v45 = vadd.s32 104, %v4838_v53 }
 0x187   : > { %1512 = vrot.lane.b32.xlu0 %v1202_v46, %s4333_s15  ;;  %v4967_v56 = vpop.f32.mrb[18].mxu1 }
 0x188   : > { %v4969_v57 = vpop.f32.mrb[18].mxu0  ;;  %v4975_v60 = vpop.f32.mrb[19].mxu1  ;;  %v5074_v59 = vadd.s32 %v4847_v61, %v2998_v45 }
 0x189   : > { %v4977_v0 = vpop.f32.mrb[19].mxu0 }
 0x18a   : > { %1831 = vperm.xlu1 %4131, %v646_v54   ;;  %8916 = vst [vmem:[#allocation31_spill] sm:$0xff] %v5074_v59 }
 0x18b   : > { %1826 = vperm.xlu0 %4132, %v641_v55   ;;  %v4985_v4 = vpop.f32.mrb[20].mxu1 }
 0x18c   : > { %v4987_v5 = vpop.f32.mrb[20].mxu0  ;;  %v4993_v11 = vpop.f32.mrb[21].mxu1 }
 0x18d   : > { %v4995_v12 = vpop.f32.mrb[21].mxu0 }
 0x18e   : > { %1518 = vrot.lane.b32.xlu1 %v1217_v1, %s4333_s15  ;;  %v2997_v1 = vadd.s32 96, %v4838_v53 }
 0x18f   : > { %1516 = vrot.lane.b32.xlu0 %v1212_v3, %s4333_s15  ;;  %v5007_v15 = vpop.f32.mrb[22].mxu1 }
 0x190   : > { %v5009_v16 = vpop.f32.mrb[22].mxu0  ;;  %v5015_v20 = vpop.f32.mrb[23].mxu1  ;;  %v5096_v19 = vadd.s32 %v4847_v61, %v2997_v1  ;;  %v681_v1 = vadd.f32 %v4830_v39, %v4957_v52  ;;  %v1257_v52 = vadd.f32 %v4967_v56, %v4830_v39 }
 0x191   : > { %v5017_v21 = vpop.f32.mrb[23].mxu0 }
 0x192   : > { %1841 = vperm.xlu1 %4131, %v656_v13   ;;  %8917 = vst [vmem:[#allocation32_spill] sm:$0xff] %v5096_v19 }
 0x193   : > { %1836 = vperm.xlu0 %4132, %v651_v14   ;;  %v5027_v24 = vpop.f32.mrb[24].mxu1 }
 0x194   : > { %v5029_v25 = vpop.f32.mrb[24].mxu0  ;;  %v5035_v29 = vpop.f32.mrb[25].mxu1 }
 0x195   : > { %v5037_v30 = vpop.f32.mrb[25].mxu0 }
 0x196   : > { %1522 = vrot.lane.b32.xlu1 %v1227_v22, %s4333_s15  ;;  %v3000_v22 = vadd.s32 120, %v4838_v53 }
 0x197   : > { %1520 = vrot.lane.b32.xlu0 %v1222_v23, %s4333_s15  ;;  %v5049_v36 = vpop.f32.mrb[26].mxu1 }
 0x198   : > { %v5051_v37 = vpop.f32.mrb[26].mxu0  ;;  %v5057_v46 = vpop.f32.mrb[27].mxu1  ;;  %v5116_v45 = vadd.s32 %v4847_v61, %v3000_v22 }
 0x199   : > { %v5059_v31 = vpop.f32.mrb[27].mxu0 }
 0x19a   : > { %1851 = vperm.xlu1 %4131, %v666_v33   ;;  %8918 = vst [vmem:[#allocation33_spill] sm:$0xff] %v5116_v45 }
 0x19b   : > { %1846 = vperm.xlu0 %4132, %v661_v34   ;;  %v5069_v54 = vpop.f32.mrb[28].mxu1 }
 0x19c   : > { %v5071_v55 = vpop.f32.mrb[28].mxu0  ;;  %v5077_v3 = vpop.f32.mrb[29].mxu1 }
 0x19d   : > { %v5079_v38 = vpop.f32.mrb[29].mxu0 }
 0x19e   : > { %1526 = vrot.lane.b32.xlu1 %v1237_v35, %s4333_s15  ;;  %v2999_v35 = vadd.s32 112, %v4838_v53 }
 0x19f   : > { %1524 = vrot.lane.b32.xlu0 %v1232_v50, %s4333_s15  ;;  %v5091_v13 = vpop.f32.mrb[30].mxu1 }
 0x1a0   : > { %v5093_v14 = vpop.f32.mrb[30].mxu0  ;;  %v5099_v23 = vpop.f32.mrb[31].mxu1  ;;  %v5138_v22 = vadd.s32 %v4847_v61, %v2999_v35 }
 0x1a1   : > { %v5101_v40 = vpop.f32.mrb[31].mxu0 }
 0x1a2   : > { %1861 = vperm.xlu1 %4131, %v676_v43   ;;  %8919 = vst [vmem:[#allocation34_spill] sm:$0xff] %v5138_v22 }
 0x1a3   : > { %1856 = vperm.xlu0 %4132, %v671_v8   ;;  %v5113_v34 = vpop.f32.mrb[32].mxu1 }
 0x1a4   : > { %v5111_v33 = vpop.f32.mrb[32].mxu0  ;;  %v5121_v47 = vpop.f32.mrb[33].mxu1 }
 0x1a5   : > { %v5119_v50 = vpop.f32.mrb[33].mxu0 }
 0x1a6   : > { %1530 = vrot.lane.b32.xlu1 %v1247_v44, %s4333_s15  ;;  %v3002_v44 = vadd.s32 136, %v4838_v53 }
 0x1a7   : > { %1528 = vrot.lane.b32.xlu0 %v1242_v28, %s4333_s15  ;;  %v5135_v8 = vpop.f32.mrb[34].mxu1  ;;  %v1252_v28 = vadd.f32 %v4830_v39, %v4975_v60  ;;  %v696_v60 = vadd.f32 %v4969_v57, %v4830_v39 }
 0x1a8   : > { %v5133_v43 = vpop.f32.mrb[34].mxu0  ;;  %v5143_v48 = vpop.f32.mrb[35].mxu1  ;;  %v5158_v19 = vadd.s32 %v4847_v61, %v3002_v44 }
 0x1a9   : > { %v5141_v59 = vpop.f32.mrb[35].mxu0 }
 0x1aa   : > { %1871 = vperm.xlu1 %4131, %v686_v51   ;;  %8920 = vst [vmem:[#allocation35_spill] sm:$0xff] %v5158_v19  ;;  %v5173_v51 = vadd.s32 %v4847_v61, %v3001_v42  ;;  %v1262_v42 = vadd.f32 %v4830_v39, %v4993_v11  ;;  %v5215_v11 = vadd.s32 %v4847_v61, %v3003_v58 }
 0x1ab   : > { %1866 = vperm.xlu0 %4132, %v681_v1   ;;  %v5155_v45 = vpop.f32.mrb[36].mxu1  ;;  %v691_v1 = vadd.f32 %v4830_v39, %v4977_v0  ;;  %v1267_v0 = vadd.f32 %v4985_v4, %v4830_v39  ;;  %v706_v4 = vadd.f32 %v4987_v5, %v4830_v39  ;;  %v1277_v58 = vadd.f32 %v5007_v15, %v4830_v39 }
 0x1ac   : > { %v5153_v35 = vpop.f32.mrb[36].mxu0  ;;  %v5163_v56 = vpop.f32.mrb[37].mxu1  ;;  %8921 = vst [vmem:[#allocation36_spill] sm:$0xff] %v5173_v51  ;;  %8923 = vst [vmem:[#allocation38_spill] sm:$0xff] %v5215_v11  ;;  %v716_v15 = vadd.f32 %v5009_v16, %v4830_v39 }
 0x1ad   : > { %v5161_v27 = vpop.f32.mrb[37].mxu0 }
 0x1ae   : > { %1534 = vrot.lane.b32.xlu1 %v1257_v52, %s4333_s15  ;;  %v3004_v52 = vadd.s32 152, %v4838_v53 }
 0x1af   : > { %1532 = vrot.lane.b32.xlu0 %v1252_v28, %s4333_s15  ;;  %v5180_v22 = vpop.f32.mrb[38].mxu1 }
 0x1b0   : > { %v5178_v44 = vpop.f32.mrb[38].mxu0  ;;  %v5185_v57 = vpop.f32.mrb[39].mxu1  ;;  %v5200_v17 = vadd.s32 %v4847_v61, %v3004_v52 }
 0x1b1   : > { %v5183_v7 = vpop.f32.mrb[39].mxu0 }
 0x1b2   : > { %1881 = vperm.xlu1 %4131, %v696_v60   ;;  %8922 = vst [vmem:[#allocation37_spill] sm:$0xff] %v5200_v17  ;;  %v701_v60 = vadd.f32 %v4830_v39, %v4995_v12  ;;  %v1272_v12 = vadd.f32 %v4830_v39, %v5015_v20  ;;  %v5257_v20 = vadd.s32 %v4847_v61, %v3005_v26 }
 0x1b3   : > { %1876 = vperm.xlu0 %4132, %v691_v1   ;;  %v5197_v19 = vpop.f32.mrb[40].mxu1  ;;  %v1287_v26 = vadd.f32 %v5027_v24, %v4830_v39  ;;  %v726_v24 = vadd.f32 %v5029_v25, %v4830_v39  ;;  %v3009_v25 = vadd.s32 192, %v4838_v53 }
 0x1b4   : > { %v5195_v28 = vpop.f32.mrb[40].mxu0  ;;  %v5205_v51 = vpop.f32.mrb[41].mxu1  ;;  %8925 = vst [vmem:[#allocation40_spill] sm:$0xff] %v5257_v20  ;;  %v2231_v20 = vld [vmem:[%s5583_s16 + $0x78] sm:$0xff] }
 0x1b5   : > { %v5203_v49 = vpop.f32.mrb[41].mxu0 }
 0x1b6   : > { %1538 = vrot.lane.b32.xlu1 %v1267_v0, %s4333_s15  ;;  %v3006_v0 = vadd.s32 168, %v4838_v53 }
 0x1b7   : > { %1536 = vrot.lane.b32.xlu0 %v1262_v42, %s4333_s15  ;;  %v5222_v52 = vpop.f32.mrb[42].mxu1 }
 0x1b8   : > { %v5220_v1 = vpop.f32.mrb[42].mxu0  ;;  %v5227_v5 = vpop.f32.mrb[43].mxu1  ;;  %v5242_v41 = vadd.s32 %v4847_v61, %v3006_v0 }
 0x1b9   : > { %v5225_v32 = vpop.f32.mrb[43].mxu0 }
 0x1ba   : > { %1891 = vperm.xlu1 %4131, %v706_v4   ;;  %8924 = vst [vmem:[#allocation39_spill] sm:$0xff] %v5242_v41  ;;  %v711_v4 = vadd.f32 %v4830_v39, %v5017_v21  ;;  %v1282_v21 = vadd.f32 %v4830_v39, %v5035_v29  ;;  %v3007_v41 = vadd.s32 176, %v4838_v53  ;;  %v721_v29 = vadd.f32 %v4830_v39, %v5037_v30 }
 0x1bb   : > { %1886 = vperm.xlu0 %4132, %v701_v60   ;;  %v5239_v17 = vpop.f32.mrb[44].mxu1  ;;  %v1292_v30 = vadd.f32 %v4830_v39, %v5057_v46  ;;  %v3012_v46 = vadd.s32 216, %v4838_v53 }
 0x1bc   : > { %v5237_v42 = vpop.f32.mrb[44].mxu0  ;;  %v5247_v11 = vpop.f32.mrb[45].mxu1 }
 0x1bd   : > { %v5245_v18 = vpop.f32.mrb[45].mxu0 }
 0x1be   : > { %1542 = vrot.lane.b32.xlu1 %v1277_v58, %s4333_s15  ;;  %v3008_v58 = vadd.s32 184, %v4838_v53 }
 0x1bf   : > { %1540 = vrot.lane.b32.xlu0 %v1272_v12, %s4333_s15  ;;  %v5264_v0 = vpop.f32.mrb[46].mxu1 }
 0x1c0   : > { %v5262_v60 = vpop.f32.mrb[46].mxu0  ;;  %v5269_v16 = vpop.f32.mrb[47].mxu1  ;;  %v5280_v12 = vadd.s32 %v4847_v61, %v3008_v58 }
 0x1c1   : > { %v5267_v6 = vpop.f32.mrb[47].mxu0 }
 0x1c2   : > { %1901 = vperm.xlu1 %4131, %v716_v15   ;;  %8926 = vst [vmem:[#allocation41_spill] sm:$0xff] %v5280_v12  ;;  %v5291_v15 = vadd.s32 %v4847_v61, %v3007_v41  ;;  %v1297_v41 = vadd.f32 %v5049_v36, %v4830_v39  ;;  %v731_v36 = vadd.f32 %v4830_v39, %v5059_v31  ;;  %v2230_v12 = vld [vmem:[%s5583_s16 + $0x70] sm:$0xff] }
 0x1c3   : > { %1896 = vperm.xlu0 %4132, %v711_v4   ;;  %v3010_v4 = vadd.s32 200, %v4838_v53 }
 0x1c4   : > { %8927 = vst [vmem:[#allocation42_spill] sm:$0xff] %v5291_v15  ;;  %v2229_v15 = vld [vmem:[%s5583_s16 + $0x68] sm:$0xff] }
 0x1c5   : > { %v5302_v58 = vadd.s32 %v4847_v61, %v3010_v4  ;;  %v1302_v4 = vadd.f32 %v4830_v39, %v5077_v3  ;;  %v3014_v3 = vadd.s32 232, %v4838_v53 }
 0x1c6   : > { %1546 = vrot.lane.b32.xlu1 %v1287_v26, %s4333_s15  ;;  %v5314_v26 = vadd.s32 %v4847_v61, %v3009_v25  ;;  %v746_v25 = vadd.f32 %v5071_v55, %v4830_v39  ;;  %v1317_v55 = vadd.f32 %v5091_v13, %v4830_v39  ;;  %v1087_v13 = vadd.f32 %v5111_v33, %v4830_v39 }
 0x1c7   : > { %1544 = vrot.lane.b32.xlu0 %v1282_v21, %s4333_s15  ;;  %8928 = vst [vmem:[#allocation43_spill] sm:$0xff] %v5302_v58  ;;  %v736_v21 = vadd.f32 %v5051_v37, %v4830_v39  ;;  %v1307_v37 = vadd.f32 %v5069_v54, %v4830_v39  ;;  %v741_v54 = vadd.f32 %v4830_v39, %v5079_v38 }
 0x1c8   : > { %8929 = vst [vmem:[#allocation44_spill] sm:$0xff] %v5314_v26  ;;  %v1337_v33 = vadd.f32 %v5135_v8, %v4830_v39  ;;  %v2228_v26 = vld [vmem:[%s5583_s16 + $0x60] sm:$0xff] }
 0x1ca   : > { %1911 = vperm.xlu1 %4131, %v726_v24   ;;  %v5328_v24 = vadd.s32 %v4847_v61, %v3012_v46 }
 0x1cb   : > { %1906 = vperm.xlu0 %4132, %v721_v29   ;;  %v3011_v29 = vadd.s32 208, %v4838_v53 }
 0x1cc   : > { %8930 = vst [vmem:[#allocation45_spill] sm:$0xff] %v5328_v24 }
 0x1cd   : > { %v5340_v31 = vadd.s32 %v4847_v61, %v3011_v29 }
 0x1ce   : > { %1550 = vrot.lane.b32.xlu1 %v1297_v41, %s4333_s15  ;;  %v5354_v41 = vadd.s32 %v4847_v61, %v3014_v3  ;;  %v1102_v3 = vadd.f32 %v4830_v39, %v5161_v27  ;;  %v1117_v27 = vadd.f32 %v5178_v44, %v4830_v39  ;;  %v1352_v44 = vadd.f32 %v4830_v39, %v5185_v57 }
 0x1cf   : > { %1548 = vrot.lane.b32.xlu0 %v1292_v30, %s4333_s15  ;;  %8931 = vst [vmem:[#allocation46_spill] sm:$0xff] %v5340_v31  ;;  %v3013_v30 = vadd.s32 224, %v4838_v53  ;;  %v1367_v57 = vadd.f32 %v5197_v19, %v4830_v39  ;;  %v1132_v19 = vadd.f32 %v4830_v39, %v5225_v32  ;;  %v1147_v32 = vadd.f32 %v5237_v42, %v4830_v39 }
 0x1d0   : > { %8932 = vst [vmem:[#allocation47_spill] sm:$0xff] %v5354_v41  ;;  %v1382_v42 = vadd.f32 %v4830_v39, %v5247_v11  ;;  %v1397_v11 = vadd.f32 %v5264_v0, %v4830_v39 }
 0x1d1   : > { %v5366_v38 = vadd.s32 %v4847_v61, %v3013_v30 }
 0x1d2   : > { %1921 = vperm.xlu1 %4131, %v736_v21   ;;  %v1312_v21 = vadd.f32 %v4830_v39, %v5099_v23  ;;  %v1097_v23 = vadd.f32 %v5133_v43, %v4830_v39 }
 0x1d3   : > { %1916 = vperm.xlu0 %4132, %v731_v36   ;;  %8933 = vst [vmem:[#allocation48_spill] sm:$0xff] %v5366_v38  ;;  %v1327_v36 = vadd.f32 %v5113_v34, %v4830_v39  ;;  %v1082_v34 = vadd.f32 %v4830_v39, %v5119_v50  ;;  %v1092_v50 = vadd.f32 %v4830_v39, %v5141_v59 }
 0x1d4   : > { %v1347_v59 = vadd.f32 %v5155_v45, %v4830_v39  ;;  %v1112_v45 = vadd.f32 %v4830_v39, %v5183_v7  ;;  %v1127_v7 = vadd.f32 %v5195_v28, %v4830_v39  ;;  %v1362_v28 = vadd.f32 %v4830_v39, %v5205_v51 }
 0x1d5   : > { %v1377_v51 = vadd.f32 %v5222_v52, %v4830_v39  ;;  %v1142_v52 = vadd.f32 %v4830_v39, %v5245_v18  ;;  %v1157_v18 = vadd.f32 %v5262_v60, %v4830_v39  ;;  %v1392_v60 = vadd.f32 %v4830_v39, %v5269_v16 }
 0x1d6   : > { %1554 = vrot.lane.b32.xlu1 %v1307_v37, %s4333_s15  ;;  %v1322_v37 = vadd.f32 %v4830_v39, %v5121_v47 }
 0x1d7   : > { %1552 = vrot.lane.b32.xlu0 %v1302_v4, %s4333_s15 }
 0x1d8   : > { %v5382_v46 = vpop.permute.xlu1 %1498 }
 0x1d9   : > { %v5386_v29 = vpop.permute.xlu0 %1496 }
 0x1da   : > { %1931 = vperm.xlu1 %4131, %v746_v25   ;;  %v1332_v25 = vadd.f32 %v4830_v39, %v5143_v48 }
 0x1db   : > { %1926 = vperm.xlu0 %4132, %v741_v54   ;;  %v1107_v54 = vadd.f32 %v5153_v35, %v4830_v39  ;;  %v1342_v35 = vadd.f32 %v4830_v39, %v5163_v56  ;;  %v1357_v56 = vadd.f32 %v5180_v22, %v4830_v39  ;;  %v1122_v22 = vadd.f32 %v4830_v39, %v5203_v49 }
 0x1dc   : > { %v1137_v49 = vadd.f32 %v5220_v1, %v4830_v39  ;;  %v1372_v1 = vadd.f32 %v4830_v39, %v5227_v5  ;;  %v1387_v5 = vadd.f32 %v5239_v17, %v4830_v39  ;;  %v1152_v17 = vadd.f32 %v4830_v39, %v5267_v6 }
 0x1de   : > { %1558 = vrot.lane.b32.xlu1 %v1317_v55, %s4333_s15 }
 0x1df   : > { %1556 = vrot.lane.b32.xlu0 %v1312_v21, %s4333_s15 }
 0x1e2   : > { %1562 = vrot.lane.b32.xlu1 %v1327_v36, %s4333_s15 }
 0x1e3   : > { %1466 = vrot.lane.b32.xlu0 %v1087_v13, %s4333_s15 }
 0x1e6   : > { %1470 = vrot.lane.b32.xlu1 %v1097_v23, %s4333_s15 }
 0x1e7   : > { %1464 = vrot.lane.b32.xlu0 %v1082_v34, %s4333_s15 }
 0x1e9   : > { %v5394_v43 = vpop.permute.xlu1 %1791 }
 0x1ea   : > { %8934 = vst [vmem:[#allocation49_spill] sm:$0xff] %v5394_v43  ;;  %1566 = vrot.lane.b32.xlu1 %v1337_v33, %s4333_s15  ;;  %v5397_v4 = vpop.permute.xlu0 %1786 }
 0x1eb   : > { %8935 = vst [vmem:[#allocation50_spill] sm:$0xff] %v5397_v4  ;;  %1560 = vrot.lane.b32.xlu0 %v1322_v37, %s4333_s15 }
 0x1ed   : > { %v5404_v8 = vpop.permute.xlu1 %1502 }
 0x1ee   : > { %1468 = vrot.lane.b32.xlu1 %v1092_v50, %s4333_s15  ;;  %v5409_v47 = vpop.permute.xlu0 %1500 }
 0x1ef   : > { %1564 = vrot.lane.b32.xlu0 %v1332_v25, %s4333_s15 }
 0x1f1   : > { %v5414_v30 = vpop.permute.xlu1 %1801 }
 0x1f2   : > { %8936 = vst [vmem:[#allocation51_spill] sm:$0xff] %v5414_v30  ;;  %1474 = vrot.lane.b32.xlu1 %v1107_v54, %s4333_s15  ;;  %v5419_v48 = vpop.permute.xlu0 %1796 }
 0x1f3   : > { %8937 = vst [vmem:[#allocation52_spill] sm:$0xff] %v5419_v48  ;;  %1472 = vrot.lane.b32.xlu0 %v1102_v3, %s4333_s15 }
 0x1f5   : > { %v5424_v55 = vpop.permute.xlu1 %1506 }
 0x1f6   : > { %1570 = vrot.lane.b32.xlu1 %v1347_v59, %s4333_s15  ;;  %v5429_v21 = vpop.permute.xlu0 %1504 }
 0x1f7   : > { %1568 = vrot.lane.b32.xlu0 %v1342_v35, %s4333_s15 }
 0x1f9   : > { %v5434_v36 = vpop.permute.xlu1 %1811 }
 0x1fa   : > { %8938 = vst [vmem:[#allocation53_spill] sm:$0xff] %v5434_v36  ;;  %1478 = vrot.lane.b32.xlu1 %v1117_v27, %s4333_s15  ;;  %v5439_v13 = vpop.permute.xlu0 %1806 }
 0x1fb   : > { %8939 = vst [vmem:[#allocation54_spill] sm:$0xff] %v5439_v13  ;;  %1476 = vrot.lane.b32.xlu0 %v1112_v45, %s4333_s15 }
 0x1fd   : > { %v5444_v23 = vpop.permute.xlu1 %1510 }
 0x1fe   : > { %1574 = vrot.lane.b32.xlu1 %v1357_v56, %s4333_s15  ;;  %v5449_v34 = vpop.permute.xlu0 %1508 }
 0x1ff   : > { %1572 = vrot.lane.b32.xlu0 %v1352_v44, %s4333_s15 }
 0x201   : > { %v5454_v33 = vpop.permute.xlu1 %1821 }
 0x202   : > { %8940 = vst [vmem:[#allocation55_spill] sm:$0xff] %v5454_v33  ;;  %1482 = vrot.lane.b32.xlu1 %v1127_v7, %s4333_s15  ;;  %v5459_v37 = vpop.permute.xlu0 %1816 }
 0x203   : > { %8941 = vst [vmem:[#allocation56_spill] sm:$0xff] %v5459_v37  ;;  %1480 = vrot.lane.b32.xlu0 %v1122_v22, %s4333_s15 }
 0x205   : > { %v5464_v50 = vpop.permute.xlu1 %1514 }
 0x206   : > { %1578 = vrot.lane.b32.xlu1 %v1367_v57, %s4333_s15  ;;  %v5469_v25 = vpop.permute.xlu0 %1512 }
 0x207   : > { %1576 = vrot.lane.b32.xlu0 %v1362_v28, %s4333_s15 }
 0x209   : > { %v5474_v54 = vpop.permute.xlu1 %1831 }
 0x20a   : > { %8942 = vst [vmem:[#allocation57_spill] sm:$0xff] %v5474_v54  ;;  %1486 = vrot.lane.b32.xlu1 %v1137_v49, %s4333_s15  ;;  %v5479_v3 = vpop.permute.xlu0 %1826  ;;  %v2266_v54 = vld [vmem:[%s5583_s16 + $0x190] sm:$0xff] }
 0x20b   : > { %8943 = vst [vmem:[#allocation58_spill] sm:$0xff] %v5479_v3  ;;  %1484 = vrot.lane.b32.xlu0 %v1132_v19, %s4333_s15 }
 0x20d   : > { %v5484_v59 = vpop.permute.xlu1 %1518 }
 0x20e   : > { %1582 = vrot.lane.b32.xlu1 %v1377_v51, %s4333_s15  ;;  %v5489_v35 = vpop.permute.xlu0 %1516 }
 0x20f   : > { %1580 = vrot.lane.b32.xlu0 %v1372_v1, %s4333_s15 }
 0x211   : > { %v5494_v27 = vpop.permute.xlu1 %1841 }
 0x212   : > { %8944 = vst [vmem:[#allocation59_spill] sm:$0xff] %v5494_v27  ;;  %1490 = vrot.lane.b32.xlu1 %v1147_v32, %s4333_s15  ;;  %v5499_v45 = vpop.permute.xlu0 %1836  ;;  %v2248_v27 = vld [vmem:[%s5583_s16 + $0x100] sm:$0xff] }
 0x213   : > { %8945 = vst [vmem:[#allocation60_spill] sm:$0xff] %v5499_v45  ;;  %1488 = vrot.lane.b32.xlu0 %v1142_v52, %s4333_s15  ;;  %v2265_v45 = vld [vmem:[%s5583_s16 + $0x188] sm:$0xff] }
 0x215   : > { %v5504_v56 = vpop.permute.xlu1 %1522 }
 0x216   : > { %1586 = vrot.lane.b32.xlu1 %v1387_v5, %s4333_s15  ;;  %v5509_v44 = vpop.permute.xlu0 %1520 }
 0x217   : > { %1584 = vrot.lane.b32.xlu0 %v1382_v42, %s4333_s15 }
 0x219   : > { %v5514_v7 = vpop.permute.xlu1 %1851 }
 0x21a   : > { %8946 = vst [vmem:[#allocation61_spill] sm:$0xff] %v5514_v7  ;;  %1494 = vrot.lane.b32.xlu1 %v1157_v18, %s4333_s15  ;;  %v5519_v22 = vpop.permute.xlu0 %1846  ;;  %v2107_v7 = vld [vmem:[%s4608_s11 + $0x98] sm:$0xff] }
 0x21b   : > { %8947 = vst [vmem:[#allocation62_spill] sm:$0xff] %v5519_v22  ;;  %1492 = vrot.lane.b32.xlu0 %v1152_v17, %s4333_s15  ;;  %v2232_v22 = vld [vmem:[%s5583_s16 + $0x80] sm:$0xff] }
 0x21d   : > { %v5524_v57 = vpop.permute.xlu1 %1526 }
 0x21e   : > { %1590 = vrot.lane.b32.xlu1 %v1397_v11, %s4333_s15  ;;  %v5527_v6 = vpop.permute.xlu0 %1524 }
 0x21f   : > { %1588 = vrot.lane.b32.xlu0 %v1392_v60, %s4333_s15 }
 0x221   : > { %v5530_v28 = vpop.permute.xlu1 %1861 }
 0x222   : > { %8948 = vst [vmem:[#allocation63_spill] sm:$0xff] %v5530_v28  ;;  %v5532_v0 = vpop.permute.xlu0 %1856  ;;  %v2238_v28 = vld [vmem:[%s5583_s16 + $0xb0] sm:$0xff] }
 0x223   : > { %8949 = vst [vmem:[#allocation64_spill] sm:$0xff] %v5532_v0  ;;  %v2239_v0 = vld [vmem:[%s5583_s16 + $0xb8] sm:$0xff] }
 0x225   : > { %v1531_v49 = vpop.permute.xlu1 %1530 }
 0x226   : > { %v1529_v19 = vpop.permute.xlu0 %1528 }
 0x229   : > { %v5534_v51 = vpop.permute.xlu1 %1871 }
 0x22a   : > { %8950 = vst [vmem:[#allocation65_spill] sm:$0xff] %v5534_v51  ;;  %v5536_v1 = vpop.permute.xlu0 %1866  ;;  %v2236_v51 = vld [vmem:[%s5583_s16 + $0xa0] sm:$0xff] }
 0x22b   : > { %8951 = vst [vmem:[#allocation66_spill] sm:$0xff] %v5536_v1  ;;  %v2237_v1 = vld [vmem:[%s5583_s16 + $0xa8] sm:$0xff] }
 0x22d   : > { %v1535_v39 = vpop.permute.xlu1 %1534 }
 0x22e   : > { %v1533_v16 = vpop.permute.xlu0 %1532 }
 0x231   : > { %v5538_v32 = vpop.permute.xlu1 %1881 }
 0x232   : > { %8952 = vst [vmem:[#allocation67_spill] sm:$0xff] %v5538_v32  ;;  %v5540_v52 = vpop.permute.xlu0 %1876  ;;  %v2110_v32 = vld [vmem:[%s4608_s11 + $0xb0] sm:$0xff] }
 0x233   : > { %8953 = vst [vmem:[#allocation68_spill] sm:$0xff] %v5540_v52  ;;  %v2111_v52 = vld [vmem:[%s4608_s11 + $0xb8] sm:$0xff] }
 0x235   : > { %v1539_v5 = vpop.permute.xlu1 %1538 }
 0x236   : > { %v1537_v42 = vpop.permute.xlu0 %1536 }
 0x239   : > { %v5542_v18 = vpop.permute.xlu1 %1891 }
 0x23a   : > { %8954 = vst [vmem:[#allocation69_spill] sm:$0xff] %v5542_v18  ;;  %v5544_v17 = vpop.permute.xlu0 %1886  ;;  %v2108_v18 = vld [vmem:[%s4608_s11 + $0xa0] sm:$0xff] }
 0x23b   : > { %8955 = vst [vmem:[#allocation70_spill] sm:$0xff] %v5544_v17  ;;  %v2109_v17 = vld [vmem:[%s4608_s11 + $0xa8] sm:$0xff] }
 0x23d   : > { %v1543_v11 = vpop.permute.xlu1 %1542  ;;  %1720 = vxpose.xlu0.b32.start [1/16] (narrow) %v1529_v19, 8 }
 0x23e   : > { %v1541_v60 = vpop.permute.xlu0 %1540 }
 0x241   : > { %v5546_v9 = vpop.permute.xlu1 %1901  ;;  %1721 = vxpose.xlu0.b32.cont [2/16] (narrow) %v1531_v49, 8 }
 0x242   : > { %8956 = vst [vmem:[#allocation71_spill] sm:$0xff] %v5546_v9  ;;  %v5548_v2 = vpop.permute.xlu0 %1896 }
 0x243   : > { %8957 = vst [vmem:[#allocation72_spill] sm:$0xff] %v5548_v2 }
 0x245   : > { %v1547_v61 = vpop.permute.xlu1 %1546  ;;  %1722 = vxpose.xlu0.b32.cont [3/16] (narrow) %v1533_v16, 8 }
 0x246   : > { %v1545_v41 = vpop.permute.xlu0 %1544 }
 0x247   : > { %1688 = vxpose.xlu1.b32.start [1/16] (narrow) %v5386_v29, 8 }
 0x249   : > { %v5551_v38 = vpop.permute.xlu1 %1911  ;;  %1723 = vxpose.xlu0.b32.cont [4/16] (narrow) %v1535_v39, 8 }
 0x24a   : > { %8958 = vst [vmem:[#allocation73_spill] sm:$0xff] %v5551_v38  ;;  %v5553_v31 = vpop.permute.xlu0 %1906  ;;  %v2226_v38 = vld [vmem:[%s5583_s16 + $0x50] sm:$0xff] }
 0x24b   : > { %8959 = vst [vmem:[#allocation74_spill] sm:$0xff] %v5553_v31  ;;  %1689 = vxpose.xlu1.b32.cont [2/16] (narrow) %v5382_v46, 8  ;;  %v2227_v31 = vld [vmem:[%s5583_s16 + $0x58] sm:$0xff] }
 0x24d   : > { %v1551_v24 = vpop.permute.xlu1 %1550  ;;  %1724 = vxpose.xlu0.b32.cont [5/16] (narrow) %v1537_v42, 8 }
 0x24e   : > { %v1549_v19 = vpop.permute.xlu0 %1548 }
 0x24f   : > { %1690 = vxpose.xlu1.b32.cont [3/16] (narrow) %v5409_v47, 8 }
 0x251   : > { %v5557_v49 = vpop.permute.xlu1 %1921  ;;  %1725 = vxpose.xlu0.b32.cont [6/16] (narrow) %v1539_v5, 8 }
 0x252   : > { %8960 = vst [vmem:[#allocation75_spill] sm:$0xff] %v5557_v49  ;;  %v5559_v58 = vpop.permute.xlu0 %1916  ;;  %v2224_v49 = vld [vmem:[%s5583_s16 + $0x40] sm:$0xff] }
 0x253   : > { %8961 = vst [vmem:[#allocation76_spill] sm:$0xff] %v5559_v58  ;;  %1691 = vxpose.xlu1.b32.cont [4/16] (narrow) %v5404_v8, 8  ;;  %v2225_v58 = vld [vmem:[%s5583_s16 + $0x48] sm:$0xff] }
 0x255   : > { %v1555_v29 = vpop.permute.xlu1 %1554  ;;  %1726 = vxpose.xlu0.b32.cont [7/16] (narrow) %v1541_v60, 8 }
 0x256   : > { %v1553_v16 = vpop.permute.xlu0 %1552 }
 0x257   : > { %1692 = vxpose.xlu1.b32.cont [5/16] (narrow) %v5429_v21, 8 }
 0x259   : > { %v5563_v39 = vpop.permute.xlu1 %1931  ;;  %1727 = vxpose.xlu0.b32.cont [8/16] (narrow) %v1543_v11, 8 }
 0x25a   : > { %8962 = vst [vmem:[#allocation77_spill] sm:$0xff] %v5563_v39  ;;  %v5565_v46 = vpop.permute.xlu0 %1926  ;;  %v2097_v39 = vld [vmem:[%s4608_s11 + $0x48] sm:$0xff] }
 0x25b   : > { %8963 = vst [vmem:[#allocation78_spill] sm:$0xff] %v5565_v46  ;;  %1693 = vxpose.xlu1.b32.cont [6/16] (narrow) %v5424_v55, 8  ;;  %v2099_v46 = vld [vmem:[%s4608_s11 + $0x58] sm:$0xff] }
 0x25d   : > { %1728 = vxpose.xlu0.b32.cont [9/16] (narrow) %v1545_v41, 8  ;;  %v1559_v47 = vpop.permute.xlu1 %1558 }
 0x25e   : > { %v1557_v42 = vpop.permute.xlu0 %1556 }
 0x25f   : > { %1694 = vxpose.xlu1.b32.cont [7/16] (narrow) %v5449_v34, 8 }
 0x261   : > { %1729 = vxpose.xlu0.b32.cont [10/16] (narrow) %v1547_v61, 8  ;;  %v1563_v8 = vpop.permute.xlu1 %1562 }
 0x262   : > { %v1467_v5 = vpop.permute.xlu0 %1466 }
 0x263   : > { %1695 = vxpose.xlu1.b32.cont [8/16] (narrow) %v5444_v23, 8 }
 0x265   : > { %1730 = vxpose.xlu0.b32.cont [11/16] (narrow) %v1549_v19, 8  ;;  %v1471_v21 = vpop.permute.xlu1 %1470 }
 0x266   : > { %v1465_v60 = vpop.permute.xlu0 %1464 }
 0x267   : > { %1696 = vxpose.xlu1.b32.cont [9/16] (narrow) %v5469_v25, 8 }
 0x269   : > { %1731 = vxpose.xlu0.b32.cont [12/16] (narrow) %v1551_v24, 8  ;;  %v1567_v41 = vpop.permute.xlu1 %1566 }
 0x26a   : > { %v1561_v11 = vpop.permute.xlu0 %1560 }
 0x26b   : > { %1697 = vxpose.xlu1.b32.cont [10/16] (narrow) %v5464_v50, 8 }
 0x26d   : > { %1732 = vxpose.xlu0.b32.cont [13/16] (narrow) %v1553_v16, 8  ;;  %v1469_v61 = vpop.permute.xlu1 %1468 }
 0x26e   : > { %v1565_v55 = vpop.permute.xlu0 %1564 }
 0x26f   : > { %1698 = vxpose.xlu1.b32.cont [11/16] (narrow) %v5489_v35, 8 }
 0x271   : > { %1733 = vxpose.xlu0.b32.cont [14/16] (narrow) %v1555_v29, 8  ;;  %v1475_v24 = vpop.permute.xlu1 %1474 }
 0x272   : > { %v1473_v23 = vpop.permute.xlu0 %1472 }
 0x273   : > { %1699 = vxpose.xlu1.b32.cont [12/16] (narrow) %v5484_v59, 8 }
 0x275   : > { %1734 = vxpose.xlu0.b32.cont [15/16] (narrow) %v1557_v42, 8  ;;  %v1571_v50 = vpop.permute.xlu1 %1570 }
 0x276   : > { %v1569_v34 = vpop.permute.xlu0 %1568 }
 0x277   : > { %1700 = vxpose.xlu1.b32.cont [13/16] (narrow) %v5509_v44, 8 }
 0x279   : > { %1735 = vxpose.xlu0.b32.end [16/16] (narrow) %v1559_v47, 8  ;;  %v1479_v59 = vpop.permute.xlu1 %1478 }
 0x27a   : > { %v1477_v25 = vpop.permute.xlu0 %1476 }
 0x27b   : > { %1701 = vxpose.xlu1.b32.cont [14/16] (narrow) %v5504_v56, 8 }
 0x27d   : > { %1656 = vxpose.xlu0.b32.start [1/16] (narrow) %v1465_v60, 8  ;;  %v1575_v44 = vpop.permute.xlu1 %1574 }
 0x27e   : > { %v1573_v35 = vpop.permute.xlu0 %1572 }
 0x27f   : > { %1702 = vxpose.xlu1.b32.cont [15/16] (narrow) %v5527_v6, 8 }
 0x281   : > { %1657 = vxpose.xlu0.b32.cont [2/16] (narrow) %v1467_v5, 8  ;;  %v1483_v19 = vpop.permute.xlu1 %1482 }
 0x282   : > { %v1481_v56 = vpop.permute.xlu0 %1480 }
 0x283   : > { %1703 = vxpose.xlu1.b32.end [16/16] (narrow) %v5524_v57, 8 }
 0x285   : > { %1658 = vxpose.xlu0.b32.cont [3/16] (narrow) %v1469_v61, 8  ;;  %v1579_v29 = vpop.permute.xlu1 %1578  ;;  %v2220_v61 = vld [vmem:[%s5583_s16 + $0x20] sm:$0xff] }
 0x286   : > { %v1577_v6 = vpop.permute.xlu0 %1576 }
 0x287   : > { %1752 = vxpose.xlu1.b32.start [1/16] (narrow) %v1561_v11, 8 }
 0x289   : > { %1659 = vxpose.xlu0.b32.cont [4/16] (narrow) %v1471_v21, 8  ;;  %v1487_v16 = vpop.permute.xlu1 %1486 }
 0x28a   : > { %v1485_v57 = vpop.permute.xlu0 %1484 }
 0x28b   : > { %1753 = vxpose.xlu1.b32.cont [2/16] (narrow) %v1563_v8, 8 }
 0x28d   : > { %1660 = vxpose.xlu0.b32.cont [5/16] (narrow) %v1473_v23, 8  ;;  %v1583_v42 = vpop.permute.xlu1 %1582  ;;  %v2221_v23 = vld [vmem:[%s5583_s16 + $0x28] sm:$0xff] }
 0x28e   : > { %v1581_v47 = vpop.permute.xlu0 %1580 }
 0x28f   : > { %1754 = vxpose.xlu1.b32.cont [3/16] (narrow) %v1565_v55, 8  ;;  %v2093_v55 = vld [vmem:[%s4608_s11 + $0x28] sm:$0xff] }
 0x290   : > { %v5619_v2 = vmul.f32 %v2221_v23, %v2093_v55  ;;  %v2104_v23 = vld [vmem:[%s4608_s11 + $0x80] sm:$0xff] }
 0x291   : > { %1661 = vxpose.xlu0.b32.cont [6/16] (narrow) %v1475_v24, 8  ;;  %v1491_v8 = vpop.permute.xlu1 %1490  ;;  %v2094_v24 = vld [vmem:[%s4608_s11 + $0x30] sm:$0xff] }
 0x292   : > { %v1489_v5 = vpop.permute.xlu0 %1488  ;;  %8965 = vst [vmem:[#allocation80_spill] sm:$0xff] %v5619_v2  ;;  %v2106_v2 = vld [vmem:[%s4608_s11 + $0x90] sm:$0xff] }
 0x293   : > { %1755 = vxpose.xlu1.b32.cont [4/16] (narrow) %v1567_v41, 8  ;;  %v2092_v41 = vld [vmem:[%s4608_s11 + $0x20] sm:$0xff] }
 0x294   : > { %v5617_v9 = vmul.f32 %v2220_v61, %v2092_v41 }
 0x295   : > { %1662 = vxpose.xlu0.b32.cont [7/16] (narrow) %v1477_v25, 8  ;;  %v5578_v21 = vpop.permute.xlu1 %1586  ;;  %v2223_v25 = vld [vmem:[%s5583_s16 + $0x38] sm:$0xff] }
 0x296   : > { %v1585_v60 = vpop.permute.xlu0 %1584  ;;  %8964 = vst [vmem:[#allocation79_spill] sm:$0xff] %v5617_v9  ;;  %v2105_v9 = vld [vmem:[%s4608_s11 + $0x88] sm:$0xff] }
 0x297   : > { %1756 = vxpose.xlu1.b32.cont [5/16] (narrow) %v1569_v34, 8  ;;  %v2095_v34 = vld [vmem:[%s4608_s11 + $0x38] sm:$0xff] }
 0x298   : > { %v5631_v41 = vmul.f32 %v2223_v25, %v2095_v34  ;;  %v2234_v34 = vld [vmem:[%s5583_s16 + $0x90] sm:$0xff] }
 0x299   : > { %1663 = vxpose.xlu0.b32.cont [8/16] (narrow) %v1479_v59, 8  ;;  %v2088_v59 = vld [vmem:[%s4608_s11] sm:$0xff] }
 0x29a   : > { %v1493_v11 = vpop.permute.xlu0 %1492  ;;  %8967 = vst [vmem:[#allocation82_spill] sm:$0xff] %v5631_v41  ;;  %v2117_v41 = vld [vmem:[%s4608_s11 + $0xe8] sm:$0xff] }
 0x29b   : > { %1757 = vxpose.xlu1.b32.cont [6/16] (narrow) %v1571_v50, 8  ;;  %v2222_v50 = vld [vmem:[%s5583_s16 + $0x30] sm:$0xff] }
 0x29d   : > { %1664 = vxpose.xlu0.b32.cont [9/16] (narrow) %v1481_v56, 8  ;;  %v2090_v56 = vld [vmem:[%s4608_s11 + $0x10] sm:$0xff] }
 0x29f   : > { %1758 = vxpose.xlu1.b32.cont [7/16] (narrow) %v1573_v35, 8  ;;  %v2089_v35 = vld [vmem:[%s4608_s11 + $0x8] sm:$0xff] }
 0x2a1   : > { %1665 = vxpose.xlu0.b32.cont [10/16] (narrow) %v1483_v19, 8  ;;  %v2091_v19 = vld [vmem:[%s4608_s11 + $0x18] sm:$0xff] }
 0x2a3   : > { %1759 = vxpose.xlu1.b32.cont [8/16] (narrow) %v1575_v44, 8  ;;  %v2216_v44 = vld [vmem:[%s5583_s16] sm:$0xff] }
 0x2a4   : > { %v5633_v55 = vmul.f32 %v2216_v44, %v2088_v59 }
 0x2a5   : > { %1666 = vxpose.xlu0.b32.cont [11/16] (narrow) %v1485_v57, 8  ;;  %v2219_v57 = vld [vmem:[%s5583_s16 + $0x18] sm:$0xff] }
 0x2a6   : > { %8968 = vst [vmem:[#allocation83_spill] sm:$0xff] %v5633_v55  ;;  %v5654_v44 = vmul.f32 %v2219_v57, %v2091_v19  ;;  %v2118_v55 = vld [vmem:[%s4608_s11 + $0xf0] sm:$0xff]  ;;  %v2112_v57 = vld [vmem:[%s4608_s11 + $0xc0] sm:$0xff] }
 0x2a7   : > { %1760 = vxpose.xlu1.b32.cont [9/16] (narrow) %v1577_v6, 8  ;;  %v2217_v6 = vld [vmem:[%s5583_s16 + $0x8] sm:$0xff] }
 0x2a8   : > { %v5635_v61 = vmul.f32 %v2217_v6, %v2089_v35  ;;  %8973 = vst [vmem:[#allocation88_spill] sm:$0xff] %v5654_v44  ;;  %v2116_v6 = vld [vmem:[%s4608_s11 + $0xe0] sm:$0xff]  ;;  %v2113_v44 = vld [vmem:[%s4608_s11 + $0xc8] sm:$0xff] }
 0x2a9   : > { %1667 = vxpose.xlu0.b32.cont [12/16] (narrow) %v1487_v16, 8  ;;  %v3053_v16 = vadd.s32 128, %v4849_v62 }
 0x2aa   : > { %8969 = vst [vmem:[#allocation84_spill] sm:$0xff] %v5635_v61  ;;  %v2246_v61 = vld [vmem:[%s5583_s16 + $0xf0] sm:$0xff] }
 0x2ab   : > { %1761 = vxpose.xlu1.b32.cont [10/16] (narrow) %v1579_v29, 8  ;;  %v2218_v29 = vld [vmem:[%s5583_s16 + $0x10] sm:$0xff]  ;;  %v5647_v25 = vadd.s32 %v4851_v63, %v3053_v16  ;;  %v2244_v16 = vld [vmem:[%s5583_s16 + $0xe0] sm:$0xff] }
 0x2ac   : > { %v5652_v35 = vmul.f32 %v2218_v29, %v2090_v56 }
 0x2ad   : > { %1668 = vxpose.xlu0.b32.cont [13/16] (narrow) %v1489_v5, 8  ;;  %v2101_v5 = vld [vmem:[%s4608_s11 + $0x68] sm:$0xff]  ;;  %8970 = vst [vmem:[#allocation85_spill] sm:$0xff] %v5647_v25 }
 0x2ae   : > { %8972 = vst [vmem:[#allocation87_spill] sm:$0xff] %v5652_v35  ;;  %v2245_v25 = vld [vmem:[%s5583_s16 + $0xe8] sm:$0xff]  ;;  %v5666_v56 = vmul.f32 %v2229_v15, %v2101_v5  ;;  %v2243_v15 = vld [vmem:[%s5583_s16 + $0xd8] sm:$0xff]  ;;  %v5680_v5 = vmul.f32 %v2224_v49, %v2096_v10  ;;  %v2252_v35 = vld [vmem:[%s5583_s16 + $0x120] sm:$0xff] }
 0x2af   : > { %1762 = vxpose.xlu1.b32.cont [11/16] (narrow) %v1581_v47, 8  ;;  %v3054_v47 = vadd.s32 256, %v4849_v62  ;;  %v2098_v62 = vld [vmem:[%s4608_s11 + $0x50] sm:$0xff]  ;;  %v2253_v10 = vld [vmem:[%s5583_s16 + $0x128] sm:$0xff]  ;;  %v2255_v49 = vld [vmem:[%s5583_s16 + $0x138] sm:$0xff] }
 0x2b0   : > { %8975 = vst [vmem:[#allocation90_spill] sm:$0xff] %v5666_v56  ;;  %8978 = vst [vmem:[#allocation93_spill] sm:$0xff] %v5680_v5  ;;  %v2126_v56 = vld [vmem:[%s4608_s11 + $0x130] sm:$0xff]  ;;  %v2121_v5 = vld [vmem:[%s4608_s11 + $0x108] sm:$0xff] }
 0x2b1   : > { %1669 = vxpose.xlu0.b32.cont [14/16] (narrow) %v1491_v8, 8  ;;  %v2102_v8 = vld [vmem:[%s4608_s11 + $0x70] sm:$0xff]  ;;  %v5650_v59 = vadd.s32 %v4851_v63, %v3054_v47  ;;  %v2247_v63 = vld [vmem:[%s5583_s16 + $0xf8] sm:$0xff] }
 0x2b2   : > { %v5668_v19 = vmul.f32 %v2230_v12, %v2102_v8  ;;  %v5682_v12 = vmul.f32 %v2225_v58, %v2097_v39  ;;  %v5686_v8 = vmul.f32 %v2227_v31, %v2099_v46  ;;  %v2254_v58 = vld [vmem:[%s5583_s16 + $0x130] sm:$0xff]  ;;  %v1589_v39 = vpop.permute.xlu0 %1588  ;;  %v5700_v31 = vmul.f32 %v2238_v28, %v2110_v32 }
 0x2b3   : > { %1763 = vxpose.xlu1.b32.cont [12/16] (narrow) %v1583_v42, 8  ;;  %v2100_v42 = vld [vmem:[%s4608_s11 + $0x60] sm:$0xff]  ;;  %8971 = vst [vmem:[#allocation86_spill] sm:$0xff] %v5650_v59  ;;  %v2114_v59 = vld [vmem:[%s4608_s11 + $0xd0] sm:$0xff]  ;;  %v5702_v46 = vmul.f32 %v2239_v0, %v2111_v52  ;;  %v5712_v28 = vmul.f32 %v2232_v22, %v2104_v23  ;;  %v5716_v32 = vmul.f32 %v2234_v34, %v2106_v2  ;;  %v2261_v23 = vld [vmem:[%s5583_s16 + $0x168] sm:$0xff] }
 0x2b4   : > { %v5664_v47 = vmul.f32 %v2228_v26, %v2100_v42  ;;  %8976 = vst [vmem:[#allocation91_spill] sm:$0xff] %v5668_v19  ;;  %v2240_v26 = vld [vmem:[%s5583_s16 + $0xc0] sm:$0xff]  ;;  %v2241_v42 = vld [vmem:[%s5583_s16 + $0xc8] sm:$0xff]  ;;  %8979 = vst [vmem:[#allocation94_spill] sm:$0xff] %v5682_v12  ;;  %v5730_v2 = vmul.f32 %v2245_v25, %v2117_v41 }
 0x2b5   : > { %1670 = vxpose.xlu0.b32.cont [15/16] (narrow) %v1493_v11, 8  ;;  %v2103_v11 = vld [vmem:[%s4608_s11 + $0x78] sm:$0xff]  ;;  %8981 = vst [vmem:[#allocation96_spill] sm:$0xff] %v5686_v8  ;;  %8984 = vst [vmem:[#allocation99_spill] sm:$0xff] %v5700_v31  ;;  %v2120_v8 = vld [vmem:[%s4608_s11 + $0x100] sm:$0xff]  ;;  %v5744_v25 = vmul.f32 %v2240_v26, %v2112_v57 }
 0x2b6   : > { %8974 = vst [vmem:[#allocation89_spill] sm:$0xff] %v5664_v47  ;;  %v5670_v29 = vmul.f32 %v2231_v20, %v2103_v11  ;;  %v2242_v47 = vld [vmem:[%s5583_s16 + $0xd0] sm:$0xff]  ;;  %v5684_v20 = vmul.f32 %v2226_v38, %v2098_v62  ;;  %v2124_v11 = vld [vmem:[%s4608_s11 + $0x120] sm:$0xff]  ;;  %v2127_v19 = vld [vmem:[%s4608_s11 + $0x138] sm:$0xff]  ;;  %v5696_v38 = vmul.f32 %v2236_v51, %v2108_v18  ;;  %v5698_v62 = vmul.f32 %v2237_v1, %v2109_v17 }
 0x2b7   : > { %1764 = vxpose.xlu1.b32.cont [13/16] (narrow) %v1585_v60, 8  ;;  %v1495_v60 = vpop.permute.xlu1 %1494  ;;  %8985 = vst [vmem:[#allocation100_spill] sm:$0xff] %v5702_v46  ;;  %v2122_v12 = vld [vmem:[%s4608_s11 + $0x110] sm:$0xff]  ;;  %v2249_v51 = vld [vmem:[%s5583_s16 + $0x108] sm:$0xff]  ;;  %v2251_v18 = vld [vmem:[%s5583_s16 + $0x118] sm:$0xff] }
 0x2b8   : > { %8977 = vst [vmem:[#allocation92_spill] sm:$0xff] %v5670_v29  ;;  %8980 = vst [vmem:[#allocation95_spill] sm:$0xff] %v5684_v20  ;;  %v2125_v29 = vld [vmem:[%s4608_s11 + $0x128] sm:$0xff]  ;;  %v2123_v20 = vld [vmem:[%s4608_s11 + $0x118] sm:$0xff] }
 0x2b9   : > { %1671 = vxpose.xlu0.b32.end [16/16] (narrow) %v1495_v60, 8  ;;  %v5629_v60 = vmul.f32 %v2222_v50, %v2094_v24  ;;  %v2233_v24 = vld [vmem:[%s5583_s16 + $0x88] sm:$0xff]  ;;  %v2235_v50 = vld [vmem:[%s5583_s16 + $0x98] sm:$0xff]  ;;  %8982 = vst [vmem:[#allocation97_spill] sm:$0xff] %v5696_v38  ;;  %8983 = vst [vmem:[#allocation98_spill] sm:$0xff] %v5698_v62 }
 0x2ba   : > { %v2250_v1 = vld [vmem:[%s5583_s16 + $0x110] sm:$0xff]  ;;  %8986 = vst [vmem:[#allocation101_spill] sm:$0xff] %v5712_v28  ;;  %v5714_v0 = vmul.f32 %v2233_v24, %v2105_v9  ;;  %8988 = vst [vmem:[#allocation103_spill] sm:$0xff] %v5716_v32  ;;  %v5718_v52 = vmul.f32 %v2235_v50, %v2107_v7  ;;  %v2132_v17 = vld [vmem:[%s4608_s11 + $0x160] sm:$0xff]  ;;  %v5728_v24 = vmul.f32 %v2244_v16, %v2116_v6 }
 0x2bb   : > { %8966 = vst [vmem:[#allocation81_spill] sm:$0xff] %v5629_v60  ;;  %1765 = vxpose.xlu1.b32.cont [14/16] (narrow) %v5578_v21, 8  ;;  %v2119_v21 = vld [vmem:[%s4608_s11 + $0xf8] sm:$0xff]  ;;  %v2133_v46 = vld [vmem:[%s4608_s11 + $0x168] sm:$0xff]  ;;  %v2134_v38 = vld [vmem:[%s4608_s11 + $0x170] sm:$0xff]  ;;  %v5732_v7 = vmul.f32 %v2246_v61, %v2118_v55  ;;  %v5746_v55 = vmul.f32 %v2241_v42, %v2113_v44  ;;  %v5748_v61 = vmul.f32 %v2242_v47, %v2114_v59  ;;  %v1591_v42 = vpop.permute.xlu1 %1590 }
 0x2bc   : > { %v2115_v60 = vld [vmem:[%s4608_s11 + $0xd8] sm:$0xff]  ;;  %8987 = vst [vmem:[#allocation102_spill] sm:$0xff] %v5714_v0  ;;  %8989 = vst [vmem:[#allocation104_spill] sm:$0xff] %v5718_v52  ;;  %v2260_v22 = vld [vmem:[%s5583_s16 + $0x160] sm:$0xff]  ;;  %v5734_v34 = vmul.f32 %v2247_v63, %v2119_v21  ;;  %v5760_v59 = vmul.f32 %v2252_v35, %v2124_v11  ;;  %v5762_v47 = vmul.f32 %v2253_v10, %v2125_v29 }
 0x2bd   : > { %v2135_v62 = vld [vmem:[%s4608_s11 + $0x178] sm:$0xff]  ;;  %8990 = vst [vmem:[#allocation105_spill] sm:$0xff] %v5728_v24  ;;  %8991 = vst [vmem:[#allocation106_spill] sm:$0xff] %v5730_v2  ;;  %v2128_v50 = vld [vmem:[%s4608_s11 + $0x140] sm:$0xff]  ;;  %v5750_v21 = vmul.f32 %v2243_v15, %v2115_v60  ;;  %v5764_v60 = vmul.f32 %v2254_v58, %v2126_v56  ;;  %v5766_v15 = vmul.f32 %v2255_v49, %v2127_v19 }
 0x2be   : > { %v2263_v9 = vld [vmem:[%s5583_s16 + $0x178] sm:$0xff]  ;;  %8992 = vst [vmem:[#allocation107_spill] sm:$0xff] %v5732_v7  ;;  %8993 = vst [vmem:[#allocation108_spill] sm:$0xff] %v5734_v34  ;;  %v2129_v52 = vld [vmem:[%s4608_s11 + $0x148] sm:$0xff]  ;;  %v5776_v56 = vmul.f32 %v2248_v27, %v2120_v8  ;;  %v5778_v19 = vmul.f32 %v2249_v51, %v2121_v5  ;;  %v5780_v29 = vmul.f32 %v2250_v1, %v2122_v12 }
 0x2bf   : > { %1766 = vxpose.xlu1.b32.cont [15/16] (narrow) %v1589_v39, 8  ;;  %v2262_v39 = vld [vmem:[%s5583_s16 + $0x170] sm:$0xff]  ;;  %v2131_v0 = vld [vmem:[%s4608_s11 + $0x158] sm:$0xff]  ;;  %v2256_v6 = vld [vmem:[%s5583_s16 + $0x140] sm:$0xff]  ;;  %8994 = vst [vmem:[#allocation109_spill] sm:$0xff] %v5744_v25  ;;  %v5782_v11 = vmul.f32 %v2251_v18, %v2123_v20  ;;  %v5794_v5 = vmul.f32 %v2263_v9, %v2135_v62 }
 0x2c0   : > { %v2130_v28 = vld [vmem:[%s4608_s11 + $0x150] sm:$0xff]  ;;  %v2257_v16 = vld [vmem:[%s5583_s16 + $0x148] sm:$0xff]  ;;  %v2259_v41 = vld [vmem:[%s5583_s16 + $0x158] sm:$0xff]  ;;  %8995 = vst [vmem:[#allocation110_spill] sm:$0xff] %v5746_v55  ;;  %v5792_v27 = vmul.f32 %v2262_v39, %v2134_v38 }
 0x2c1   : > { %v2258_v24 = vld [vmem:[%s5583_s16 + $0x150] sm:$0xff]  ;;  %8996 = vst [vmem:[#allocation111_spill] sm:$0xff] %v5748_v61  ;;  %8997 = vst [vmem:[#allocation112_spill] sm:$0xff] %v5750_v21  ;;  %v2140_v63 = vld [vmem:[%s4608_s11 + $0x1a0] sm:$0xff]  ;;  %v5806_v38 = vmul.f32 %v2257_v16, %v2129_v52 }
 0x2c2   : > { %v2141_v34 = vld [vmem:[%s4608_s11 + $0x1a8] sm:$0xff]  ;;  %v2142_v2 = vld [vmem:[%s4608_s11 + $0x1b0] sm:$0xff]  ;;  %v2143_v7 = vld [vmem:[%s4608_s11 + $0x1b8] sm:$0xff]  ;;  %8998 = vst [vmem:[#allocation113_spill] sm:$0xff] %v5760_v59  ;;  %v5788_v59 = vmul.f32 %v2260_v22, %v2132_v17  ;;  %v5808_v62 = vmul.f32 %v2258_v24, %v2130_v28 }
 0x2c3   : > { %v2268_v31 = vld [vmem:[%s5583_s16 + $0x1a0] sm:$0xff]  ;;  %v2269_v57 = vld [vmem:[%s5583_s16 + $0x1a8] sm:$0xff]  ;;  %v2270_v44 = vld [vmem:[%s5583_s16 + $0x1b0] sm:$0xff]  ;;  %8999 = vst [vmem:[#allocation114_spill] sm:$0xff] %v5762_v47  ;;  %1767 = vxpose.xlu1.b32.end [16/16] (narrow) %v1591_v42, 8  ;;  %v5790_v42 = vmul.f32 %v2261_v23, %v2133_v46  ;;  %v5804_v46 = vmul.f32 %v2256_v6, %v2128_v50  ;;  %v5810_v23 = vmul.f32 %v2259_v41, %v2131_v0 }
 0x2c4   : > { %v2271_v26 = vld [vmem:[%s5583_s16 + $0x1b8] sm:$0xff]  ;;  %9000 = vst [vmem:[#allocation115_spill] sm:$0xff] %v5766_v15  ;;  %v2136_v21 = vld [vmem:[%s4608_s11 + $0x180] sm:$0xff]  ;;  %v2137_v25 = vld [vmem:[%s4608_s11 + $0x188] sm:$0xff]  ;;  %v5818_v50 = vmul.f32 %v2268_v31, %v2140_v63  ;;  %v5820_v52 = vmul.f32 %v2269_v57, %v2141_v34  ;;  %v5822_v28 = vmul.f32 %v2270_v44, %v2142_v2 }
 0x2c5   : > { %v2138_v55 = vld [vmem:[%s4608_s11 + $0x190] sm:$0xff]  ;;  %v2139_v61 = vld [vmem:[%s4608_s11 + $0x198] sm:$0xff]  ;;  %v2264_v32 = vld [vmem:[%s5583_s16 + $0x180] sm:$0xff]  ;;  %9001 = vst [vmem:[#allocation116_spill] sm:$0xff] %v5776_v56  ;;  %v5824_v0 = vmul.f32 %v2271_v26, %v2143_v7  ;;  %v5836_v2 = vmul.f32 %v2265_v45, %v2137_v25 }
 0x2c6   : > { %v2267_v35 = vld [vmem:[%s5583_s16 + $0x198] sm:$0xff]  ;;  %9002 = vst [vmem:[#allocation117_spill] sm:$0xff] %v5778_v19  ;;  %9003 = vst [vmem:[#allocation118_spill] sm:$0xff] %v5782_v11  ;;  %v2148_v10 = vld [vmem:[%s4608_s11 + $0x1e0] sm:$0xff]  ;;  %v5834_v57 = vmul.f32 %v2264_v32, %v2136_v21  ;;  %v5838_v7 = vmul.f32 %v2266_v54, %v2138_v55 }
 0x2c7   : > { %v2149_v58 = vld [vmem:[%s4608_s11 + $0x1e8] sm:$0xff]  ;;  %v2276_v49 = vld [vmem:[%s5583_s16 + $0x1e0] sm:$0xff]  ;;  %9004 = vst [vmem:[#allocation119_spill] sm:$0xff] %v5788_v59  ;;  %9005 = vst [vmem:[#allocation120_spill] sm:$0xff] %v5790_v42  ;;  %v5840_v44 = vmul.f32 %v2267_v35, %v2139_v61 }
 0x2c8   : > { %v2277_v15 = vld [vmem:[%s5583_s16 + $0x1e8] sm:$0xff]  ;;  %9006 = vst [vmem:[#allocation121_spill] sm:$0xff] %v5794_v5  ;;  %v2150_v12 = vld [vmem:[%s4608_s11 + $0x1f0] sm:$0xff]  ;;  %v2151_v20 = vld [vmem:[%s4608_s11 + $0x1f8] sm:$0xff]  ;;  %v5856_v61 = vmul.f32 %v2276_v49, %v2148_v10 }
 0x2c9   : > { %v2278_v8 = vld [vmem:[%s5583_s16 + $0x1f0] sm:$0xff]  ;;  %v2279_v51 = vld [vmem:[%s5583_s16 + $0x1f8] sm:$0xff]  ;;  %v2144_v1 = vld [vmem:[%s4608_s11 + $0x1c0] sm:$0xff]  ;;  %9007 = vst [vmem:[#allocation122_spill] sm:$0xff] %v5804_v46  ;;  %v5858_v35 = vmul.f32 %v2277_v15, %v2149_v58 }
 0x2ca   : > { %v2145_v18 = vld [vmem:[%s4608_s11 + $0x1c8] sm:$0xff]  ;;  %v2272_v17 = vld [vmem:[%s5583_s16 + $0x1c0] sm:$0xff]  ;;  %9008 = vst [vmem:[#allocation123_spill] sm:$0xff] %v5806_v38  ;;  %9009 = vst [vmem:[#allocation124_spill] sm:$0xff] %v5810_v23  ;;  %v5870_v10 = vmul.f32 %v2279_v51, %v2151_v20 }
 0x2cb   : > { %v2273_v22 = vld [vmem:[%s5583_s16 + $0x1c8] sm:$0xff]  ;;  %v2146_v39 = vld [vmem:[%s4608_s11 + $0x1d0] sm:$0xff]  ;;  %v2147_v9 = vld [vmem:[%s4608_s11 + $0x1d8] sm:$0xff]  ;;  %9010 = vst [vmem:[#allocation125_spill] sm:$0xff] %v5818_v50  ;;  %v5872_v15 = vmul.f32 %v2272_v17, %v2144_v1 }
 0x2cc   : > { %v2274_v5 = vld [vmem:[%s5583_s16 + $0x1d0] sm:$0xff]  ;;  %v2275_v11 = vld [vmem:[%s5583_s16 + $0x1d8] sm:$0xff]  ;;  %v2156_v59 = vld [vmem:[%s4608_s11 + $0x220] sm:$0xff]  ;;  %9011 = vst [vmem:[#allocation126_spill] sm:$0xff] %v5820_v52  ;;  %v5874_v58 = vmul.f32 %v2273_v22, %v2145_v18 }
 0x2cd   : > { %v2284_v56 = vld [vmem:[%s5583_s16 + $0x220] sm:$0xff]  ;;  %9012 = vst [vmem:[#allocation127_spill] sm:$0xff] %v5822_v28  ;;  %9013 = vst [vmem:[#allocation128_spill] sm:$0xff] %v5824_v0  ;;  %v2157_v24 = vld [vmem:[%s4608_s11 + $0x228] sm:$0xff]  ;;  %v5882_v28 = vmul.f32 %v2274_v5, %v2146_v39 }
 0x2ce   : > { %v2158_v6 = vld [vmem:[%s4608_s11 + $0x230] sm:$0xff]  ;;  %v2159_v16 = vld [vmem:[%s4608_s11 + $0x238] sm:$0xff]  ;;  %v2285_v41 = vld [vmem:[%s5583_s16 + $0x228] sm:$0xff]  ;;  %9014 = vst [vmem:[#allocation129_spill] sm:$0xff] %v5834_v57  ;;  %v5886_v20 = vmul.f32 %v2284_v56, %v2156_v59 }
 0x2cf   : > { %v2286_v31 = vld [vmem:[%s5583_s16 + $0x230] sm:$0xff]  ;;  %v2287_v63 = vld [vmem:[%s5583_s16 + $0x238] sm:$0xff]  ;;  %v2152_v23 = vld [vmem:[%s4608_s11 + $0x200] sm:$0xff]  ;;  %9015 = vst [vmem:[#allocation130_spill] sm:$0xff] %v5836_v2 }
 0x2d0   : > { %v2280_v34 = vld [vmem:[%s5583_s16 + $0x200] sm:$0xff]  ;;  %9016 = vst [vmem:[#allocation131_spill] sm:$0xff] %v5838_v7  ;;  %9017 = vst [vmem:[#allocation132_spill] sm:$0xff] %v5840_v44  ;;  %v2153_v26 = vld [vmem:[%s4608_s11 + $0x208] sm:$0xff]  ;;  %v5901_v59 = vmul.f32 %v2286_v31, %v2158_v6  ;;  %v5903_v56 = vmul.f32 %v2287_v63, %v2159_v16  ;;  %v1736_v6 = vpop.trf.xlu0 }
 0x2d1   : > { %v2154_v0 = vld [vmem:[%s4608_s11 + $0x210] sm:$0xff]  ;;  %v2155_v50 = vld [vmem:[%s4608_s11 + $0x218] sm:$0xff]  ;;  %v2281_v46 = vld [vmem:[%s5583_s16 + $0x208] sm:$0xff]  ;;  %9020 = vst [vmem:[#allocation135_spill] sm:$0xff] %v5856_v61 }
 0x2d2   : > { %v2282_v52 = vld [vmem:[%s5583_s16 + $0x210] sm:$0xff]  ;;  %v2283_v32 = vld [vmem:[%s5583_s16 + $0x218] sm:$0xff]  ;;  %v2164_v45 = vld [vmem:[%s4608_s11 + $0x260] sm:$0xff]  ;;  %9021 = vst [vmem:[#allocation136_spill] sm:$0xff] %v5858_v35  ;;  %v5915_v16 = vmul.f32 %v2281_v46, %v2153_v26 }
 0x2d3   : > { %v2292_v25 = vld [vmem:[%s5583_s16 + $0x260] sm:$0xff]  ;;  %v4133_v21 = vld [vmem:[#allocation2] ss:$0 sm:$0xff]  ;;  %v2165_v44 = vld [vmem:[%s4608_s11 + $0x268] sm:$0xff]  ;;  %9023 = vst [vmem:[#allocation138_spill] sm:$0xff] %v5870_v10  ;;  %v5905_v10 = vmul.f32 %v2280_v34, %v2152_v23  ;;  %v5919_v23 = vmul.f32 %v2283_v32, %v2155_v50 }
 0x2d4   : > { %v5851_v54 = vadd.f32 %v4133_v21, %v5093_v14  ;;  %v5854_v55 = vadd.f32 %v4133_v21, %v5101_v40  ;;  %v2166_v57 = vld [vmem:[%s4608_s11 + $0x270] sm:$0xff]  ;;  %v2167_v2 = vld [vmem:[%s4608_s11 + $0x278] sm:$0xff]  ;;  %v2293_v42 = vld [vmem:[%s5583_s16 + $0x268] sm:$0xff]  ;;  %v5868_v21 = vmul.f32 %v2278_v8, %v2150_v12  ;;  %9024 = vst [vmem:[#allocation139_spill] sm:$0xff] %v5872_v15  ;;  %v5884_v12 = vmul.f32 %v2275_v11, %v2147_v9 }
 0x2d5   : > { %v2294_v38 = vld [vmem:[%s5583_s16 + $0x270] sm:$0xff]  ;;  %v2295_v14 = vld [vmem:[%s5583_s16 + $0x278] sm:$0xff]  ;;  %v2160_v47 = vld [vmem:[%s4608_s11 + $0x240] sm:$0xff]  ;;  %9025 = vst [vmem:[#allocation140_spill] sm:$0xff] %v5874_v58  ;;  %v5897_v11 = vsub.s32 0, %v4838_v53  ;;  %v5899_v9 = vmul.f32 %v2285_v41, %v2157_v24  ;;  %v5917_v41 = vmul.f32 %v2282_v52, %v2154_v0  ;;  %v5921_v31 = vmul.f32 %v2292_v25, %v2164_v45 }
 0x2d6   : > { %9018 = vst [vmem:[#allocation133_spill] sm:$0xff] %v5851_v54  ;;  %9019 = vst [vmem:[#allocation134_spill] sm:$0xff] %v5854_v55  ;;  %v2288_v40 = vld [vmem:[%s5583_s16 + $0x240] sm:$0xff]  ;;  %v2161_v49 = vld [vmem:[%s4608_s11 + $0x248] sm:$0xff]  ;;  %v5930_v7 = vmul.f32 %v2294_v38, %v2166_v57  ;;  %v5932_v46 = vmul.f32 %v2295_v14, %v2167_v2 }
 0x2d7   : > { %9022 = vst [vmem:[#allocation137_spill] sm:$0xff] %v5868_v21  ;;  %v2162_v61 = vld [vmem:[%s4608_s11 + $0x250] sm:$0xff]  ;;  %v2163_v35 = vld [vmem:[%s4608_s11 + $0x258] sm:$0xff]  ;;  %v2289_v19 = vld [vmem:[%s5583_s16 + $0x248] sm:$0xff]  ;;  %v5934_v52 = vmul.f32 %v2288_v40, %v2160_v47  ;;  %v5949_v57 = vrot.slane %v1736_v6, %v5897_v11 }
 0x2d8   : > { %v2290_v55 = vld [vmem:[%s5583_s16 + $0x250] sm:$0xff]  ;;  %v2291_v54 = vld [vmem:[%s5583_s16 + $0x258] sm:$0xff]  ;;  %9026 = vst [vmem:[#allocation141_spill] sm:$0xff] %v5882_v28  ;;  %9027 = vst [vmem:[#allocation142_spill] sm:$0xff] %v5884_v12  ;;  %v5939_v32 = vmul.f32 %v2289_v19, %v2161_v49 }
 0x2d9   : > { %9028 = vst [vmem:[#allocation143_spill] sm:$0xff] %v5886_v20  ;;  %v2172_v8 = vld [vmem:[%s4608_s11 + $0x2a0] sm:$0xff]  ;;  %v2173_v51 = vld [vmem:[%s4608_s11 + $0x2a8] sm:$0xff]  ;;  %v2174_v1 = vld [vmem:[%s4608_s11 + $0x2b0] sm:$0xff]  ;;  %v5941_v45 = vmul.f32 %v2290_v55, %v2162_v61  ;;  %v5943_v25 = vmul.f32 %v2291_v54, %v2163_v35 }
 0x2da   : > { %v2175_v18 = vld [vmem:[%s4608_s11 + $0x2b8] sm:$0xff]  ;;  %v2300_v17 = vld [vmem:[%s5583_s16 + $0x2a0] sm:$0xff]  ;;  %v2301_v22 = vld [vmem:[%s5583_s16 + $0x2a8] sm:$0xff]  ;;  %9029 = vst [vmem:[#allocation144_spill] sm:$0xff] %v5897_v11 }
 0x2db   : > { %v2302_v5 = vld [vmem:[%s5583_s16 + $0x2b0] sm:$0xff]  ;;  %v2303_v39 = vld [vmem:[%s5583_s16 + $0x2b8] sm:$0xff]  ;;  %9030 = vst [vmem:[#allocation145_spill] sm:$0xff] %v5899_v9  ;;  %9031 = vst [vmem:[#allocation146_spill] sm:$0xff] %v5901_v59  ;;  %v5928_v59 = vmul.f32 %v2293_v42, %v2165_v44  ;;  %v5951_v2 = vmul.f32 %v2300_v17, %v2172_v8  ;;  %v5953_v47 = vmul.f32 %v2301_v22, %v2173_v51 }
 0x2dc   : > { %9032 = vst [vmem:[#allocation147_spill] sm:$0xff] %v5903_v56  ;;  %9033 = vst [vmem:[#allocation148_spill] sm:$0xff] %v5905_v10  ;;  %v2168_v12 = vld [vmem:[%s4608_s11 + $0x280] sm:$0xff]  ;;  %v2169_v20 = vld [vmem:[%s4608_s11 + $0x288] sm:$0xff]  ;;  %v5955_v14 = vmul.f32 %v2302_v5, %v2174_v1  ;;  %v5957_v40 = vmul.f32 %v2303_v39, %v2175_v18  ;;  %v1962_v18 = vadd.f32 %v5949_v57, %v5397_v4 }
 0x2dd   : > { %v2170_v15 = vld [vmem:[%s4608_s11 + $0x290] sm:$0xff]  ;;  %v2296_v58 = vld [vmem:[%s5583_s16 + $0x280] sm:$0xff]  ;;  %v2297_v21 = vld [vmem:[%s5583_s16 + $0x288] sm:$0xff]  ;;  %9034 = vst [vmem:[#allocation149_spill] sm:$0xff] %v5915_v16 }
 0x2de   : > { %v2298_v53 = vld [vmem:[%s5583_s16 + $0x290] sm:$0xff]  ;;  %9035 = vst [vmem:[#allocation150_spill] sm:$0xff] %v5919_v23  ;;  %9036 = vst [vmem:[#allocation151_spill] sm:$0xff] %v5921_v31  ;;  %v5962_v61 = vmul.f32 %v2296_v58, %v2168_v12  ;;  %v5964_v54 = vmul.f32 %v2297_v21, %v2169_v20  ;;  %v1966_v58 = vadd.f32 %v5949_v57, %v5394_v43  ;;  %v9049_v39 = vld [vmem:[#allocation60_spill] sm:$0xff] }
 0x2df   : > { %v2182_v28 = vld [vmem:[%s4608_s11 + $0x2f0] sm:$0xff]  ;;  %9037 = vst [vmem:[#allocation152_spill] sm:$0xff] %v5928_v59  ;;  %9038 = vst [vmem:[#allocation153_spill] sm:$0xff] %v5932_v46  ;;  %v2426_v35 = vmul.f32 %v2298_v53, %v2170_v15  ;;  %v1970_v53 = vadd.f32 %v5949_v57, %v5419_v48  ;;  %v1978_v21 = vadd.f32 %v5949_v57, %v5439_v13  ;;  %v9058_v31 = vld [vmem:[#allocation67_spill] sm:$0xff] }
 0x2e0   : > { %v2310_v24 = vld [vmem:[%s5583_s16 + $0x2f0] sm:$0xff]  ;;  %9039 = vst [vmem:[#allocation154_spill] sm:$0xff] %v5934_v52  ;;  %9040 = vst [vmem:[#allocation155_spill] sm:$0xff] %v5939_v32  ;;  %v1986_v15 = vadd.f32 %v5949_v57, %v5459_v37  ;;  %v1990_v12 = vadd.f32 %v5949_v57, %v5454_v33  ;;  %v1994_v20 = vadd.f32 %v5949_v57, %v5479_v3  ;;  %v9061_v16 = vld [vmem:[#allocation72_spill] sm:$0xff] }
 0x2e1   : > { %v2178_v63 = vld [vmem:[%s4608_s11 + $0x2d0] sm:$0xff]  ;;  %9041 = vst [vmem:[#allocation156_spill] sm:$0xff] %v5943_v25  ;;  %9042 = vst [vmem:[#allocation157_spill] sm:$0xff] %v5949_v57  ;;  %v2438_v46 = vmul.f32 %v2310_v24, %v2182_v28  ;;  %v1974_v28 = vadd.f32 %v5949_v57, %v5414_v30  ;;  %v2038_v52 = vadd.f32 %v5949_v57, %v9058_v31  ;;  %v9069_v33 = vld [vmem:[#allocation87_spill] sm:$0xff] }
 0x2e2   : > { %v2306_v34 = vld [vmem:[%s5583_s16 + $0x2d0] sm:$0xff]  ;;  %9043 = vst [vmem:[#allocation158_spill] sm:$0xff] %v5951_v2  ;;  %9044 = vst [vmem:[#allocation159_spill] sm:$0xff] %v5953_v47  ;;  %v9057_v2 = vld [vmem:[#allocation68_spill] sm:$0xff] }
 0x2e3   : > { %v2190_v56 = vld [vmem:[%s4608_s11 + $0x330] sm:$0xff]  ;;  %9045 = vst [vmem:[#allocation160_spill] sm:$0xff] %v5957_v40  ;;  %9046 = vst [vmem:[#allocation161_spill] sm:$0xff] %v5962_v61  ;;  %v2434_v25 = vmul.f32 %v2306_v34, %v2178_v63  ;;  %v9051_v63 = vld [vmem:[#allocation62_spill] sm:$0xff]  ;;  %v2034_v61 = vadd.f32 %v5949_v57, %v9057_v2 }
 0x2e4   : > { %v2318_v10 = vld [vmem:[%s5583_s16 + $0x330] sm:$0xff]  ;;  %9047 = vst [vmem:[#allocation162_spill] sm:$0xff] %v5964_v54  ;;  %v2010_v34 = vadd.f32 %v5949_v57, %v9051_v63  ;;  %v9059_v47 = vld [vmem:[#allocation70_spill] sm:$0xff]  ;;  %v9072_v13 = vld [vmem:[#allocation91_spill] sm:$0xff] }
 0x2e5   : > { %v2186_v9 = vld [vmem:[%s4608_s11 + $0x310] sm:$0xff]  ;;  %v2446_v6 = vmul.f32 %v2318_v10, %v2190_v56  ;;  %v1982_v10 = vadd.f32 %v5949_v57, %v5434_v36  ;;  %v9050_v56 = vld [vmem:[#allocation59_spill] sm:$0xff]  ;;  %v2042_v54 = vadd.f32 %v5949_v57, %v9059_v47 }
 0x2e6   : > { %v2314_v50 = vld [vmem:[%s5583_s16 + $0x310] sm:$0xff]  ;;  %v2006_v24 = vadd.f32 %v5949_v57, %v9050_v56  ;;  %v9065_v56 = vld [vmem:[#allocation76_spill] sm:$0xff]  ;;  %v9071_v36 = vld [vmem:[#allocation95_spill] sm:$0xff] }
 0x2e7   : > { %v2198_v0 = vld [vmem:[%s4608_s11 + $0x370] sm:$0xff]  ;;  %v2442_v23 = vmul.f32 %v2314_v50, %v2186_v9  ;;  %v2002_v9 = vadd.f32 %v5949_v57, %v9049_v39  ;;  %v2066_v31 = vadd.f32 %v5949_v57, %v9065_v56  ;;  %v9066_v39 = vld [vmem:[#allocation75_spill] sm:$0xff]  ;;  %v6042_v56 = vadd.f32 %v9072_v13, %v1974_v28 }
 0x2e8   : > { %v2326_v26 = vld [vmem:[%s5583_s16 + $0x370] sm:$0xff]  ;;  %v2070_v47 = vadd.f32 %v5949_v57, %v9066_v39  ;;  %v9073_v30 = vld [vmem:[#allocation103_spill] sm:$0xff] }
 0x2e9   : > { %v2194_v42 = vld [vmem:[%s4608_s11 + $0x350] sm:$0xff]  ;;  %v5966_v8 = vmul.f32 %v2326_v26, %v2198_v0  ;;  %v9053_v26 = vld [vmem:[#allocation64_spill] sm:$0xff]  ;;  %v6045_v39 = vadd.f32 %v9073_v30, %v1978_v21  ;;  %v9074_v48 = vld [vmem:[#allocation99_spill] sm:$0xff]  ;;  %v6063_v13 = vadd.f32 %v5808_v62, %v2002_v9  ;;  %v6066_v30 = vadd.f32 %v5792_v27, %v2006_v24 }
 0x2ea   : > { %v2322_v44 = vld [vmem:[%s5583_s16 + $0x350] sm:$0xff]  ;;  %v9075_v43 = vld [vmem:[#allocation111_spill] sm:$0xff]  ;;  %v9081_v27 = vld [vmem:[#allocation146_spill] sm:$0xff]  ;;  %vm2614_vm13 = vcmp.gt.f32.partialorder %v6042_v56, 0.0 }
 0x2eb   : > { %v2206_v38 = vld [vmem:[%s4608_s11 + $0x3b0] sm:$0xff]  ;;  %v2450_v51 = vmul.f32 %v2322_v44, %v2194_v42  ;;  %v2018_v42 = vadd.f32 %v5949_v57, %v9053_v26  ;;  %v9054_v44 = vld [vmem:[#allocation63_spill] sm:$0xff]  ;;  %vm2618_vm10 = vcmp.gt.f32.partialorder %v6045_v39, 0.0 }
 0x2ec   : > { %v2334_v19 = vld [vmem:[%s5583_s16 + $0x3b0] sm:$0xff]  ;;  %v9062_v26 = vld [vmem:[#allocation71_spill] sm:$0xff] }
 0x2ed   : > { %v2202_v49 = vld [vmem:[%s4608_s11 + $0x390] sm:$0xff]  ;;  %v5968_v17 = vmul.f32 %v2334_v19, %v2206_v38  ;;  %v2022_v38 = vadd.f32 %v5949_v57, %v9054_v44  ;;  %v9055_v19 = vld [vmem:[#allocation66_spill] sm:$0xff]  ;;  %v2050_v44 = vadd.f32 %v5949_v57, %v9061_v16  ;;  %v9110_v11 = vld [vmem:[#allocation35_spill] sm:$0xff] }
 0x2ee   : > { %v2330_v55 = vld [vmem:[%s5583_s16 + $0x390] sm:$0xff] }
 0x2ef   : > { %v5970_v1 = vmul.f32 %v2330_v55, %v2202_v49  ;;  %v9048_v22 = vld [vmem:[#allocation57_spill] sm:$0xff]  ;;  %v2026_v49 = vadd.f32 %v5949_v57, %v9055_v19  ;;  %v2054_v19 = vadd.f32 %v5949_v57, %v9062_v26  ;;  %v6033_v26 = vadd.f32 %v9069_v33, %v1962_v18  ;;  %v9076_v33 = vld [vmem:[#allocation107_spill] sm:$0xff] }
 0x2f0   : > { %v1998_v5 = vadd.f32 %v5949_v57, %v9048_v22  ;;  %v9052_v50 = vld [vmem:[#allocation61_spill] sm:$0xff]  ;;  %v9067_v22 = vld [vmem:[#allocation78_spill] sm:$0xff]  ;;  %v6054_v18 = vadd.f32 %v9076_v33, %v1990_v12  ;;  %v6090_v12 = vadd.f32 %v5930_v7, %v2038_v52  ;;  %v6097_v9 = vadd.f32 %v2434_v25, %v2050_v44 }
 0x2f1   : > { %v2014_v0 = vadd.f32 %v5949_v57, %v9052_v50  ;;  %v9056_v55 = vld [vmem:[#allocation65_spill] sm:$0xff]  ;;  %v9063_v50 = vld [vmem:[#allocation74_spill] sm:$0xff]  ;;  %v6081_v62 = vadd.f32 %v5917_v41, %v2026_v49  ;;  %v6100_v24 = vadd.f32 %v2438_v46, %v2054_v19  ;;  %v6113_v25 = vadd.f32 %v5966_v8, %v2070_v47  ;;  %v2309_v46 = vld [vmem:[%s5583_s16 + $0x2e8] sm:$0xff] }
 0x2f2   : > { %v2030_v40 = vadd.f32 %v5949_v57, %v9056_v55  ;;  %v9060_v59 = vld [vmem:[#allocation69_spill] sm:$0xff]  ;;  %v2058_v55 = vadd.f32 %v5949_v57, %v9063_v50  ;;  %v2171_v41 = vld [vmem:[%s4608_s11 + $0x298] sm:$0xff]  ;;  %vm2602_vm0 = vcmp.gt.f32.partialorder %v6033_v26, 0.0  ;;  %vm2630_vm11 = vcmp.gt.f32.partialorder %v6054_v18, 0.0 }
 0x2f3   : > { %v2046_v32 = vadd.f32 %v5949_v57, %v9060_v59  ;;  %v9064_v63 = vld [vmem:[#allocation73_spill] sm:$0xff]  ;;  %v2074_v59 = vadd.f32 %v5949_v57, %v9067_v22  ;;  %v6048_v22 = vadd.f32 %v9074_v48, %v1982_v10  ;;  %v9077_v48 = vld [vmem:[#allocation131_spill] sm:$0xff]  ;;  %v2299_v52 = vld [vmem:[%s5583_s16 + $0x298] sm:$0xff]  ;;  %v6144_v8 = vmul.f32 0.2, %v6042_v56 }
 0x2f4   : > { %v2062_v2 = vadd.f32 %v5949_v57, %v9064_v63  ;;  %v9068_v3 = vld [vmem:[#allocation77_spill] sm:$0xff]  ;;  %v6039_v63 = vadd.f32 %v9071_v36, %v1970_v53  ;;  %v6060_v36 = vadd.f32 %v5764_v60, %v1998_v5  ;;  %v6084_v10 = vadd.f32 %v9081_v27, %v2030_v40  ;;  %v2183_v47 = vld [vmem:[%s4608_s11 + $0x2f8] sm:$0xff] }
 0x2f5   : > { %v2078_v16 = vadd.f32 %v5949_v57, %v9068_v3  ;;  %v9070_v37 = vld [vmem:[#allocation81_spill] sm:$0xff]  ;;  %v6051_v57 = vadd.f32 %v9075_v43, %v1986_v15  ;;  %v9078_v43 = vld [vmem:[#allocation127_spill] sm:$0xff]  ;;  %v6087_v15 = vadd.f32 %v5941_v45, %v2034_v61  ;;  %v6095_v5 = vadd.f32 %v5955_v14, %v2046_v32  ;;  %v2311_v61 = vld [vmem:[%s5583_s16 + $0x2f8] sm:$0xff] }
 0x2f6   : > { %v6036_v50 = vadd.f32 %v9070_v37, %v1966_v58  ;;  %v6057_v37 = vadd.f32 %v5780_v29, %v1994_v20  ;;  %v6069_v58 = vadd.f32 %v9077_v48, %v2010_v34  ;;  %v6072_v53 = vadd.f32 %v9078_v43, %v2014_v0  ;;  %v9079_v28 = vld [vmem:[#allocation141_spill] sm:$0xff]  ;;  %v2180_v32 = vld [vmem:[%s4608_s11 + $0x2e0] sm:$0xff]  ;;  %9084 = vst [vmem:[#allocation81_spill] sm:$0xff] %v6113_v25 }
 0x2f7   : > { %v6075_v21 = vadd.f32 %v9079_v28, %v2018_v42  ;;  %v9080_v29 = vld [vmem:[#allocation137_spill] sm:$0xff]  ;;  %v6092_v20 = vadd.f32 %v2426_v35, %v2042_v54  ;;  %v6102_v40 = vadd.f32 %v2442_v23, %v2058_v55  ;;  %v6104_v34 = vadd.f32 %v2446_v6, %v2062_v2  ;;  %v2308_v14 = vld [vmem:[%s5583_s16 + $0x2e0] sm:$0xff]  ;;  %v9085_v23 = vld [vmem:[#allocation134_spill] sm:$0xff] }
 0x2f8   : > { %v6078_v60 = vadd.f32 %v9080_v29, %v2022_v38  ;;  %v6106_v45 = vadd.f32 %v2450_v51, %v2066_v31  ;;  %v9083_v7 = vld [vmem:[#allocation133_spill] sm:$0xff]  ;;  %vm2606_vm14 = vcmp.gt.f32.partialorder %v6036_v50, 0.0  ;;  %vm2610_vm15 = vcmp.gt.f32.partialorder %v6039_v63, 0.0  ;;  %1936 = vperm.xlu0 %4132, %v9085_v23   ;;  %v2181_v31 = vld [vmem:[%s4608_s11 + $0x2e8] sm:$0xff]  ;;  %v2304_v51 = vld [vmem:[%s5583_s16 + $0x2c0] sm:$0xff] }
 0x2f9   : > { %1941 = vperm.xlu1 %4131, %v9083_v7   ;;  %vm2622_vm9 = vcmp.gt.f32.partialorder %v6048_v22, 0.0  ;;  %vm2626_vm12 = vcmp.gt.f32.partialorder %v6051_v57, 0.0  ;;  %v6126_v2 = vmul.f32 0.2, %v6033_v26  ;;  %v6131_v54 = vadd.f32 %v5970_v1, %v2074_v59  ;;  %v2176_v59 = vld [vmem:[%s4608_s11 + $0x2c0] sm:$0xff] }
 0x2fa   : > { %9082 = vst [vmem:[#allocation87_spill] sm:$0xff] %v6106_v45  ;;  %vm2634_vm6 = vcmp.gt.f32.partialorder %v6057_v37, 0.0  ;;  %vm2638_vm5 = vcmp.gt.f32.partialorder %v6060_v36, 0.0  ;;  %v6138_v35 = vmul.f32 0.2, %v6036_v50  ;;  %v6149_v1 = vadd.f32 %v5968_v17, %v2078_v16  ;;  %v2177_v16 = vld [vmem:[%s4608_s11 + $0x2c8] sm:$0xff] }
 0x2fb   : > { %v6141_v6 = vmul.f32 0.2, %v6039_v63  ;;  %v6156_v0 = vmul.f32 0.2, %v6045_v39  ;;  %v6159_v42 = vmul.f32 0.2, %v6048_v22  ;;  %v6164_v38 = vmul.f32 %v2299_v52, %v2171_v41 }
 0x2fc   : > { %v6162_v44 = vmul.f32 0.2, %v6051_v57  ;;  %v2305_v17 = vld [vmem:[%s5583_s16 + $0x2c8] sm:$0xff]  ;;  %v6173_v19 = vmul.f32 0.2, %v6054_v18  ;;  %v6181_v33 = vmul.f32 %v2308_v14, %v2180_v32  ;;  %v6196_v29 = vmul.f32 %v2309_v46, %v2181_v31  ;;  %v9089_v52 = vld [vmem:[#allocation86_spill] sm:$0xff] }
 0x2fd   : > { %9086 = vst [vmem:[#allocation95_spill] sm:$0xff] %v6164_v38  ;;  %v6176_v49 = vmul.f32 0.2, %v6057_v37  ;;  %v6179_v55 = vmul.f32 0.2, %v6060_v36  ;;  %v6213_v14 = vmul.f32 %v2311_v61, %v2183_v47  ;;  %vm2710_vm7 = vcmp.gt.f32.partialorder %v6113_v25, 0.0 }
 0x2fe   : > { %9087 = vst [vmem:[#allocation91_spill] sm:$0xff] %v6181_v33  ;;  %v6188_v48 = vmul.f32 0.2, %v6063_v13  ;;  %v6191_v43 = vmul.f32 0.2, %v6066_v30  ;;  %9088 = vst [vmem:[#allocation103_spill] sm:$0xff] %v6196_v29  ;;  %v2858_v32 = vsel %vm2602_vm0, %v6033_v26, %v6126_v2  ;;  %v2862_v26 = vsel %vm2606_vm14, %v6036_v50, %v6138_v35 }
 0x2ff   : > { %v6194_v28 = vmul.f32 0.2, %v6069_v58  ;;  %v6203_v27 = vmul.f32 0.2, %v6072_v53  ;;  %v6206_v41 = vmul.f32 0.2, %v6075_v21  ;;  %v2866_v2 = vsel %vm2610_vm15, %v6039_v63, %v6141_v6 }
 0x300   : > { %v6209_v7 = vmul.f32 0.2, %v6078_v60  ;;  %9091 = vst [vmem:[#allocation99_spill] sm:$0xff] %v6213_v14  ;;  %vm2718_vm2 = vcmp.gt.f32.partialorder %v6149_v1, 0.0  ;;  %v2794_v23 = vmul.f32 0.2, %v6081_v62  ;;  %v6229_v14 = vmul.f32 %v2304_v51, %v2176_v59 }
 0x301   : > { %v2798_v31 = vmul.f32 0.2, %v6084_v10  ;;  %v2802_v46 = vmul.f32 0.2, %v6087_v15  ;;  %v2806_v29 = vmul.f32 0.2, %v6090_v12  ;;  %v6242_v59 = vmul.f32 %v2305_v17, %v2177_v16 }
 0x302   : > { %9096 = vst [vmem:[#allocation111_spill] sm:$0xff] %v6229_v14  ;;  %v2810_v3 = vmul.f32 0.2, %v6092_v20  ;;  %v2814_v4 = vmul.f32 0.2, %v6095_v5  ;;  %v9106_v47 = vld [vmem:[#allocation31_spill] sm:$0xff]  ;;  %vm3132_vm0 = vcmp.eq.s32.totalorder %v9110_v11, %v9089_v52  ;;  %v2870_v50 = vsel %vm2614_vm13, %v6042_v56, %v6144_v8 }
 0x303   : > { %9101 = vst [vmem:[#allocation107_spill] sm:$0xff] %v6242_v59  ;;  %v2818_v51 = vmul.f32 0.2, %v6097_v9  ;;  %v2822_v14 = vmul.f32 0.2, %v6100_v24  ;;  %vm3116_vm1 = vcmp.eq.s32.totalorder %v9106_v47, %v9089_v52  ;;  %v9111_v38 = vld [vmem:[#allocation37_spill] sm:$0xff]  ;;  %v2874_v63 = vsel %vm2618_vm10, %v6045_v39, %v6156_v0 }
 0x304   : > { %v2826_v61 = vmul.f32 0.2, %v6102_v40  ;;  %v2830_v16 = vmul.f32 0.2, %v6104_v34  ;;  %v2834_v17 = vmul.f32 0.2, %v6106_v45  ;;  %vm3140_vm4 = vcmp.eq.s32.totalorder %v9111_v38, %v9089_v52 }
 0x305   : > { %v2838_v59 = vmul.f32 0.2, %v6113_v25  ;;  %v2842_v45 = vmul.f32 0.2, %v6131_v54  ;;  %v2846_v25 = vmul.f32 0.2, %v6149_v1  ;;  %v2878_v35 = vsel %vm2622_vm9, %v6048_v22, %v6159_v42 }
 0x306   : > { %v9112_v33 = vld [vmem:[#allocation38_spill] sm:$0xff]  ;;  %v9113_v47 = vld [vmem:[#allocation40_spill] sm:$0xff]  ;;  %v2882_v6 = vsel %vm2626_vm12, %v6051_v57, %v6162_v44  ;;  %v9115_v56 = vld [vmem:[#allocation41_spill] sm:$0xff]  ;;  %v2886_v22 = vsel %vm2630_vm11, %v6054_v18, %v6173_v19  ;;  %v2890_v57 = vsel %vm2634_vm6, %v6057_v37, %v6176_v49  ;;  %v2894_v0 = vsel %vm2638_vm5, %v6060_v36, %v6179_v55 }
 0x307   : > { %vm3136_vm8 = vcmp.eq.s32.totalorder %v9112_v33, %v9089_v52  ;;  %vm3144_vm3 = vcmp.eq.s32.totalorder %v9113_v47, %v9089_v52  ;;  %v9114_v47 = vld [vmem:[#allocation39_spill] sm:$0xff]  ;;  %vm3156_vm13 = vcmp.eq.s32.totalorder %v9115_v56, %v9089_v52  ;;  %v9116_v8 = vld [vmem:[#allocation42_spill] sm:$0xff]  ;;  %v9117_v39 = vld [vmem:[#allocation44_spill] sm:$0xff]  ;;  %vm9118_vm9 = vcmp.gt.f32.partialorder %v6063_v13, 0.0 }
 0x308   : > { %vm3148_vm14 = vcmp.eq.s32.totalorder %v9114_v47, %v9089_v52  ;;  %vm3152_vm15 = vcmp.eq.s32.totalorder %v9116_v8, %v9089_v52  ;;  %v2898_v42 = vsel %vm9118_vm9, %v6063_v13, %v6188_v48  ;;  %v9119_v44 = vld [vmem:[#allocation43_spill] sm:$0xff]  ;;  %v9120_v18 = vld [vmem:[#allocation45_spill] sm:$0xff]  ;;  %v9121_v19 = vld [vmem:[#allocation46_spill] sm:$0xff]  ;;  %vm9123_vm5 = vcmp.gt.f32.partialorder %v6066_v30, 0.0 }
 0x309   : > { %v9122_v37 = vld [vmem:[#allocation48_spill] sm:$0xff]  ;;  %v2902_v36 = vsel %vm9123_vm5, %v6066_v30, %v6191_v43  ;;  %vm9124_vm9 = vcmp.gt.f32.partialorder %v6069_v58, 0.0  ;;  %vm9125_vm11 = vcmp.gt.f32.partialorder %v6072_v53, 0.0  ;;  %vm9126_vm10 = vcmp.gt.f32.partialorder %v6075_v21, 0.0  ;;  %v9127_v48 = vld [vmem:[#allocation47_spill] sm:$0xff]  ;;  %v2327_v33 = vld [vmem:[%s5583_s16 + $0x378] sm:$0xff] }
 0x30a   : > { %v2906_v13 = vsel %vm9124_vm9, %v6069_v58, %v6194_v28  ;;  %v2910_v49 = vsel %vm9125_vm11, %v6072_v53, %v6203_v27  ;;  %v2914_v55 = vsel %vm9126_vm10, %v6075_v21, %v6206_v41  ;;  %vm9128_vm5 = vcmp.gt.f32.partialorder %v6078_v60, 0.0  ;;  %v9147_v41 = vld [vmem:[#allocation22_spill] sm:$0xff]  ;;  %v2193_v38 = vld [vmem:[%s4608_s11 + $0x348] sm:$0xff]  ;;  %v2332_v47 = vld [vmem:[%s5583_s16 + $0x3a0] sm:$0xff] }
 0x30b   : > { %v2918_v30 = vsel %vm9128_vm5, %v6078_v60, %v6209_v7  ;;  %vm9129_vm9 = vcmp.gt.f32.partialorder %v6081_v62, 0.0  ;;  %vm9130_vm11 = vcmp.gt.f32.partialorder %v6084_v10, 0.0  ;;  %vm9131_vm12 = vcmp.gt.f32.partialorder %v6087_v15, 0.0  ;;  %v2207_v8 = vld [vmem:[%s4608_s11 + $0x3b8] sm:$0xff]  ;;  %v2333_v56 = vld [vmem:[%s5583_s16 + $0x3a8] sm:$0xff] }
 0x30c   : > { %v2922_v58 = vsel %vm9129_vm9, %v6081_v62, %v2794_v23  ;;  %v2926_v53 = vsel %vm9130_vm11, %v6084_v10, %v2798_v31  ;;  %v2930_v21 = vsel %vm9131_vm12, %v6087_v15, %v2802_v46  ;;  %vm9132_vm10 = vcmp.gt.f32.partialorder %v6090_v12, 0.0  ;;  %v9155_v23 = vld [vmem:[#allocation26_spill] sm:$0xff]  ;;  %v9157_v46 = vld [vmem:[#allocation25_spill] sm:$0xff] }
 0x30d   : > { %v2934_v43 = vsel %vm9132_vm10, %v6090_v12, %v2806_v29  ;;  %vm9133_vm6 = vcmp.gt.f32.partialorder %v6092_v20, 0.0  ;;  %vm9134_vm5 = vcmp.gt.f32.partialorder %v6095_v5, 0.0  ;;  %vm9135_vm9 = vcmp.gt.f32.partialorder %v6097_v9, 0.0  ;;  %v9145_v29 = vld [vmem:[#allocation18_spill] sm:$0xff] }
 0x30e   : > { %v2938_v60 = vsel %vm9133_vm6, %v6092_v20, %v2810_v3  ;;  %v6376_v62 = vsel %vm9134_vm5, %v6095_v5, %v2814_v4  ;;  %v6381_v10 = vsel %vm9135_vm9, %v6097_v9, %v2818_v51  ;;  %vm9136_vm12 = vcmp.gt.f32.partialorder %v6100_v24, 0.0  ;;  %v9139_v3 = vld [vmem:[#allocation87_spill] sm:$0xff]  ;;  %v9141_v5 = vld [vmem:[#allocation81_spill] sm:$0xff] }
 0x30f   : > { %v6386_v15 = vsel %vm9136_vm12, %v6100_v24, %v2822_v14  ;;  %vm9137_vm11 = vcmp.gt.f32.partialorder %v6102_v40, 0.0  ;;  %vm9138_vm6 = vcmp.gt.f32.partialorder %v6104_v34, 0.0  ;;  %vm9140_vm10 = vcmp.gt.f32.partialorder %v9139_v3, 0.0 }
 0x310   : > { %v6391_v12 = vsel %vm9137_vm11, %v6102_v40, %v2826_v61  ;;  %v6396_v4 = vsel %vm9138_vm6, %v6104_v34, %v2830_v16  ;;  %v6401_v20 = vsel %vm9140_vm10, %v9139_v3, %v2834_v17  ;;  %v6406_v9 = vsel %vm2710_vm7, %v9141_v5, %v2838_v59  ;;  %v9143_v34 = vld [vmem:[#allocation20_spill] sm:$0xff]  ;;  %v6454_v16 = vld [vmem:[%s4608_s11 + $0x2d8] sm:$0xff]  ;;  %v9165_v3 = vld [vmem:[#allocation29_spill] sm:$0xff] }
 0x311   : > { %vm9142_vm5 = vcmp.gt.f32.partialorder %v6131_v54, 0.0  ;;  %v6416_v40 = vsel %vm2718_vm2, %v6149_v1, %v2846_v25  ;;  %vm9144_vm9 = vcmp.eq.s32.totalorder %v9143_v34, %v9089_v52  ;;  %vm9146_vm12 = vcmp.eq.s32.totalorder %v9145_v29, %v9089_v52  ;;  %v9151_v1 = vld [vmem:[#allocation24_spill] sm:$0xff]  ;;  %v6457_v17 = vld [vmem:[%s5583_s16 + $0x2d8] sm:$0xff]  ;;  %v9232_v29 = vld [vmem:[#allocation75_spill] sm:$0xff] }
 0x312   : > { %v6411_v24 = vsel %vm9142_vm5, %v6131_v54, %v2842_v45  ;;  %v3192_v28 = vsel %vm9144_vm9, 0.0, %v2858_v32  ;;  %v3196_v27 = vsel %vm9146_vm12, 0.0, %v2862_v26  ;;  %vm9148_vm7 = vcmp.eq.s32.totalorder %v9147_v41, %v9089_v52  ;;  %v9149_v54 = vld [vmem:[#allocation21_spill] sm:$0xff]  ;;  %v9153_v32 = vld [vmem:[#allocation23_spill] sm:$0xff]  ;;  %v9159_v59 = vld [vmem:[#allocation28_spill] sm:$0xff] }
 0x313   : > { %v3200_v45 = vsel %vm9148_vm7, 0.0, %v2866_v2  ;;  %vm9150_vm11 = vcmp.eq.s32.totalorder %v9149_v54, %v9089_v52  ;;  %vm9152_vm2 = vcmp.eq.s32.totalorder %v9151_v1, %v9089_v52  ;;  %3320 = vst [vmem:[%s6434_s9 + $0x10] sm:$0xff] %v3192_v28  ;;  %vm9154_vm6 = vcmp.eq.s32.totalorder %v9153_v32, %v9089_v52  ;;  %3324 = vst [vmem:[%s6434_s9 + $0x30] sm:$0xff] %v3196_v27  ;;  %v6460_v26 = vld [vmem:[%s4608_s11 + $0x320] sm:$0xff]  ;;  %v6463_v2 = vld [vmem:[%s4608_s11 + $0x328] sm:$0xff] }
 0x314   : > { %v3204_v25 = vsel %vm9150_vm11, 0.0, %v2870_v50  ;;  %v3208_v7 = vsel %vm9152_vm2, 0.0, %v2874_v63  ;;  %v3212_v14 = vsel %vm9154_vm6, 0.0, %v2878_v35  ;;  %vm9156_vm10 = vcmp.eq.s32.totalorder %v9155_v23, %v9089_v52  ;;  %3328 = vst [vmem:[%s6434_s9 + $0x50] sm:$0xff] %v3200_v45  ;;  %v6466_v50 = vld [vmem:[%s5583_s16 + $0x320] sm:$0xff]  ;;  %v6469_v63 = vld [vmem:[%s5583_s16 + $0x328] sm:$0xff] }
 0x315   : > { %v3216_v31 = vsel %vm9156_vm10, 0.0, %v2882_v6  ;;  %vm9158_vm5 = vcmp.eq.s32.totalorder %v9157_v46, %v9089_v52  ;;  %vm9160_vm9 = vcmp.eq.s32.totalorder %v9159_v59, %v9089_v52  ;;  %3332 = vst [vmem:[%s6434_s9 + $0x70] sm:$0xff] %v3204_v25  ;;  %3336 = vst [vmem:[%s6434_s9 + $0x90] sm:$0xff] %v3208_v7  ;;  %v9161_v35 = vld [vmem:[#allocation27_spill] sm:$0xff]  ;;  %vm9166_vm11 = vcmp.eq.s32.totalorder %v9165_v3, %v9089_v52  ;;  %v9167_v28 = vld [vmem:[#allocation32_spill] sm:$0xff] }
 0x316   : > { %v3220_v61 = vsel %vm9158_vm5, 0.0, %v2886_v22  ;;  %v3224_v51 = vsel %vm9160_vm9, 0.0, %v2890_v57  ;;  %vm9162_vm12 = vcmp.eq.s32.totalorder %v9161_v35, %v9089_v52  ;;  %v9163_v22 = vld [vmem:[#allocation30_spill] sm:$0xff]  ;;  %v3236_v5 = vsel %vm9166_vm11, 0.0, %v2902_v36  ;;  %3340 = vst [vmem:[%s6434_s9 + $0xb0] sm:$0xff] %v3212_v14  ;;  %3344 = vst [vmem:[%s6434_s9 + $0xd0] sm:$0xff] %v3216_v31 }
 0x317   : > { %v3228_v6 = vsel %vm9162_vm12, 0.0, %v2894_v0  ;;  %vm9164_vm7 = vcmp.eq.s32.totalorder %v9163_v22, %v9089_v52  ;;  %vm9168_vm2 = vcmp.eq.s32.totalorder %v9167_v28, %v9089_v52  ;;  %3348 = vst [vmem:[%s6434_s9 + $0xf0] sm:$0xff] %v3220_v61  ;;  %3352 = vst [vmem:[%s6434_s9 + $0x110] sm:$0xff] %v3224_v51  ;;  %v6488_v0 = vld [vmem:[%s4608_s11 + $0x338] sm:$0xff]  ;;  %v6494_v45 = vld [vmem:[%s4608_s11 + $0x300] sm:$0xff]  ;;  %v3244_v61 = vsel %vm3116_vm1, 0.0, %v2910_v49 }
 0x318   : > { %v3232_v57 = vsel %vm9164_vm7, 0.0, %v2898_v42  ;;  %v3240_v27 = vsel %vm9168_vm2, 0.0, %v2906_v13  ;;  %v6491_v42 = vld [vmem:[%s5583_s16 + $0x338] sm:$0xff]  ;;  %v6497_v36 = vld [vmem:[%s4608_s11 + $0x308] sm:$0xff]  ;;  %v6503_v25 = vld [vmem:[%s5583_s16 + $0x300] sm:$0xff]  ;;  %3356 = vst [vmem:[%s6434_s9 + $0x130] sm:$0xff] %v3228_v6  ;;  %vm9177_vm1 = vcmp.eq.s32.totalorder %v9117_v39, %v9089_v52 }
 0x319   : > { %v6500_v13 = vld [vmem:[%s4608_s11 + $0x318] sm:$0xff]  ;;  %v6506_v7 = vld [vmem:[%s5583_s16 + $0x308] sm:$0xff]  ;;  %v9172_v22 = vld [vmem:[#allocation33_spill] sm:$0xff]  ;;  %3360 = vst [vmem:[%s6434_s9 + $0x150] sm:$0xff] %v3232_v57  ;;  %v3264_v6 = vsel %vm3136_vm8, 0.0, %v2930_v21  ;;  %v3268_v57 = vsel %vm3140_vm4, 0.0, %v2934_v43  ;;  %vm9179_vm4 = vcmp.eq.s32.totalorder %v9121_v19, %v9089_v52  ;;  %vm9180_vm8 = vcmp.eq.s32.totalorder %v9120_v18, %v9089_v52 }
 0x31a   : > { %v6509_v14 = vld [vmem:[%s5583_s16 + $0x318] sm:$0xff]  ;;  %vm9173_vm10 = vcmp.eq.s32.totalorder %v9172_v22, %v9089_v52  ;;  %v9174_v35 = vld [vmem:[#allocation36_spill] sm:$0xff]  ;;  %3364 = vst [vmem:[%s6434_s9 + $0x170] sm:$0xff] %v3236_v5  ;;  %3368 = vst [vmem:[%s6434_s9 + $0x190] sm:$0xff] %v3240_v27  ;;  %v3272_v27 = vsel %vm3144_vm3, 0.0, %v2938_v60  ;;  %v3288_v11 = vsel %vm9177_vm1, 0.0, %v6391_v12  ;;  %v1704_v12 = vpop.trf.xlu1  ;;  %vm9178_vm3 = vcmp.eq.s32.totalorder %v9119_v44, %v9089_v52 }
 0x31b   : > { %v9170_v51 = vld [vmem:[#allocation34_spill] sm:$0xff]  ;;  %v3252_v3 = vsel %vm9173_vm10, 0.0, %v2918_v30  ;;  %vm9175_vm5 = vcmp.eq.s32.totalorder %v9174_v35, %v9089_v52  ;;  %v6528_v49 = vld [vmem:[%s4608_s11 + $0x360] sm:$0xff]  ;;  %v2325_v35 = vld [vmem:[%s5583_s16 + $0x368] sm:$0xff]  ;;  %3372 = vst [vmem:[%s6434_s9 + $0x1b0] sm:$0xff] %v3244_v61  ;;  %v3284_v61 = vsel %vm3156_vm13, 0.0, %v6386_v15 }
 0x31c   : > { %vm9171_vm6 = vcmp.eq.s32.totalorder %v9170_v51, %v9089_v52  ;;  %v3256_v59 = vsel %vm9175_vm5, 0.0, %v2922_v58  ;;  %v2324_v30 = vld [vmem:[%s5583_s16 + $0x360] sm:$0xff]  ;;  %v3260_v58 = vsel %vm3132_vm0, 0.0, %v2926_v53  ;;  %3380 = vst [vmem:[%s6434_s9 + $0x1f0] sm:$0xff] %v3252_v3  ;;  %v2199_v53 = vld [vmem:[%s4608_s11 + $0x378] sm:$0xff]  ;;  %v2321_v60 = vld [vmem:[%s5583_s16 + $0x348] sm:$0xff]  ;;  %vm9181_vm0 = vcmp.eq.s32.totalorder %v9122_v37, %v9089_v52 }
 0x31d   : > { %v3248_v28 = vsel %vm9171_vm6, 0.0, %v2914_v55  ;;  %v6531_v55 = vld [vmem:[%s4608_s11 + $0x368] sm:$0xff]  ;;  %3384 = vst [vmem:[%s6434_s9 + $0x210] sm:$0xff] %v3256_v59  ;;  %v2192_v21 = vld [vmem:[%s4608_s11 + $0x340] sm:$0xff]  ;;  %v2195_v43 = vld [vmem:[%s4608_s11 + $0x358] sm:$0xff]  ;;  %v3276_v59 = vsel %vm3148_vm14, 0.0, %v6376_v62  ;;  %vm9184_vm14 = vcmp.eq.s32.totalorder %v9127_v48, %v9089_v52 }
 0x31e   : > { %3376 = vst [vmem:[%s6434_s9 + $0x1d0] sm:$0xff] %v3248_v28  ;;  %v2320_v5 = vld [vmem:[%s5583_s16 + $0x340] sm:$0xff]  ;;  %v2323_v28 = vld [vmem:[%s5583_s16 + $0x358] sm:$0xff]  ;;  %v3280_v3 = vsel %vm3152_vm15, 0.0, %v6381_v10  ;;  %3388 = vst [vmem:[%s6434_s9 + $0x230] sm:$0xff] %v3260_v58  ;;  %v3292_v58 = vsel %vm9178_vm3, 0.0, %v6396_v4  ;;  %v6608_v4 = vmul.f32 %v6457_v17, %v6454_v16  ;;  %v6632_v17 = vmul.f32 %v6491_v42, %v6488_v0 }
 0x31f   : > { %3392 = vst [vmem:[%s6434_s9 + $0x250] sm:$0xff] %v3264_v6  ;;  %3396 = vst [vmem:[%s6434_s9 + $0x270] sm:$0xff] %v3268_v57  ;;  %v2204_v62 = vld [vmem:[%s4608_s11 + $0x3a0] sm:$0xff]  ;;  %v2205_v10 = vld [vmem:[%s4608_s11 + $0x3a8] sm:$0xff]  ;;  %v3296_v6 = vsel %vm9179_vm4, 0.0, %v6401_v20  ;;  %v3300_v57 = vsel %vm9180_vm8, 0.0, %v6406_v9  ;;  %v6612_v20 = vmul.f32 %v6466_v50, %v6460_v26  ;;  %v6616_v9 = vmul.f32 %v6469_v63, %v6463_v2 }
 0x320   : > { %3400 = vst [vmem:[%s6434_s9 + $0x290] sm:$0xff] %v3272_v27  ;;  %v2335_v15 = vld [vmem:[%s5583_s16 + $0x3b8] sm:$0xff]  ;;  %v2200_v51 = vld [vmem:[%s4608_s11 + $0x380] sm:$0xff]  ;;  %v3304_v27 = vsel %vm9181_vm0, 0.0, %v6411_v24  ;;  %3404 = vst [vmem:[%s6434_s9 + $0x2b0] sm:$0xff] %v3276_v59  ;;  %v3308_v16 = vsel %vm9184_vm14, 0.0, %v6416_v40  ;;  %v6636_v26 = vmul.f32 %v6503_v25, %v6494_v45  ;;  %v6640_v2 = vmul.f32 %v6506_v7, %v6497_v36 }
 0x321   : > { %3408 = vst [vmem:[%s6434_s9 + $0x2d0] sm:$0xff] %v3280_v3  ;;  %3412 = vst [vmem:[%s6434_s9 + $0x2f0] sm:$0xff] %v3284_v61  ;;  %v2201_v24 = vld [vmem:[%s4608_s11 + $0x388] sm:$0xff]  ;;  %v2203_v59 = vld [vmem:[%s4608_s11 + $0x398] sm:$0xff]  ;;  %v6644_v40 = vmul.f32 %v6509_v14, %v6500_v13  ;;  %v6651_v42 = vmul.f32 %v2324_v30, %v6528_v49  ;;  %v6654_v45 = vmul.f32 %v2325_v35, %v6531_v55 }
 0x322   : > { %3416 = vst [vmem:[%s6434_s9 + $0x310] sm:$0xff] %v3288_v11  ;;  %9182 = vst [vmem:[#allocation131_spill] sm:$0xff] %v6608_v4  ;;  %v2328_v3 = vld [vmem:[%s5583_s16 + $0x380] sm:$0xff]  ;;  %v2329_v11 = vld [vmem:[%s5583_s16 + $0x388] sm:$0xff]  ;;  %v6674_v55 = vmul.f32 %v2332_v47, %v2204_v62  ;;  %v6678_v52 = vmul.f32 %v2335_v15, %v2207_v8 }
 0x323   : > { %9183 = vst [vmem:[#allocation127_spill] sm:$0xff] %v6612_v20  ;;  %3420 = vst [vmem:[%s6434_s9 + $0x330] sm:$0xff] %v3292_v58  ;;  %v2331_v50 = vld [vmem:[%s5583_s16 + $0x398] sm:$0xff]  ;;  %v2212_v63 = vld [vmem:[%s4608_s11 + $0x3e0] sm:$0xff] }
 0x324   : > { %3424 = vst [vmem:[%s6434_s9 + $0x350] sm:$0xff] %v3296_v6  ;;  %3428 = vst [vmem:[%s6434_s9 + $0x370] sm:$0xff] %v3300_v57  ;;  %v2213_v0 = vld [vmem:[%s4608_s11 + $0x3e8] sm:$0xff]  ;;  %v2214_v7 = vld [vmem:[%s4608_s11 + $0x3f0] sm:$0xff]  ;;  %v6663_v6 = vmul.f32 %v2327_v33, %v2199_v53  ;;  %v6665_v57 = vmul.f32 %v2320_v5, %v2192_v21  ;;  %v6684_v33 = vmul.f32 %v2331_v50, %v2203_v59 }
 0x325   : > { %3432 = vst [vmem:[%s6434_s9 + $0x390] sm:$0xff] %v3304_v27  ;;  %9185 = vst [vmem:[#allocation141_spill] sm:$0xff] %v6632_v17  ;;  %v9189_v25 = vld [vmem:[#allocation144_spill] sm:$0xff]  ;;  %v2340_v61 = vld [vmem:[%s5583_s16 + $0x3e0] sm:$0xff]  ;;  %v6667_v27 = vmul.f32 %v2321_v60, %v2193_v38  ;;  %v6680_v17 = vmul.f32 %v2328_v3, %v2200_v51 }
 0x326   : > { %9186 = vst [vmem:[#allocation137_spill] sm:$0xff] %v6636_v26  ;;  %9187 = vst [vmem:[#allocation146_spill] sm:$0xff] %v6644_v40  ;;  %v6657_v36 = vrot.slane %v1704_v12, %v9189_v25  ;;  %v2341_v13 = vld [vmem:[%s5583_s16 + $0x3e8] sm:$0xff]  ;;  %v9191_v14 = vld [vmem:[#allocation15_spill] sm:$0xff]  ;;  %v6676_v12 = vmul.f32 %v2333_v56, %v2205_v10  ;;  %v6686_v5 = vmul.f32 %v2340_v61, %v2212_v63 }
 0x327   : > { %3436 = vst [vmem:[%s6434_s9 + $0x3b0] sm:$0xff] %v3308_v16  ;;  %9188 = vst [vmem:[#allocation133_spill] sm:$0xff] %v6651_v42  ;;  %v3016_v58 = vadd.s32 248, %v9191_v14  ;;  %v6669_v16 = vmul.f32 %v2323_v28, %v2195_v43  ;;  %v2215_v49 = vld [vmem:[%s4608_s11 + $0x3f8] sm:$0xff]  ;;  %v2342_v30 = vld [vmem:[%s5583_s16 + $0x3f0] sm:$0xff]  ;;  %v6682_v14 = vmul.f32 %v2329_v11, %v2201_v24  ;;  %v6688_v38 = vmul.f32 %v2341_v13, %v2213_v0 }
 0x328   : > { %9190 = vst [vmem:[#allocation134_spill] sm:$0xff] %v6657_v36  ;;  %9192 = vst [vmem:[#allocation87_spill] sm:$0xff] %v6663_v6  ;;  %v2343_v35 = vld [vmem:[%s5583_s16 + $0x3f8] sm:$0xff]  ;;  %v6692_v43 = vmul.f32 %v2342_v30, %v2214_v7  ;;  %v9204_v56 = vld [vmem:[#allocation16_spill] sm:$0xff] }
 0x329   : > { %9193 = vst [vmem:[#allocation81_spill] sm:$0xff] %v6665_v57  ;;  %9194 = vst [vmem:[#allocation163_spill] sm:$0xff] %v6669_v16  ;;  %v9201_v53 = vld [vmem:[#allocation50_spill] sm:$0xff]  ;;  %v6694_v47 = vmul.f32 %v2343_v35, %v2215_v49  ;;  %v6697_v8 = vadd.s32 %v9204_v56, %v3016_v58  ;;  %v9206_v51 = vld [vmem:[#allocation49_spill] sm:$0xff] }
 0x32a   : > { %9195 = vst [vmem:[#allocation164_spill] sm:$0xff] %v6674_v55  ;;  %9196 = vst [vmem:[#allocation165_spill] sm:$0xff] %v6678_v52  ;;  %v1961_v21 = vadd.f32 %v6657_v36, %v9201_v53  ;;  %v1965_v60 = vadd.f32 %v6657_v36, %v9206_v51  ;;  %v9207_v28 = vld [vmem:[#allocation52_spill] sm:$0xff]  ;;  %v9208_v10 = vld [vmem:[#allocation51_spill] sm:$0xff] }
 0x32b   : > { %9197 = vst [vmem:[#allocation166_spill] sm:$0xff] %v6680_v17  ;;  %9198 = vst [vmem:[#allocation167_spill] sm:$0xff] %v6684_v33  ;;  %v1969_v62 = vadd.f32 %v6657_v36, %v9207_v28  ;;  %v1973_v15 = vadd.f32 %v6657_v36, %v9208_v10  ;;  %v9209_v24 = vld [vmem:[#allocation54_spill] sm:$0xff]  ;;  %v9210_v3 = vld [vmem:[#allocation53_spill] sm:$0xff] }
 0x32c   : > { %9199 = vst [vmem:[#allocation168_spill] sm:$0xff] %v6686_v5  ;;  %9200 = vst [vmem:[#allocation169_spill] sm:$0xff] %v6688_v38  ;;  %v1977_v59 = vadd.f32 %v6657_v36, %v9209_v24  ;;  %v1981_v11 = vadd.f32 %v6657_v36, %v9210_v3  ;;  %v9211_v50 = vld [vmem:[#allocation56_spill] sm:$0xff]  ;;  %v9212_v0 = vld [vmem:[#allocation55_spill] sm:$0xff] }
 0x32d   : > { %9202 = vst [vmem:[#allocation170_spill] sm:$0xff] %v6692_v43  ;;  %9203 = vst [vmem:[#allocation171_spill] sm:$0xff] %v6694_v47  ;;  %v1985_v63 = vadd.f32 %v6657_v36, %v9211_v50  ;;  %v1989_v7 = vadd.f32 %v6657_v36, %v9212_v0  ;;  %v9213_v61 = vld [vmem:[#allocation58_spill] sm:$0xff]  ;;  %v9214_v58 = vld [vmem:[#allocation57_spill] sm:$0xff] }
 0x32e   : > { %9205 = vst [vmem:[#allocation172_spill] sm:$0xff] %v6697_v8  ;;  %v1993_v13 = vadd.f32 %v6657_v36, %v9213_v61  ;;  %v1997_v49 = vadd.f32 %v6657_v36, %v9214_v58  ;;  %v9215_v30 = vld [vmem:[#allocation60_spill] sm:$0xff]  ;;  %v9216_v47 = vld [vmem:[#allocation59_spill] sm:$0xff]  ;;  %v9217_v38 = vld [vmem:[#allocation62_spill] sm:$0xff] }
 0x32f   : > { %v2001_v35 = vadd.f32 %v6657_v36, %v9215_v30  ;;  %v2005_v43 = vadd.f32 %v6657_v36, %v9216_v47  ;;  %v2009_v5 = vadd.f32 %v6657_v36, %v9217_v38  ;;  %v9218_v8 = vld [vmem:[#allocation61_spill] sm:$0xff]  ;;  %v9219_v52 = vld [vmem:[#allocation64_spill] sm:$0xff]  ;;  %v9220_v6 = vld [vmem:[#allocation63_spill] sm:$0xff] }
 0x330   : > { %v2013_v56 = vadd.f32 %v6657_v36, %v9218_v8  ;;  %v2017_v33 = vadd.f32 %v6657_v36, %v9219_v52  ;;  %v2021_v16 = vadd.f32 %v6657_v36, %v9220_v6  ;;  %v9221_v40 = vld [vmem:[#allocation66_spill] sm:$0xff]  ;;  %v9222_v55 = vld [vmem:[#allocation65_spill] sm:$0xff]  ;;  %v9223_v42 = vld [vmem:[#allocation68_spill] sm:$0xff] }
 0x331   : > { %v2025_v4 = vadd.f32 %v6657_v36, %v9221_v40  ;;  %v2029_v17 = vadd.f32 %v6657_v36, %v9222_v55  ;;  %v2033_v57 = vadd.f32 %v6657_v36, %v9223_v42  ;;  %v9224_v20 = vld [vmem:[#allocation67_spill] sm:$0xff]  ;;  %v9225_v48 = vld [vmem:[#allocation70_spill] sm:$0xff]  ;;  %v9226_v19 = vld [vmem:[#allocation69_spill] sm:$0xff] }
 0x332   : > { %v2037_v26 = vadd.f32 %v6657_v36, %v9224_v20  ;;  %v2041_v37 = vadd.f32 %v6657_v36, %v9225_v48  ;;  %v2045_v18 = vadd.f32 %v6657_v36, %v9226_v19  ;;  %v9227_v44 = vld [vmem:[#allocation72_spill] sm:$0xff]  ;;  %v9228_v22 = vld [vmem:[#allocation71_spill] sm:$0xff]  ;;  %v9229_v23 = vld [vmem:[#allocation74_spill] sm:$0xff]  ;;  %v2069_v48 = vadd.f32 %v6657_v36, %v9232_v29 }
 0x333   : > { %v2049_v39 = vadd.f32 %v6657_v36, %v9227_v44  ;;  %v2053_v31 = vadd.f32 %v6657_v36, %v9228_v22  ;;  %v2057_v46 = vadd.f32 %v6657_v36, %v9229_v23  ;;  %v9230_v32 = vld [vmem:[#allocation73_spill] sm:$0xff]  ;;  %v9231_v41 = vld [vmem:[#allocation76_spill] sm:$0xff]  ;;  %v9233_v20 = vld [vmem:[#allocation78_spill] sm:$0xff] }
 0x334   : > { %v2061_v1 = vadd.f32 %v6657_v36, %v9230_v32  ;;  %v2065_v54 = vadd.f32 %v6657_v36, %v9231_v41  ;;  %v2073_v19 = vadd.f32 %v6657_v36, %v9233_v20  ;;  %v9234_v42 = vld [vmem:[#allocation77_spill] sm:$0xff]  ;;  %v9235_v55 = vld [vmem:[#allocation84_spill] sm:$0xff]  ;;  %v9237_v23 = vld [vmem:[#allocation94_spill] sm:$0xff] }
 0x335   : > { %v2077_v44 = vadd.f32 %v6657_v36, %v9234_v42  ;;  %v2473_v22 = vadd.f32 %v9235_v55, %v1961_v21  ;;  %v9236_v40 = vld [vmem:[#allocation80_spill] sm:$0xff]  ;;  %v6762_v6 = vadd.f32 %v9237_v23, %v1969_v62  ;;  %v9238_v32 = vld [vmem:[#allocation90_spill] sm:$0xff] }
 0x336   : > { %v6759_v34 = vadd.f32 %v9236_v40, %v1965_v60  ;;  %v6765_v52 = vadd.f32 %v9238_v32, %v1973_v15  ;;  %v9239_v41 = vld [vmem:[#allocation102_spill] sm:$0xff]  ;;  %v9243_v40 = vld [vmem:[#allocation117_spill] sm:$0xff]  ;;  %v9245_v32 = vld [vmem:[#allocation123_spill] sm:$0xff] }
 0x337   : > { %v6768_v8 = vadd.f32 %v9239_v41, %v1977_v59  ;;  %v9240_v29 = vld [vmem:[#allocation98_spill] sm:$0xff]  ;;  %v6780_v21 = vadd.f32 %v9243_v40, %v1993_v13  ;;  %v6786_v62 = vadd.f32 %v9245_v32, %v2001_v35  ;;  %v9246_v41 = vld [vmem:[#allocation120_spill] sm:$0xff]  ;;  %v9252_v35 = vld [vmem:[#allocation145_spill] sm:$0xff]  ;;  %vm2601_vm13 = vcmp.gt.f32.partialorder %v2473_v22, 0.0 }
 0x338   : > { %v6771_v38 = vadd.f32 %v9240_v29, %v1981_v11  ;;  %v9241_v20 = vld [vmem:[#allocation110_spill] sm:$0xff]  ;;  %v6789_v15 = vadd.f32 %v9246_v41, %v2005_v43  ;;  %v9253_v43 = vld [vmem:[#allocation155_spill] sm:$0xff]  ;;  %v9254_v41 = vld [vmem:[#allocation152_spill] sm:$0xff]  ;;  %vm2605_vm15 = vcmp.gt.f32.partialorder %v6759_v34, 0.0  ;;  %vm2609_vm9 = vcmp.gt.f32.partialorder %v6762_v6, 0.0 }
 0x339   : > { %v6774_v47 = vadd.f32 %v9241_v20, %v1985_v63  ;;  %v9242_v36 = vld [vmem:[#allocation106_spill] sm:$0xff]  ;;  %v6810_v32 = vadd.f32 %v9253_v43, %v2033_v57  ;;  %v6831_v57 = vadd.f32 %v6616_v9, %v2061_v1  ;;  %v6849_v1 = vmul.f32 0.2, %v6762_v6 }
 0x33a   : > { %v6777_v55 = vadd.f32 %v9242_v36, %v1989_v7  ;;  %v9244_v23 = vld [vmem:[#allocation114_spill] sm:$0xff]  ;;  %v9249_v36 = vld [vmem:[#allocation140_spill] sm:$0xff]  ;;  %v6861_v9 = vmul.f32 0.2, %v6771_v38  ;;  %vm2613_vm12 = vcmp.gt.f32.partialorder %v6765_v52, 0.0  ;;  %vm2617_vm7 = vcmp.gt.f32.partialorder %v6768_v8, 0.0 }
 0x33b   : > { %v6783_v60 = vadd.f32 %v9244_v23, %v1997_v49  ;;  %v9247_v29 = vld [vmem:[#allocation130_spill] sm:$0xff]  ;;  %v6798_v63 = vadd.f32 %v9249_v36, %v2017_v33  ;;  %v9250_v7 = vld [vmem:[#allocation136_spill] sm:$0xff]  ;;  %v9251_v49 = vld [vmem:[#allocation149_spill] sm:$0xff]  ;;  %v6807_v23 = vadd.f32 %v9252_v35, %v2029_v17  ;;  %v6828_v17 = vadd.f32 %v6640_v2, %v2057_v46 }
 0x33c   : > { %v6792_v59 = vadd.f32 %v9247_v29, %v2009_v5  ;;  %v9248_v20 = vld [vmem:[#allocation126_spill] sm:$0xff]  ;;  %v6801_v13 = vadd.f32 %v9250_v7, %v2021_v16  ;;  %v6804_v40 = vadd.f32 %v9251_v49, %v2025_v4  ;;  %v1672_v5 = vpop.trf.xlu0  ;;  %v6813_v29 = vadd.f32 %v9254_v41, %v2037_v26  ;;  %v9256_v33 = vld [vmem:[#allocation159_spill] sm:$0xff] }
 0x33d   : > { %v6795_v11 = vadd.f32 %v9248_v20, %v2013_v56  ;;  %v9255_v56 = vld [vmem:[#allocation162_spill] sm:$0xff]  ;;  %v6819_v36 = vadd.f32 %v9256_v33, %v2045_v18  ;;  %v9257_v16 = vld [vmem:[#allocation107_spill] sm:$0xff]  ;;  %v2729_v26 = vmul.f32 0.2, %v2473_v22  ;;  %v6834_v35 = vadd.f32 %v6667_v27, %v2065_v54 }
 0x33e   : > { %v6816_v20 = vadd.f32 %v9255_v56, %v2041_v37  ;;  %v6822_v7 = vadd.f32 %v9257_v16, %v2049_v39  ;;  %v9258_v4 = vld [vmem:[#allocation103_spill] sm:$0xff]  ;;  %v6837_v37 = vadd.f32 %v6654_v45, %v2069_v48  ;;  %v6840_v39 = vrot.slane %v1672_v5, %v9189_v25 }
 0x33f   : > { %v6825_v49 = vadd.f32 %v9258_v4, %v2053_v31  ;;  %v6843_v18 = vadd.f32 %v6682_v14, %v2073_v19  ;;  %v6846_v46 = vmul.f32 0.2, %v6759_v34  ;;  %v6852_v31 = vmul.f32 0.2, %v6765_v52 }
 0x340   : > { %9259 = vst [vmem:[#allocation84_spill] sm:$0xff] %v6840_v39  ;;  %v6855_v54 = vadd.f32 %v6676_v12, %v2077_v44  ;;  %v6858_v48 = vmul.f32 0.2, %v6768_v8  ;;  %v6864_v19 = vmul.f32 0.2, %v6774_v47  ;;  %v6875_v44 = vsel %vm2601_vm13, %v2473_v22, %v2729_v26 }
 0x341   : > { %9260 = vst [vmem:[#allocation80_spill] sm:$0xff] %v6843_v18  ;;  %v6867_v2 = vmul.f32 0.2, %v6777_v55  ;;  %v6870_v45 = vmul.f32 0.2, %v6780_v21  ;;  %9262 = vst [vmem:[#allocation90_spill] sm:$0xff] %v6875_v44  ;;  %v6888_v5 = vadd.f32 %v6840_v39, %v9201_v53  ;;  %v6903_v33 = vadd.f32 %v6840_v39, %v9206_v51 }
 0x342   : > { %9261 = vst [vmem:[#allocation94_spill] sm:$0xff] %v6855_v54  ;;  %v6873_v14 = vmul.f32 0.2, %v6783_v60  ;;  %v6878_v27 = vmul.f32 0.2, %v6786_v62  ;;  %vm2621_vm11 = vcmp.gt.f32.partialorder %v6771_v38, 0.0  ;;  %v6920_v51 = vadd.f32 %v6840_v39, %v9207_v28 }
 0x343   : > { %v6881_v12 = vmul.f32 0.2, %v6789_v15  ;;  %v6884_v43 = vmul.f32 0.2, %v6792_v59  ;;  %9263 = vst [vmem:[#allocation102_spill] sm:$0xff] %v6888_v5  ;;  %9264 = vst [vmem:[#allocation98_spill] sm:$0xff] %v6903_v33  ;;  %v6937_v28 = vadd.f32 %v6840_v39, %v9208_v10  ;;  %v6954_v10 = vadd.f32 %v6840_v39, %v9209_v24 }
 0x344   : > { %v6893_v22 = vmul.f32 0.2, %v6795_v11  ;;  %v6896_v41 = vmul.f32 0.2, %v6798_v63  ;;  %v6899_v56 = vmul.f32 0.2, %v6801_v13  ;;  %v6971_v24 = vadd.f32 %v6840_v39, %v9210_v3 }
 0x345   : > { %vm2625_vm2 = vcmp.gt.f32.partialorder %v6774_v47, 0.0  ;;  %v6910_v16 = vmul.f32 0.2, %v6804_v40  ;;  %v6913_v4 = vmul.f32 0.2, %v6807_v23  ;;  %9265 = vst [vmem:[#allocation110_spill] sm:$0xff] %v6920_v51  ;;  %v6997_v3 = vadd.f32 %v6840_v39, %v9213_v61 }
 0x346   : > { %v6916_v26 = vmul.f32 0.2, %v6810_v32  ;;  %vm2629_vm6 = vcmp.gt.f32.partialorder %v6777_v55, 0.0  ;;  %vm2633_vm10 = vcmp.gt.f32.partialorder %v6780_v21, 0.0  ;;  %vm2637_vm5 = vcmp.gt.f32.partialorder %v6783_v60, 0.0  ;;  %9266 = vst [vmem:[#allocation106_spill] sm:$0xff] %v6937_v28 }
 0x347   : > { %vm2641_vm1 = vcmp.gt.f32.partialorder %v6786_v62, 0.0  ;;  %v6927_v53 = vmul.f32 0.2, %v6813_v29  ;;  %v6930_v44 = vmul.f32 0.2, %v6816_v20  ;;  %vm2645_vm3 = vcmp.gt.f32.partialorder %v6789_v15, 0.0 }
 0x348   : > { %v6933_v33 = vmul.f32 0.2, %v6819_v36  ;;  %vm2649_vm4 = vcmp.gt.f32.partialorder %v6792_v59, 0.0  ;;  %v6944_v51 = vmul.f32 0.2, %v6822_v7  ;;  %9269 = vst [vmem:[#allocation123_spill] sm:$0xff] %v6954_v10 }
 0x349   : > { %v6947_v5 = vmul.f32 0.2, %v6825_v49  ;;  %v6950_v25 = vmul.f32 0.2, %v6828_v17  ;;  %v6961_v28 = vmul.f32 0.2, %v6831_v57 }
 0x34a   : > { %9272 = vst [vmem:[#allocation126_spill] sm:$0xff] %v6971_v24  ;;  %v6978_v10 = vmul.f32 0.2, %v6843_v18  ;;  %v6989_v24 = vadd.f32 %v6840_v39, %v9212_v0  ;;  %9277 = vst [vmem:[#allocation155_spill] sm:$0xff] %v6997_v3  ;;  %v9282_v61 = vld [vmem:[#allocation62_spill] sm:$0xff]  ;;  %v9291_v18 = vld [vmem:[#allocation20_spill] sm:$0xff] }
 0x34b   : > { %9267 = vst [vmem:[#allocation117_spill] sm:$0xff] %v6947_v5  ;;  %9268 = vst [vmem:[#allocation114_spill] sm:$0xff] %v6950_v25  ;;  %v6964_v5 = vmul.f32 0.2, %v6834_v35  ;;  %v6967_v25 = vmul.f32 0.2, %v6837_v37  ;;  %v7016_v3 = vadd.f32 %v6840_v39, %v9282_v61 }
 0x34c   : > { %9273 = vst [vmem:[#allocation140_spill] sm:$0xff] %v6978_v10  ;;  %9276 = vst [vmem:[#allocation145_spill] sm:$0xff] %v6989_v24  ;;  %v9280_v24 = vld [vmem:[#allocation59_spill] sm:$0xff] }
 0x34d   : > { %9270 = vst [vmem:[#allocation120_spill] sm:$0xff] %v6964_v5  ;;  %9271 = vst [vmem:[#allocation130_spill] sm:$0xff] %v6967_v25  ;;  %v6981_v5 = vmul.f32 0.2, %v6855_v54  ;;  %v6985_v25 = vadd.f32 %v6840_v39, %v9211_v50  ;;  %v7001_v50 = vadd.f32 %v6840_v39, %v9214_v58  ;;  %v7009_v0 = vadd.f32 %v6840_v39, %v9280_v24  ;;  %v9284_v58 = vld [vmem:[#allocation61_spill] sm:$0xff]  ;;  %v9288_v24 = vld [vmem:[#allocation63_spill] sm:$0xff] }
 0x34e   : > { %9283 = vst [vmem:[#allocation107_spill] sm:$0xff] %v7016_v3  ;;  %v9292_v54 = vld [vmem:[#allocation66_spill] sm:$0xff]  ;;  %v9294_v3 = vld [vmem:[#allocation65_spill] sm:$0xff] }
 0x34f   : > { %9274 = vst [vmem:[#allocation136_spill] sm:$0xff] %v6981_v5  ;;  %9275 = vst [vmem:[#allocation149_spill] sm:$0xff] %v6985_v25  ;;  %v7005_v25 = vadd.f32 %v6840_v39, %v9215_v30  ;;  %v9286_v30 = vld [vmem:[#allocation64_spill] sm:$0xff]  ;;  %v9290_v5 = vld [vmem:[#allocation85_spill] sm:$0xff]  ;;  %v7034_v10 = vadd.f32 %v6840_v39, %v9292_v54  ;;  %v7038_v61 = vadd.f32 %v6840_v39, %v9294_v3 }
 0x350   : > { %9278 = vst [vmem:[#allocation152_spill] sm:$0xff] %v7001_v50  ;;  %9281 = vst [vmem:[#allocation159_spill] sm:$0xff] %v7009_v0  ;;  %v7020_v50 = vadd.f32 %v6840_v39, %v9284_v58  ;;  %v7028_v0 = vadd.f32 %v6840_v39, %v9288_v24 }
 0x351   : > { %9279 = vst [vmem:[#allocation162_spill] sm:$0xff] %v7005_v25  ;;  %v7024_v25 = vadd.f32 %v6840_v39, %v9286_v30  ;;  %9293 = vst [vmem:[#allocation175_spill] sm:$0xff] %v7034_v10  ;;  %v9322_v10 = vld [vmem:[#allocation75_spill] sm:$0xff] }
 0x352   : > { %9285 = vst [vmem:[#allocation103_spill] sm:$0xff] %v7020_v50  ;;  %9289 = vst [vmem:[#allocation174_spill] sm:$0xff] %v7028_v0  ;;  %v9296_v50 = vld [vmem:[#allocation68_spill] sm:$0xff]  ;;  %v9310_v0 = vld [vmem:[#allocation71_spill] sm:$0xff]  ;;  %v7094_v3 = vadd.f32 %v6840_v39, %v9322_v10  ;;  %v2865_v10 = vsel %vm2609_vm9, %v6762_v6, %v6849_v1  ;;  %v2873_v6 = vsel %vm2617_vm7, %v6768_v8, %v6858_v48 }
 0x353   : > { %9287 = vst [vmem:[#allocation173_spill] sm:$0xff] %v7024_v25  ;;  %9295 = vst [vmem:[#allocation176_spill] sm:$0xff] %v7038_v61  ;;  %v7042_v58 = vadd.f32 %v6840_v39, %v9296_v50  ;;  %v9298_v25 = vld [vmem:[#allocation67_spill] sm:$0xff]  ;;  %v9304_v61 = vld [vmem:[#allocation70_spill] sm:$0xff]  ;;  %v7070_v24 = vadd.f32 %v6840_v39, %v9310_v0  ;;  %v2881_v1 = vsel %vm2625_vm2, %v6774_v47, %v6864_v19  ;;  %vm9352_vm2 = vcmp.gt.f32.partialorder %v6810_v32, 0.0 }
 0x354   : > { %v7046_v30 = vadd.f32 %v6840_v39, %v9298_v25  ;;  %v7058_v50 = vadd.f32 %v6840_v39, %v9304_v61  ;;  %9323 = vst [vmem:[#allocation186_spill] sm:$0xff] %v7094_v3  ;;  %v2861_v3 = vsel %vm2605_vm15, %v6759_v34, %v6846_v46  ;;  %v2869_v34 = vsel %vm2613_vm12, %v6765_v52, %v6852_v31  ;;  %v9336_v52 = vld [vmem:[#allocation37_spill] sm:$0xff]  ;;  %v9337_v31 = vld [vmem:[#allocation38_spill] sm:$0xff]  ;;  %v9338_v8 = vld [vmem:[#allocation40_spill] sm:$0xff] }
 0x355   : > { %9297 = vst [vmem:[#allocation177_spill] sm:$0xff] %v7042_v58  ;;  %v9306_v58 = vld [vmem:[#allocation69_spill] sm:$0xff]  ;;  %9311 = vst [vmem:[#allocation182_spill] sm:$0xff] %v7070_v24  ;;  %v9320_v24 = vld [vmem:[#allocation76_spill] sm:$0xff]  ;;  %v2877_v46 = vsel %vm2621_vm11, %v6771_v38, %v6861_v9  ;;  %vm3139_vm9 = vcmp.eq.s32.totalorder %v9336_v52, %v9290_v5  ;;  %vm3135_vm12 = vcmp.eq.s32.totalorder %v9337_v31, %v9290_v5 }
 0x356   : > { %9299 = vst [vmem:[#allocation178_spill] sm:$0xff] %v7046_v30  ;;  %9305 = vst [vmem:[#allocation179_spill] sm:$0xff] %v7058_v50  ;;  %v7062_v25 = vadd.f32 %v6840_v39, %v9306_v58  ;;  %v9308_v30 = vld [vmem:[#allocation72_spill] sm:$0xff]  ;;  %v7090_v61 = vadd.f32 %v6840_v39, %v9320_v24  ;;  %v9324_v50 = vld [vmem:[#allocation27_spill] sm:$0xff]  ;;  %vm3143_vm7 = vcmp.eq.s32.totalorder %v9338_v8, %v9290_v5 }
 0x357   : > { %v7066_v54 = vadd.f32 %v6840_v39, %v9308_v30  ;;  %v9325_v58 = vld [vmem:[#allocation29_spill] sm:$0xff]  ;;  %v2885_v38 = vsel %vm2629_vm6, %v6777_v55, %v6867_v2  ;;  %v2889_v47 = vsel %vm2633_vm10, %v6780_v21, %v6870_v45  ;;  %v2893_v48 = vsel %vm2637_vm5, %v6783_v60, %v6873_v14  ;;  %v9339_v19 = vld [vmem:[#allocation39_spill] sm:$0xff]  ;;  %v9341_v2 = vld [vmem:[#allocation42_spill] sm:$0xff] }
 0x358   : > { %9307 = vst [vmem:[#allocation180_spill] sm:$0xff] %v7062_v25  ;;  %v9316_v25 = vld [vmem:[#allocation74_spill] sm:$0xff]  ;;  %9321 = vst [vmem:[#allocation185_spill] sm:$0xff] %v7090_v61  ;;  %v7110_v61 = vadd.f32 %v6840_v39, %v9234_v42  ;;  %v2897_v9 = vsel %vm2641_vm1, %v6786_v62, %v6878_v27  ;;  %vm3147_vm11 = vcmp.eq.s32.totalorder %v9339_v19, %v9290_v5  ;;  %v9340_v55 = vld [vmem:[#allocation41_spill] sm:$0xff]  ;;  %vm9343_vm5 = vcmp.gt.f32.partialorder %v6795_v11, 0.0 }
 0x359   : > { %9309 = vst [vmem:[#allocation181_spill] sm:$0xff] %v7066_v54  ;;  %v7082_v30 = vadd.f32 %v6840_v39, %v9316_v25  ;;  %v9318_v54 = vld [vmem:[#allocation73_spill] sm:$0xff]  ;;  %v9331_v25 = vld [vmem:[#allocation31_spill] sm:$0xff]  ;;  %vm3151_vm6 = vcmp.eq.s32.totalorder %v9341_v2, %v9290_v5  ;;  %v9342_v21 = vld [vmem:[#allocation44_spill] sm:$0xff]  ;;  %v2901_v60 = vsel %vm2645_vm3, %v6789_v15, %v6881_v12  ;;  %v2905_v62 = vsel %vm2649_vm4, %v6792_v59, %v6884_v43 }
 0x35a   : > { %v7086_v0 = vadd.f32 %v6840_v39, %v9318_v54  ;;  %v9327_v54 = vld [vmem:[#allocation32_spill] sm:$0xff]  ;;  %9330 = vst [vmem:[#allocation188_spill] sm:$0xff] %v7110_v61  ;;  %vm3115_vm14 = vcmp.eq.s32.totalorder %v9331_v25, %v9290_v5  ;;  %v9335_v61 = vld [vmem:[#allocation35_spill] sm:$0xff]  ;;  %v2909_v45 = vsel %vm9343_vm5, %v6795_v11, %v6893_v22  ;;  %vm9344_vm1 = vcmp.gt.f32.partialorder %v6798_v63, 0.0  ;;  %v9347_v12 = vld [vmem:[#allocation46_spill] sm:$0xff] }
 0x35b   : > { %9317 = vst [vmem:[#allocation183_spill] sm:$0xff] %v7082_v30  ;;  %v9326_v30 = vld [vmem:[#allocation30_spill] sm:$0xff]  ;;  %vm3131_vm15 = vcmp.eq.s32.totalorder %v9335_v61, %v9290_v5  ;;  %v2913_v14 = vsel %vm9344_vm1, %v6798_v63, %v6896_v41  ;;  %v9345_v27 = vld [vmem:[#allocation43_spill] sm:$0xff]  ;;  %vm9349_vm5 = vcmp.gt.f32.partialorder %v6801_v13, 0.0  ;;  %vm9350_vm1 = vcmp.gt.f32.partialorder %v6804_v40, 0.0  ;;  %v1768_v41 = vpop.trf.xlu1  ;;  %v9449_v8 = vld [vmem:[#allocation109_spill] sm:$0xff] }
 0x35c   : > { %9319 = vst [vmem:[#allocation184_spill] sm:$0xff] %v7086_v0  ;;  %v9328_v0 = vld [vmem:[#allocation78_spill] sm:$0xff]  ;;  %vm3163_vm10 = vcmp.eq.s32.totalorder %v9345_v27, %v9290_v5  ;;  %v2917_v11 = vsel %vm9349_vm5, %v6801_v13, %v6899_v56  ;;  %v2921_v63 = vsel %vm9350_vm1, %v6804_v40, %v6910_v16  ;;  %vm9351_vm3 = vcmp.gt.f32.partialorder %v6807_v23, 0.0  ;;  %v9358_v56 = vld [vmem:[#allocation117_spill] sm:$0xff]  ;;  %v9368_v16 = vld [vmem:[#allocation80_spill] sm:$0xff] }
 0x35d   : > { %v7106_v24 = vadd.f32 %v6840_v39, %v9328_v0  ;;  %v9332_v0 = vld [vmem:[#allocation33_spill] sm:$0xff]  ;;  %v9334_v39 = vld [vmem:[#allocation36_spill] sm:$0xff]  ;;  %v2925_v43 = vsel %vm9351_vm3, %v6807_v23, %v6913_v4  ;;  %v2929_v22 = vsel %vm9352_vm2, %v6810_v32, %v6916_v26  ;;  %vm9354_vm5 = vcmp.gt.f32.partialorder %v6813_v29, 0.0  ;;  %v9371_v26 = vld [vmem:[#allocation94_spill] sm:$0xff] }
 0x35e   : > { %vm3123_vm8 = vcmp.eq.s32.totalorder %v9332_v0, %v9290_v5  ;;  %vm3127_vm13 = vcmp.eq.s32.totalorder %v9334_v39, %v9290_v5  ;;  %v2933_v13 = vsel %vm9354_vm5, %v6813_v29, %v6927_v53  ;;  %vm9355_vm1 = vcmp.gt.f32.partialorder %v6816_v20, 0.0  ;;  %v9360_v29 = vld [vmem:[#allocation114_spill] sm:$0xff]  ;;  %v9370_v4 = vld [vmem:[#allocation136_spill] sm:$0xff]  ;;  %v9443_v27 = vld [vmem:[#allocation75_spill] sm:$0xff] }
 0x35f   : > { %9329 = vst [vmem:[#allocation187_spill] sm:$0xff] %v7106_v24  ;;  %v9333_v24 = vld [vmem:[#allocation34_spill] sm:$0xff]  ;;  %v2937_v40 = vsel %vm9355_vm1, %v6816_v20, %v6930_v44  ;;  %vm9356_vm3 = vcmp.gt.f32.partialorder %v6819_v36, 0.0  ;;  %vm9357_vm2 = vcmp.gt.f32.partialorder %v6822_v7, 0.0  ;;  %vm9359_vm4 = vcmp.gt.f32.partialorder %v6825_v49, 0.0  ;;  %v9363_v44 = vld [vmem:[#allocation120_spill] sm:$0xff] }
 0x360   : > { %vm3119_vm0 = vcmp.eq.s32.totalorder %v9333_v24, %v9290_v5  ;;  %v2941_v23 = vsel %vm9356_vm3, %v6819_v36, %v6933_v33  ;;  %v2945_v32 = vsel %vm9357_vm2, %v6822_v7, %v6944_v51  ;;  %v2949_v53 = vsel %vm9359_vm4, %v6825_v49, %v9358_v56  ;;  %v9365_v7 = vld [vmem:[#allocation130_spill] sm:$0xff]  ;;  %v9367_v33 = vld [vmem:[#allocation140_spill] sm:$0xff]  ;;  %v9451_v31 = vld [vmem:[#allocation105_spill] sm:$0xff] }
 0x361   : > { %vm9361_vm5 = vcmp.gt.f32.partialorder %v6828_v17, 0.0  ;;  %vm9362_vm1 = vcmp.gt.f32.partialorder %v6831_v57, 0.0  ;;  %vm9364_vm3 = vcmp.gt.f32.partialorder %v6834_v35, 0.0  ;;  %vm9366_vm4 = vcmp.gt.f32.partialorder %v6837_v37, 0.0  ;;  %v9381_v15 = vld [vmem:[#allocation90_spill] sm:$0xff]  ;;  %v9452_v61 = vld [vmem:[#allocation155_spill] sm:$0xff] }
 0x362   : > { %v2953_v20 = vsel %vm9361_vm5, %v6828_v17, %v9360_v29  ;;  %v2957_v36 = vsel %vm9362_vm1, %v6831_v57, %v6961_v28  ;;  %v2961_v51 = vsel %vm9364_vm3, %v6834_v35, %v9363_v44  ;;  %v2965_v49 = vsel %vm9366_vm4, %v6837_v37, %v9365_v7  ;;  %v9373_v57 = vld [vmem:[#allocation144_spill] sm:$0xff]  ;;  %v9375_v35 = vld [vmem:[#allocation102_spill] sm:$0xff]  ;;  %v9376_v29 = vld [vmem:[#allocation83_spill] sm:$0xff] }
 0x363   : > { %vm9369_vm2 = vcmp.gt.f32.partialorder %v9368_v16, 0.0  ;;  %vm9372_vm5 = vcmp.gt.f32.partialorder %v9371_v26, 0.0  ;;  %v7263_v56 = vrot.slane %v1768_v41, %v9373_v57  ;;  %v7267_v44 = vadd.f32 %v9376_v29, %v9375_v35  ;;  %v9377_v37 = vld [vmem:[#allocation98_spill] sm:$0xff]  ;;  %v9378_v7 = vld [vmem:[#allocation79_spill] sm:$0xff]  ;;  %v9387_v29 = vld [vmem:[#allocation21_spill] sm:$0xff] }
 0x364   : > { %v2969_v17 = vsel %vm9369_vm2, %v9368_v16, %v9367_v33  ;;  %v2973_v28 = vsel %vm9372_vm5, %v9371_v26, %v9370_v4  ;;  %v7271_v42 = vadd.f32 %v9378_v7, %v9377_v37  ;;  %v9379_v33 = vld [vmem:[#allocation110_spill] sm:$0xff]  ;;  %v9380_v16 = vld [vmem:[#allocation93_spill] sm:$0xff]  ;;  %vm9382_vm1 = vcmp.eq.s32.totalorder %v9291_v18, %v9290_v5  ;;  %v9389_v7 = vld [vmem:[#allocation24_spill] sm:$0xff] }
 0x365   : > { %9374 = vst [vmem:[#allocation117_spill] sm:$0xff] %v7263_v56  ;;  %v7275_v59 = vadd.f32 %v9380_v16, %v9379_v33  ;;  %v3191_v41 = vsel %vm9382_vm1, 0.0, %v9381_v15  ;;  %v9383_v4 = vld [vmem:[#allocation18_spill] sm:$0xff]  ;;  %vm9388_vm2 = vcmp.eq.s32.totalorder %v9387_v29, %v9290_v5  ;;  %vm9390_vm5 = vcmp.eq.s32.totalorder %v9389_v7, %v9290_v5  ;;  %v9391_v15 = vld [vmem:[#allocation23_spill] sm:$0xff]  ;;  %v9397_v29 = vld [vmem:[#allocation28_spill] sm:$0xff] }
 0x366   : > { %vm9384_vm3 = vcmp.eq.s32.totalorder %v9383_v4, %v9290_v5  ;;  %v9385_v57 = vld [vmem:[#allocation22_spill] sm:$0xff]  ;;  %v3203_v37 = vsel %vm9388_vm2, 0.0, %v2869_v34  ;;  %v3207_v33 = vsel %vm9390_vm5, 0.0, %v2873_v6  ;;  %3319 = vst [vmem:[%s6434_s9 + $0x8] sm:$0xff] %v3191_v41  ;;  %vm9392_vm1 = vcmp.eq.s32.totalorder %v9391_v15, %v9290_v5  ;;  %v9455_v0 = vld [vmem:[#allocation113_spill] sm:$0xff]  ;;  %v9478_v4 = vld [vmem:[#allocation151_spill] sm:$0xff] }
 0x367   : > { %v3195_v26 = vsel %vm9384_vm3, 0.0, %v2861_v3  ;;  %vm9386_vm4 = vcmp.eq.s32.totalorder %v9385_v57, %v9290_v5  ;;  %v3211_v3 = vsel %vm9392_vm1, 0.0, %v2877_v46  ;;  %v9393_v16 = vld [vmem:[#allocation26_spill] sm:$0xff]  ;;  %v9395_v57 = vld [vmem:[#allocation25_spill] sm:$0xff]  ;;  %vm9398_vm2 = vcmp.eq.s32.totalorder %v9397_v29, %v9290_v5  ;;  %3331 = vst [vmem:[%s6434_s9 + $0x68] sm:$0xff] %v3203_v37  ;;  %3335 = vst [vmem:[%s6434_s9 + $0x88] sm:$0xff] %v3207_v33 }
 0x368   : > { %v3199_v35 = vsel %vm9386_vm4, 0.0, %v2865_v10  ;;  %vm9394_vm3 = vcmp.eq.s32.totalorder %v9393_v16, %v9290_v5  ;;  %vm9396_vm4 = vcmp.eq.s32.totalorder %v9395_v57, %v9290_v5  ;;  %v3223_v7 = vsel %vm9398_vm2, 0.0, %v2889_v47  ;;  %3323 = vst [vmem:[%s6434_s9 + $0x28] sm:$0xff] %v3195_v26  ;;  %3339 = vst [vmem:[%s6434_s9 + $0xa8] sm:$0xff] %v3211_v3  ;;  %v9410_v26 = vld [vmem:[#allocation50_spill] sm:$0xff]  ;;  %v9412_v37 = vld [vmem:[#allocation89_spill] sm:$0xff] }
 0x369   : > { %v3215_v10 = vsel %vm9394_vm3, 0.0, %v2881_v1  ;;  %v3219_v34 = vsel %vm9396_vm4, 0.0, %v2885_v38  ;;  %3327 = vst [vmem:[%s6434_s9 + $0x48] sm:$0xff] %v3199_v35  ;;  %vm9399_vm5 = vcmp.eq.s32.totalorder %v9324_v50, %v9290_v5  ;;  %vm9400_vm1 = vcmp.eq.s32.totalorder %v9326_v30, %v9290_v5  ;;  %3351 = vst [vmem:[%s6434_s9 + $0x108] sm:$0xff] %v3223_v7  ;;  %v9411_v35 = vld [vmem:[#allocation106_spill] sm:$0xff]  ;;  %v9413_v7 = vld [vmem:[#allocation123_spill] sm:$0xff] }
 0x36a   : > { %v3227_v6 = vsel %vm9399_vm5, 0.0, %v2893_v48  ;;  %v3231_v46 = vsel %vm9400_vm1, 0.0, %v2897_v9  ;;  %vm9401_vm3 = vcmp.eq.s32.totalorder %v9325_v58, %v9290_v5  ;;  %vm9402_vm4 = vcmp.eq.s32.totalorder %v9327_v54, %v9290_v5  ;;  %3343 = vst [vmem:[%s6434_s9 + $0xc8] sm:$0xff] %v3215_v10  ;;  %3347 = vst [vmem:[%s6434_s9 + $0xe8] sm:$0xff] %v3219_v34  ;;  %v9414_v33 = vld [vmem:[#allocation101_spill] sm:$0xff]  ;;  %v9415_v3 = vld [vmem:[#allocation47_spill] sm:$0xff] }
 0x36b   : > { %v3235_v1 = vsel %vm9401_vm3, 0.0, %v2901_v60  ;;  %v3239_v38 = vsel %vm9402_vm4, 0.0, %v2905_v62  ;;  %v3243_v47 = vsel %vm3115_vm14, 0.0, %v2909_v45  ;;  %v3247_v48 = vsel %vm3119_vm0, 0.0, %v2913_v14  ;;  %3355 = vst [vmem:[%s6434_s9 + $0x128] sm:$0xff] %v3227_v6  ;;  %3359 = vst [vmem:[%s6434_s9 + $0x148] sm:$0xff] %v3231_v46 }
 0x36c   : > { %v3251_v9 = vsel %vm3123_vm8, 0.0, %v2917_v11  ;;  %v3255_v60 = vsel %vm3127_vm13, 0.0, %v2921_v63  ;;  %3363 = vst [vmem:[%s6434_s9 + $0x168] sm:$0xff] %v3235_v1  ;;  %3367 = vst [vmem:[%s6434_s9 + $0x188] sm:$0xff] %v3239_v38  ;;  %v3259_v62 = vsel %vm3131_vm15, 0.0, %v2925_v43  ;;  %v3263_v45 = vsel %vm3135_vm12, 0.0, %v2929_v22 }
 0x36d   : > { %v3267_v14 = vsel %vm3139_vm9, 0.0, %v2933_v13  ;;  %v3271_v11 = vsel %vm3143_vm7, 0.0, %v2937_v40  ;;  %3371 = vst [vmem:[%s6434_s9 + $0x1a8] sm:$0xff] %v3243_v47  ;;  %3375 = vst [vmem:[%s6434_s9 + $0x1c8] sm:$0xff] %v3247_v48  ;;  %v3275_v63 = vsel %vm3147_vm11, 0.0, %v2941_v23  ;;  %v3279_v43 = vsel %vm3151_vm6, 0.0, %v2945_v32 }
 0x36e   : > { %3379 = vst [vmem:[%s6434_s9 + $0x1e8] sm:$0xff] %v3251_v9  ;;  %3383 = vst [vmem:[%s6434_s9 + $0x208] sm:$0xff] %v3255_v60  ;;  %vm9403_vm8 = vcmp.eq.s32.totalorder %v9340_v55, %v9290_v5  ;;  %vm9404_vm0 = vcmp.eq.s32.totalorder %v9342_v21, %v9290_v5  ;;  %v3291_v40 = vsel %vm3163_vm10, 0.0, %v2957_v36  ;;  %vm9405_vm14 = vcmp.eq.s32.totalorder %v9347_v12, %v9290_v5  ;;  %v9406_v32 = vld [vmem:[#allocation45_spill] sm:$0xff]  ;;  %v9418_v6 = vld [vmem:[#allocation52_spill] sm:$0xff] }
 0x36f   : > { %v3283_v22 = vsel %vm9403_vm8, 0.0, %v2949_v53  ;;  %v3287_v13 = vsel %vm9404_vm0, 0.0, %v2953_v20  ;;  %3387 = vst [vmem:[%s6434_s9 + $0x228] sm:$0xff] %v3259_v62  ;;  %3391 = vst [vmem:[%s6434_s9 + $0x248] sm:$0xff] %v3263_v45  ;;  %v3295_v23 = vsel %vm9405_vm14, 0.0, %v2961_v51  ;;  %vm9407_vm13 = vcmp.eq.s32.totalorder %v9406_v32, %v9290_v5  ;;  %v9408_v20 = vld [vmem:[#allocation48_spill] sm:$0xff] }
 0x370   : > { %3395 = vst [vmem:[%s6434_s9 + $0x268] sm:$0xff] %v3267_v14  ;;  %3399 = vst [vmem:[%s6434_s9 + $0x288] sm:$0xff] %v3271_v11  ;;  %v3299_v53 = vsel %vm9407_vm13, 0.0, %v2965_v49  ;;  %vm9409_vm15 = vcmp.eq.s32.totalorder %v9408_v20, %v9290_v5  ;;  %v7392_v36 = vadd.f32 %v7263_v56, %v9410_v26  ;;  %v7396_v51 = vadd.f32 %v9412_v37, %v9411_v35  ;;  %v9417_v10 = vld [vmem:[#allocation49_spill] sm:$0xff]  ;;  %v9419_v1 = vld [vmem:[#allocation51_spill] sm:$0xff] }
 0x371   : > { %v3303_v41 = vsel %vm9409_vm15, 0.0, %v2969_v17  ;;  %3403 = vst [vmem:[%s6434_s9 + $0x2a8] sm:$0xff] %v3275_v63  ;;  %3407 = vst [vmem:[%s6434_s9 + $0x2c8] sm:$0xff] %v3279_v43  ;;  %v7400_v49 = vadd.f32 %v9414_v33, %v9413_v7  ;;  %vm9416_vm9 = vcmp.eq.s32.totalorder %v9415_v3, %v9290_v5  ;;  %v1967_v34 = vadd.f32 %v7263_v56, %v9417_v10  ;;  %v9420_v47 = vld [vmem:[#allocation54_spill] sm:$0xff]  ;;  %v9421_v9 = vld [vmem:[#allocation53_spill] sm:$0xff] }
 0x372   : > { %3411 = vst [vmem:[%s6434_s9 + $0x2e8] sm:$0xff] %v3283_v22  ;;  %3415 = vst [vmem:[%s6434_s9 + $0x308] sm:$0xff] %v3287_v13  ;;  %v3307_v17 = vsel %vm9416_vm9, 0.0, %v2973_v28  ;;  %v1971_v46 = vadd.f32 %v7263_v56, %v9418_v6  ;;  %v1975_v38 = vadd.f32 %v7263_v56, %v9419_v1  ;;  %v1979_v48 = vadd.f32 %v7263_v56, %v9420_v47  ;;  %v9422_v60 = vld [vmem:[#allocation56_spill] sm:$0xff]  ;;  %v9423_v45 = vld [vmem:[#allocation55_spill] sm:$0xff] }
 0x373   : > { %3419 = vst [vmem:[%s6434_s9 + $0x328] sm:$0xff] %v3291_v40  ;;  %3423 = vst [vmem:[%s6434_s9 + $0x348] sm:$0xff] %v3295_v23  ;;  %v1983_v28 = vadd.f32 %v7263_v56, %v9421_v9  ;;  %v1987_v62 = vadd.f32 %v7263_v56, %v9422_v60  ;;  %v1991_v14 = vadd.f32 %v7263_v56, %v9423_v45  ;;  %v9424_v11 = vld [vmem:[#allocation58_spill] sm:$0xff]  ;;  %v9425_v43 = vld [vmem:[#allocation57_spill] sm:$0xff]  ;;  %vm2600_vm12 = vcmp.gt.f32.partialorder %v7267_v44, 0.0 }
 0x374   : > { %3427 = vst [vmem:[%s6434_s9 + $0x368] sm:$0xff] %v3299_v53  ;;  %3431 = vst [vmem:[%s6434_s9 + $0x388] sm:$0xff] %v3303_v41  ;;  %v1995_v63 = vadd.f32 %v7263_v56, %v9424_v11  ;;  %v1999_v22 = vadd.f32 %v7263_v56, %v9425_v43  ;;  %v9426_v13 = vld [vmem:[#allocation60_spill] sm:$0xff]  ;;  %v9427_v23 = vld [vmem:[#allocation59_spill] sm:$0xff]  ;;  %vm2604_vm7 = vcmp.gt.f32.partialorder %v7271_v42, 0.0  ;;  %vm2608_vm11 = vcmp.gt.f32.partialorder %v7275_v59, 0.0 }
 0x375   : > { %3435 = vst [vmem:[%s6434_s9 + $0x3a8] sm:$0xff] %v3307_v17  ;;  %v2003_v40 = vadd.f32 %v7263_v56, %v9426_v13  ;;  %v2007_v53 = vadd.f32 %v7263_v56, %v9427_v23  ;;  %v9428_v41 = vld [vmem:[#allocation62_spill] sm:$0xff]  ;;  %v9429_v35 = vld [vmem:[#allocation61_spill] sm:$0xff]  ;;  %v9430_v7 = vld [vmem:[#allocation64_spill] sm:$0xff]  ;;  %vm2612_vm6 = vcmp.gt.f32.partialorder %v7396_v51, 0.0  ;;  %vm2616_vm10 = vcmp.gt.f32.partialorder %v7400_v49, 0.0 }
 0x376   : > { %v2011_v26 = vadd.f32 %v7263_v56, %v9428_v41  ;;  %v2015_v37 = vadd.f32 %v7263_v56, %v9429_v35  ;;  %v2019_v33 = vadd.f32 %v7263_v56, %v9430_v7  ;;  %v9431_v17 = vld [vmem:[#allocation63_spill] sm:$0xff]  ;;  %v9432_v6 = vld [vmem:[#allocation66_spill] sm:$0xff]  ;;  %v9433_v47 = vld [vmem:[#allocation65_spill] sm:$0xff] }
 0x377   : > { %v2023_v10 = vadd.f32 %v7263_v56, %v9431_v17  ;;  %v2027_v1 = vadd.f32 %v7263_v56, %v9432_v6  ;;  %v2031_v9 = vadd.f32 %v7263_v56, %v9433_v47  ;;  %v9434_v60 = vld [vmem:[#allocation68_spill] sm:$0xff]  ;;  %v9435_v11 = vld [vmem:[#allocation67_spill] sm:$0xff]  ;;  %v9436_v13 = vld [vmem:[#allocation70_spill] sm:$0xff] }
 0x378   : > { %v2035_v45 = vadd.f32 %v7263_v56, %v9434_v60  ;;  %v2039_v43 = vadd.f32 %v7263_v56, %v9435_v11  ;;  %v2043_v23 = vadd.f32 %v7263_v56, %v9436_v13  ;;  %v9437_v41 = vld [vmem:[#allocation69_spill] sm:$0xff]  ;;  %v9438_v7 = vld [vmem:[#allocation72_spill] sm:$0xff]  ;;  %v9439_v3 = vld [vmem:[#allocation71_spill] sm:$0xff]  ;;  %v2071_v13 = vadd.f32 %v7263_v56, %v9443_v27 }
 0x379   : > { %v2047_v35 = vadd.f32 %v7263_v56, %v9437_v41  ;;  %v2051_v17 = vadd.f32 %v7263_v56, %v9438_v7  ;;  %v2055_v6 = vadd.f32 %v7263_v56, %v9439_v3  ;;  %v9440_v20 = vld [vmem:[#allocation74_spill] sm:$0xff]  ;;  %v9441_v32 = vld [vmem:[#allocation73_spill] sm:$0xff]  ;;  %v9442_v12 = vld [vmem:[#allocation76_spill] sm:$0xff] }
 0x37a   : > { %v2059_v47 = vadd.f32 %v7263_v56, %v9440_v20  ;;  %v2063_v60 = vadd.f32 %v7263_v56, %v9441_v32  ;;  %v2067_v11 = vadd.f32 %v7263_v56, %v9442_v12  ;;  %v9444_v21 = vld [vmem:[#allocation78_spill] sm:$0xff]  ;;  %v9445_v55 = vld [vmem:[#allocation77_spill] sm:$0xff]  ;;  %v9453_v27 = vld [vmem:[#allocation116_spill] sm:$0xff] }
 0x37b   : > { %v2075_v41 = vadd.f32 %v7263_v56, %v9444_v21  ;;  %v2079_v7 = vadd.f32 %v7263_v56, %v9445_v55  ;;  %v9446_v2 = vld [vmem:[#allocation126_spill] sm:$0xff]  ;;  %v9447_v3 = vld [vmem:[#allocation97_spill] sm:$0xff]  ;;  %v7482_v39 = vadd.f32 %v9453_v27, %v9452_v61  ;;  %v9454_v21 = vld [vmem:[#allocation152_spill] sm:$0xff] }
 0x37c   : > { %v7470_v19 = vadd.f32 %v9447_v3, %v9446_v2  ;;  %v9448_v20 = vld [vmem:[#allocation149_spill] sm:$0xff]  ;;  %v7486_v24 = vadd.f32 %v9455_v0, %v9454_v21  ;;  %v9456_v55 = vld [vmem:[#allocation162_spill] sm:$0xff]  ;;  %v9458_v3 = vld [vmem:[#allocation159_spill] sm:$0xff] }
 0x37d   : > { %v7474_v52 = vadd.f32 %v9449_v8, %v9448_v20  ;;  %v9450_v32 = vld [vmem:[#allocation145_spill] sm:$0xff]  ;;  %v9457_v25 = vld [vmem:[#allocation122_spill] sm:$0xff]  ;;  %v9459_v54 = vld [vmem:[#allocation119_spill] sm:$0xff]  ;;  %vm2632_vm3 = vcmp.gt.f32.partialorder %v7482_v39, 0.0 }
 0x37e   : > { %v7478_v12 = vadd.f32 %v9451_v31, %v9450_v32  ;;  %v7490_v2 = vadd.f32 %v9457_v25, %v9456_v55  ;;  %v7494_v8 = vadd.f32 %v9459_v54, %v9458_v3  ;;  %v9460_v20 = vld [vmem:[#allocation107_spill] sm:$0xff]  ;;  %v9461_v58 = vld [vmem:[#allocation129_spill] sm:$0xff]  ;;  %v9467_v21 = vld [vmem:[#allocation174_spill] sm:$0xff]  ;;  %vm2620_vm2 = vcmp.gt.f32.partialorder %v7470_v19, 0.0 }
 0x37f   : > { %v7498_v31 = vadd.f32 %v9461_v58, %v9460_v20  ;;  %v9462_v32 = vld [vmem:[#allocation103_spill] sm:$0xff]  ;;  %v9463_v30 = vld [vmem:[#allocation125_spill] sm:$0xff]  ;;  %v9470_v57 = vld [vmem:[#allocation148_spill] sm:$0xff]  ;;  %vm2624_vm5 = vcmp.gt.f32.partialorder %v7474_v52, 0.0  ;;  %vm2636_vm4 = vcmp.gt.f32.partialorder %v7486_v24, 0.0 }
 0x380   : > { %v7502_v61 = vadd.f32 %v9463_v30, %v9462_v32  ;;  %v9465_v27 = vld [vmem:[#allocation173_spill] sm:$0xff]  ;;  %v9466_v50 = vld [vmem:[#allocation139_spill] sm:$0xff]  ;;  %v9471_v3 = vld [vmem:[#allocation176_spill] sm:$0xff]  ;;  %vm2628_vm1 = vcmp.gt.f32.partialorder %v7478_v12, 0.0  ;;  %vm2640_vm8 = vcmp.gt.f32.partialorder %v7490_v2, 0.0  ;;  %vm2644_vm0 = vcmp.gt.f32.partialorder %v7494_v8, 0.0 }
 0x381   : > { %v7506_v0 = vadd.f32 %v9466_v50, %v9465_v27  ;;  %v9468_v29 = vld [vmem:[#allocation135_spill] sm:$0xff]  ;;  %v9474_v20 = vld [vmem:[#allocation177_spill] sm:$0xff]  ;;  %v9475_v15 = vld [vmem:[#allocation154_spill] sm:$0xff]  ;;  %vm2648_vm14 = vcmp.gt.f32.partialorder %v7498_v31, 0.0 }
 0x382   : > { %9464 = vst [vmem:[#allocation114_spill] sm:$0xff] %v7502_v61  ;;  %v7510_v25 = vadd.f32 %v9468_v29, %v9467_v21  ;;  %v9469_v55 = vld [vmem:[#allocation175_spill] sm:$0xff]  ;;  %v7522_v30 = vadd.f32 %v9475_v15, %v9474_v20  ;;  %v9477_v32 = vld [vmem:[#allocation178_spill] sm:$0xff]  ;;  %v9481_v18 = vld [vmem:[#allocation161_spill] sm:$0xff]  ;;  %vm2652_vm13 = vcmp.gt.f32.partialorder %v7502_v61, 0.0 }
 0x383   : > { %v7514_v54 = vadd.f32 %v9470_v57, %v9469_v55  ;;  %v9472_v16 = vld [vmem:[#allocation143_spill] sm:$0xff]  ;;  %v7526_v50 = vadd.f32 %v9478_v4, %v9477_v32  ;;  %v9483_v21 = vld [vmem:[#allocation180_spill] sm:$0xff]  ;;  %v9484_v56 = vld [vmem:[#allocation158_spill] sm:$0xff]  ;;  %vm2656_vm15 = vcmp.gt.f32.partialorder %v7506_v0, 0.0 }
 0x384   : > { %v7518_v58 = vadd.f32 %v9472_v16, %v9471_v3  ;;  %9476 = vst [vmem:[#allocation130_spill] sm:$0xff] %v7522_v30  ;;  %v9480_v27 = vld [vmem:[#allocation179_spill] sm:$0xff]  ;;  %v7534_v57 = vadd.f32 %v9484_v56, %v9483_v21  ;;  %v9486_v55 = vld [vmem:[#allocation181_spill] sm:$0xff]  ;;  %v9489_v3 = vld [vmem:[#allocation182_spill] sm:$0xff]  ;;  %vm2660_vm9 = vcmp.gt.f32.partialorder %v7510_v25, 0.0 }
 0x385   : > { %9479 = vst [vmem:[#allocation140_spill] sm:$0xff] %v7526_v50  ;;  %v7530_v29 = vadd.f32 %v9481_v18, %v9480_v27  ;;  %v9487_v5 = vld [vmem:[#allocation111_spill] sm:$0xff]  ;;  %v9493_v30 = vld [vmem:[#allocation137_spill] sm:$0xff]  ;;  %v9494_v32 = vld [vmem:[#allocation184_spill] sm:$0xff] }
 0x386   : > { %9473 = vst [vmem:[#allocation120_spill] sm:$0xff] %v7518_v58  ;;  %9485 = vst [vmem:[#allocation136_spill] sm:$0xff] %v7534_v57  ;;  %v7538_v16 = vadd.f32 %v9487_v5, %v9486_v55  ;;  %v9490_v58 = vld [vmem:[#allocation91_spill] sm:$0xff]  ;;  %v9497_v27 = vld [vmem:[#allocation185_spill] sm:$0xff] }
 0x387   : > { %9482 = vst [vmem:[#allocation80_spill] sm:$0xff] %v7530_v29  ;;  %v7542_v15 = vadd.f32 %v9490_v58, %v9489_v3  ;;  %v9492_v20 = vld [vmem:[#allocation183_spill] sm:$0xff]  ;;  %v9498_v29 = vld [vmem:[#allocation81_spill] sm:$0xff]  ;;  %v9499_v21 = vld [vmem:[#allocation186_spill] sm:$0xff] }
 0x388   : > { %9488 = vst [vmem:[#allocation94_spill] sm:$0xff] %v7538_v16  ;;  %v7546_v4 = vadd.f32 %v9493_v30, %v9492_v20  ;;  %v9495_v50 = vld [vmem:[#allocation127_spill] sm:$0xff]  ;;  %v7554_v56 = vadd.f32 %v9498_v29, %v9497_v27  ;;  %v9500_v57 = vld [vmem:[#allocation133_spill] sm:$0xff]  ;;  %v9503_v16 = vld [vmem:[#allocation166_spill] sm:$0xff] }
 0x389   : > { %9491 = vst [vmem:[#allocation144_spill] sm:$0xff] %v7542_v15  ;;  %v7550_v18 = vadd.f32 %v9495_v50, %v9494_v32  ;;  %v7558_v5 = vadd.f32 %v9500_v57, %v9499_v21  ;;  %v9502_v55 = vld [vmem:[#allocation187_spill] sm:$0xff]  ;;  %v9505_v3 = vld [vmem:[#allocation188_spill] sm:$0xff]  ;;  %v9508_v32 = vld [vmem:[#allocation82_spill] sm:$0xff] }
 0x38a   : > { %v7562_v58 = vadd.f32 %v9503_v16, %v9502_v55  ;;  %v9506_v15 = vld [vmem:[#allocation164_spill] sm:$0xff] }
 0x38b   : > { %9496 = vst [vmem:[#allocation102_spill] sm:$0xff] %v7550_v18  ;;  %9501 = vst [vmem:[#allocation83_spill] sm:$0xff] %v7558_v5  ;;  %v7566_v30 = vadd.f32 %v9506_v15, %v9505_v3  ;;  %v9507_v20 = vld [vmem:[#allocation88_spill] sm:$0xff]  ;;  %v7573_v18 = vadd.f32 %v9508_v32, %v1967_v34  ;;  %v9515_v34 = vld [vmem:[#allocation118_spill] sm:$0xff] }
 0x38c   : > { %9504 = vst [vmem:[#allocation98_spill] sm:$0xff] %v7562_v58  ;;  %v7570_v50 = vadd.f32 %v9507_v20, %v7392_v36  ;;  %v9509_v29 = vld [vmem:[#allocation96_spill] sm:$0xff]  ;;  %v7594_v32 = vadd.f32 %v9515_v34, %v1995_v63  ;;  %v9522_v63 = vld [vmem:[#allocation138_spill] sm:$0xff] }
 0x38d   : > { %v7576_v27 = vadd.f32 %v9509_v29, %v1971_v46  ;;  %v9510_v57 = vld [vmem:[#allocation92_spill] sm:$0xff]  ;;  %v9516_v46 = vld [vmem:[#allocation115_spill] sm:$0xff]  ;;  %v7615_v34 = vadd.f32 %v9522_v63, %v2023_v10 }
 0x38e   : > { %v7579_v21 = vadd.f32 %v9510_v57, %v1975_v38  ;;  %v9511_v5 = vld [vmem:[#allocation104_spill] sm:$0xff]  ;;  %v7597_v29 = vadd.f32 %v9516_v46, %v1999_v22  ;;  %v9523_v22 = vld [vmem:[#allocation150_spill] sm:$0xff]  ;;  %v9524_v46 = vld [vmem:[#allocation147_spill] sm:$0xff] }
 0x38f   : > { %v7582_v16 = vadd.f32 %v9511_v5, %v1979_v48  ;;  %v9512_v55 = vld [vmem:[#allocation100_spill] sm:$0xff]  ;;  %v9518_v48 = vld [vmem:[#allocation121_spill] sm:$0xff]  ;;  %v9531_v63 = vld [vmem:[#allocation99_spill] sm:$0xff] }
 0x390   : > { %v7585_v58 = vadd.f32 %v9512_v55, %v1983_v28  ;;  %v9513_v15 = vld [vmem:[#allocation112_spill] sm:$0xff]  ;;  %v7603_v5 = vadd.f32 %v9518_v48, %v2007_v53  ;;  %v7621_v53 = vadd.f32 %v9524_v46, %v2031_v9  ;;  %v7639_v9 = vadd.f32 %v9531_v63, %v2055_v6  ;;  %v9535_v46 = vld [vmem:[#allocation141_spill] sm:$0xff] }
 0x391   : > { %v7588_v3 = vadd.f32 %v9513_v15, %v1987_v62  ;;  %v9514_v36 = vld [vmem:[#allocation108_spill] sm:$0xff]  ;;  %v9543_v6 = vld [vmem:[#allocation165_spill] sm:$0xff] }
 0x392   : > { %v7591_v20 = vadd.f32 %v9514_v36, %v1991_v14  ;;  %v9517_v38 = vld [vmem:[#allocation124_spill] sm:$0xff]  ;;  %v9521_v14 = vld [vmem:[#allocation142_spill] sm:$0xff]  ;;  %9532 = vst [vmem:[#allocation110_spill] sm:$0xff] %v7639_v9  ;;  %v2210_v63 = vld [vmem:[%s4608_s11 + $0x3d0] sm:$0xff] }
 0x393   : > { %v7600_v57 = vadd.f32 %v9517_v38, %v2003_v40  ;;  %v9519_v28 = vld [vmem:[#allocation132_spill] sm:$0xff]  ;;  %v7612_v36 = vadd.f32 %v9521_v14, %v2019_v33  ;;  %v7618_v40 = vadd.f32 %v9523_v22, %v2027_v1  ;;  %v9527_v33 = vld [vmem:[#allocation95_spill] sm:$0xff]  ;;  %v9533_v22 = vld [vmem:[#allocation146_spill] sm:$0xff] }
 0x394   : > { %v7606_v55 = vadd.f32 %v9519_v28, %v2011_v26  ;;  %v9520_v62 = vld [vmem:[#allocation128_spill] sm:$0xff]  ;;  %v7630_v28 = vadd.f32 %v9527_v33, %v2043_v23  ;;  %v9529_v14 = vld [vmem:[#allocation131_spill] sm:$0xff]  ;;  %v9556_v9 = vld [vmem:[#allocation130_spill] sm:$0xff] }
 0x395   : > { %v7609_v15 = vadd.f32 %v9520_v62, %v2015_v37  ;;  %v9525_v38 = vld [vmem:[#allocation156_spill] sm:$0xff]  ;;  %v9526_v37 = vld [vmem:[#allocation153_spill] sm:$0xff]  ;;  %v7636_v1 = vadd.f32 %v9529_v14, %v2051_v17  ;;  %v2208_v23 = vld [vmem:[%s4608_s11 + $0x3c0] sm:$0xff]  ;;  %v7658_v14 = vadd.f32 %v9543_v6, %v2079_v7  ;;  %v2744_v6 = vmul.f32 0.2, %v7400_v49 }
 0x396   : > { %v7624_v26 = vadd.f32 %v9525_v38, %v2035_v45  ;;  %v7627_v48 = vadd.f32 %v9526_v37, %v2039_v43  ;;  %v9528_v10 = vld [vmem:[#allocation160_spill] sm:$0xff]  ;;  %v7642_v45 = vadd.f32 %v9533_v22, %v2059_v47  ;;  %v7645_v43 = vadd.f32 %v9535_v46, %v2063_v60  ;;  %v9537_v38 = vld [vmem:[#allocation163_spill] sm:$0xff]  ;;  %v2211_v60 = vld [vmem:[%s4608_s11 + $0x3d8] sm:$0xff] }
 0x397   : > { %v7633_v62 = vadd.f32 %v9528_v10, %v2047_v35  ;;  %9530 = vst [vmem:[#allocation79_spill] sm:$0xff] %v7636_v1  ;;  %v7649_v37 = vadd.f32 %v9537_v38, %v2067_v11  ;;  %v9539_v35 = vld [vmem:[#allocation87_spill] sm:$0xff]  ;;  %9544 = vst [vmem:[#allocation123_spill] sm:$0xff] %v7658_v14  ;;  %v2209_v47 = vld [vmem:[%s4608_s11 + $0x3c8] sm:$0xff]  ;;  %v2732_v46 = vmul.f32 0.2, %v7271_v42 }
 0x398   : > { %9534 = vst [vmem:[#allocation93_spill] sm:$0xff] %v7642_v45  ;;  %9536 = vst [vmem:[#allocation90_spill] sm:$0xff] %v7645_v43  ;;  %v7652_v33 = vadd.f32 %v9539_v35, %v2071_v13  ;;  %v9541_v17 = vld [vmem:[#allocation167_spill] sm:$0xff]  ;;  %v2337_v11 = vld [vmem:[%s5583_s16 + $0x3c8] sm:$0xff]  ;;  %v2736_v38 = vmul.f32 0.2, %v7275_v59 }
 0x399   : > { %9538 = vst [vmem:[#allocation50_spill] sm:$0xff] %v7649_v37  ;;  %v7655_v10 = vadd.f32 %v9541_v17, %v2075_v41  ;;  %v2336_v22 = vld [vmem:[%s5583_s16 + $0x3c0] sm:$0xff]  ;;  %v2338_v13 = vld [vmem:[%s5583_s16 + $0x3d0] sm:$0xff]  ;;  %v2728_v41 = vmul.f32 0.2, %v7267_v44  ;;  %v2339_v7 = vld [vmem:[%s5583_s16 + $0x3d8] sm:$0xff] }
 0x39a   : > { %9540 = vst [vmem:[#allocation106_spill] sm:$0xff] %v7652_v33  ;;  %v2740_v35 = vmul.f32 0.2, %v7396_v51  ;;  %v7679_v17 = vmul.f32 %v2336_v22, %v2208_v23  ;;  %v2748_v14 = vmul.f32 0.2, %v7470_v19  ;;  %v7685_v33 = vmul.f32 %v2337_v11, %v2209_v47  ;;  %s3739_s11 = sshll.u32 %s8451_s24, 7 }
 0x39b   : > { %9542 = vst [vmem:[#allocation89_spill] sm:$0xff] %v7655_v10  ;;  %v2752_v10 = vmul.f32 0.2, %v7474_v52  ;;  %v2756_v37 = vmul.f32 0.2, %v7478_v12  ;;  %v7695_v22 = vmul.f32 %v2338_v13, %v2210_v63  ;;  %s8580_s12 = scalar_lea.hbm %s8671_s6, %s3739_s11 }
 0x39c   : > { %9545 = vst [vmem:[#allocation101_spill] sm:$0xff] %v7679_v17  ;;  %9546 = vst [vmem:[#allocation49_spill] sm:$0xff] %v7685_v33  ;;  %v7690_v43 = vmul.f32 0.2, %v7482_v39  ;;  %v7693_v23 = vmul.f32 0.2, %v7486_v24  ;;  %v7707_v33 = vmul.f32 %v2339_v7, %v2211_v60 }
 0x39d   : > { %9547 = vst [vmem:[#allocation52_spill] sm:$0xff] %v7695_v22  ;;  %v7699_v17 = vmul.f32 0.2, %v7490_v2  ;;  %v7702_v47 = vmul.f32 0.2, %v7494_v8  ;;  %v7722_v22 = vsel %vm2600_vm12, %v7267_v44, %v2728_v41  ;;  %v9554_v7 = vld [vmem:[#allocation120_spill] sm:$0xff] }
 0x39e   : > { %v7705_v11 = vmul.f32 0.2, %v7498_v31  ;;  %9548 = vst [vmem:[#allocation51_spill] sm:$0xff] %v7707_v33  ;;  %v7711_v45 = vmul.f32 0.2, %v7502_v61  ;;  %9552 = vst [vmem:[#allocation55_spill] sm:$0xff] %v7722_v22 }
 0x39f   : > { %v7714_v63 = vmul.f32 0.2, %v7506_v0  ;;  %v7717_v13 = vmul.f32 0.2, %v7510_v25  ;;  %v7726_v60 = vmul.f32 0.2, %v7514_v54 }
 0x3a0   : > { %9549 = vst [vmem:[#allocation54_spill] sm:$0xff] %v7711_v45  ;;  %v7729_v33 = vmul.f32 0.2, %v9554_v7  ;;  %v7732_v45 = vmul.f32 0.2, %v9556_v9  ;;  %v9559_v44 = vld [vmem:[#allocation140_spill] sm:$0xff] }
 0x3a1   : > { %9550 = vst [vmem:[#allocation53_spill] sm:$0xff] %v7714_v63  ;;  %9551 = vst [vmem:[#allocation56_spill] sm:$0xff] %v7717_v13  ;;  %v7737_v13 = vsel %vm2604_vm7, %v7271_v42, %v2732_v46  ;;  %v7741_v41 = vmul.f32 0.2, %v9559_v44  ;;  %v9561_v22 = vld [vmem:[#allocation80_spill] sm:$0xff]  ;;  %v9566_v46 = vld [vmem:[#allocation94_spill] sm:$0xff] }
 0x3a2   : > { %9553 = vst [vmem:[#allocation58_spill] sm:$0xff] %v7726_v60  ;;  %9555 = vst [vmem:[#allocation57_spill] sm:$0xff] %v7729_v33  ;;  %v7744_v63 = vmul.f32 0.2, %v9561_v22  ;;  %v9562_v60 = vld [vmem:[#allocation15_spill] sm:$0xff]  ;;  %v7750_v33 = vsel %vm2608_vm11, %v7275_v59, %v2736_v38  ;;  %v9567_v61 = vld [vmem:[#allocation144_spill] sm:$0xff] }
 0x3a3   : > { %9557 = vst [vmem:[#allocation60_spill] sm:$0xff] %v7732_v45  ;;  %9558 = vst [vmem:[#allocation59_spill] sm:$0xff] %v7737_v13  ;;  %v3015_v1 = vadd.s32 240, %v9562_v60  ;;  %v9564_v45 = vld [vmem:[#allocation136_spill] sm:$0xff]  ;;  %v7757_v13 = vmul.f32 0.2, %v9566_v46  ;;  %v7765_v60 = vsel %vm2612_vm6, %v7396_v51, %v2740_v35 }
 0x3a4   : > { %9560 = vst [vmem:[#allocation62_spill] sm:$0xff] %v7741_v41  ;;  %9563 = vst [vmem:[#allocation61_spill] sm:$0xff] %v7750_v33  ;;  %v7754_v42 = vmul.f32 0.2, %v9564_v45  ;;  %v7760_v41 = vmul.f32 0.2, %v9567_v61 }
 0x3a5   : > { %9569 = vst [vmem:[#allocation66_spill] sm:$0xff] %v7765_v60  ;;  %v7769_v59 = vmul.f32 0.2, %v7546_v4  ;;  %v9571_v38 = vld [vmem:[#allocation102_spill] sm:$0xff]  ;;  %vm2664_vm12 = vcmp.gt.f32.partialorder %v7514_v54, 0.0  ;;  %v9574_v51 = vld [vmem:[#allocation83_spill] sm:$0xff] }
 0x3a6   : > { %9565 = vst [vmem:[#allocation64_spill] sm:$0xff] %v7754_v42  ;;  %9568 = vst [vmem:[#allocation63_spill] sm:$0xff] %v7760_v41  ;;  %v7772_v33 = vmul.f32 0.2, %v9571_v38  ;;  %v7775_v42 = vmul.f32 0.2, %v7554_v56  ;;  %v7780_v41 = vsel %vm2616_vm10, %v7400_v49, %v2744_v6  ;;  %v7797_v49 = vsel %vm2620_vm2, %v7470_v19, %v2748_v14 }
 0x3a7   : > { %9570 = vst [vmem:[#allocation65_spill] sm:$0xff] %v7769_v59  ;;  %9573 = vst [vmem:[#allocation67_spill] sm:$0xff] %v7780_v41  ;;  %v7786_v35 = vmul.f32 0.2, %v9574_v51  ;;  %v9575_v60 = vld [vmem:[#allocation98_spill] sm:$0xff]  ;;  %vm2676_vm6 = vcmp.gt.f32.partialorder %v9559_v44, 0.0  ;;  %v7815_v19 = vsel %vm2624_vm5, %v7474_v52, %v2752_v10  ;;  %v7833_v52 = vsel %vm2628_vm1, %v7478_v12, %v2756_v37 }
 0x3a8   : > { %9572 = vst [vmem:[#allocation68_spill] sm:$0xff] %v7772_v33  ;;  %v7789_v59 = vmul.f32 0.2, %v9575_v60  ;;  %v7792_v33 = vmul.f32 0.2, %v7566_v30  ;;  %9578 = vst [vmem:[#allocation72_spill] sm:$0xff] %v7797_v49  ;;  %v7852_v12 = vsel %vm2632_vm3, %v7482_v39, %v7690_v43 }
 0x3a9   : > { %v9579_v6 = vld [vmem:[#allocation16_spill] sm:$0xff]  ;;  %9580 = vst [vmem:[#allocation71_spill] sm:$0xff] %v7815_v19  ;;  %vm2692_vm2 = vcmp.gt.f32.partialorder %v9567_v61, 0.0  ;;  %v7825_v14 = vmul.f32 0.2, %v7579_v21  ;;  %9581 = vst [vmem:[#allocation74_spill] sm:$0xff] %v7833_v52 }
 0x3aa   : > { %9576 = vst [vmem:[#allocation70_spill] sm:$0xff] %v7789_v59  ;;  %9577 = vst [vmem:[#allocation69_spill] sm:$0xff] %v7792_v33  ;;  %v7804_v41 = vadd.s32 %v9579_v6, %v3015_v1  ;;  %v7807_v59 = vmul.f32 0.2, %v7570_v50  ;;  %v7810_v33 = vmul.f32 0.2, %v7573_v18 }
 0x3ab   : > { %v7822_v1 = vmul.f32 0.2, %v7576_v27  ;;  %v7828_v6 = vmul.f32 0.2, %v7582_v16  ;;  %vm2708_vm5 = vcmp.gt.f32.partialorder %v9574_v51, 0.0  ;;  %vm2712_vm7 = vcmp.gt.f32.partialorder %v9575_v60, 0.0 }
 0x3ac   : > { %vm2716_vm10 = vcmp.gt.f32.partialorder %v7566_v30, 0.0  ;;  %vm2603_vm11 = vcmp.gt.f32.partialorder %v7570_v50, 0.0  ;;  %v7840_v10 = vmul.f32 0.2, %v7585_v58  ;;  %v7843_v19 = vmul.f32 0.2, %v7588_v3 }
 0x3ad   : > { %v7846_v49 = vmul.f32 0.2, %v7591_v20  ;;  %9585 = vst [vmem:[#allocation78_spill] sm:$0xff] %v7852_v12  ;;  %v7855_v37 = vmul.f32 0.2, %v7594_v32  ;;  %v7882_v12 = vsel %vm2640_vm8, %v7490_v2, %v7699_v17  ;;  %vm2607_vm1 = vcmp.gt.f32.partialorder %v7573_v18, 0.0 }
 0x3ae   : > { %9582 = vst [vmem:[#allocation73_spill] sm:$0xff] %v7840_v10  ;;  %9583 = vst [vmem:[#allocation76_spill] sm:$0xff] %v7843_v19  ;;  %v7858_v52 = vmul.f32 0.2, %v7597_v29  ;;  %v7861_v10 = vmul.f32 0.2, %v7600_v57 }
 0x3af   : > { %9584 = vst [vmem:[#allocation75_spill] sm:$0xff] %v7846_v49  ;;  %9586 = vst [vmem:[#allocation77_spill] sm:$0xff] %v7855_v37  ;;  %v7867_v49 = vsel %vm2636_vm4, %v7486_v24, %v7693_v23  ;;  %v7870_v19 = vmul.f32 0.2, %v7603_v5  ;;  %v7873_v39 = vmul.f32 0.2, %v7606_v55 }
 0x3b0   : > { %9587 = vst [vmem:[#allocation126_spill] sm:$0xff] %v7858_v52  ;;  %9588 = vst [vmem:[#allocation97_spill] sm:$0xff] %v7861_v10  ;;  %v7876_v43 = vmul.f32 0.2, %v7609_v15  ;;  %v7885_v10 = vmul.f32 0.2, %v7612_v36 }
 0x3b1   : > { %9589 = vst [vmem:[#allocation149_spill] sm:$0xff] %v7867_v49  ;;  %9590 = vst [vmem:[#allocation109_spill] sm:$0xff] %v7870_v19  ;;  %v7888_v24 = vmul.f32 0.2, %v7615_v34  ;;  %v7891_v23 = vmul.f32 0.2, %v7618_v40  ;;  %v7897_v49 = vsel %vm2644_vm0, %v7494_v8, %v7702_v47 }
 0x3b2   : > { %9591 = vst [vmem:[#allocation145_spill] sm:$0xff] %v7873_v39  ;;  %9592 = vst [vmem:[#allocation105_spill] sm:$0xff] %v7876_v43  ;;  %v7900_v43 = vmul.f32 0.2, %v7621_v53  ;;  %v7903_v2 = vmul.f32 0.2, %v7624_v26 }
 0x3b3   : > { %9593 = vst [vmem:[#allocation155_spill] sm:$0xff] %v7882_v12  ;;  %9594 = vst [vmem:[#allocation116_spill] sm:$0xff] %v7885_v10  ;;  %v7906_v17 = vmul.f32 0.2, %v7627_v48  ;;  %v7912_v12 = vsel %vm2648_vm14, %v7498_v31, %v7705_v11  ;;  %v7918_v8 = vmul.f32 0.2, %v7633_v62 }
 0x3b4   : > { %9595 = vst [vmem:[#allocation152_spill] sm:$0xff] %v7888_v24  ;;  %9596 = vst [vmem:[#allocation113_spill] sm:$0xff] %v7891_v23  ;;  %v7915_v23 = vmul.f32 0.2, %v7630_v28  ;;  %v9604_v47 = vld [vmem:[#allocation79_spill] sm:$0xff]  ;;  %v9609_v24 = vld [vmem:[#allocation110_spill] sm:$0xff] }
 0x3b5   : > { %9597 = vst [vmem:[#allocation162_spill] sm:$0xff] %v7897_v49  ;;  %9598 = vst [vmem:[#allocation122_spill] sm:$0xff] %v7900_v43  ;;  %v7921_v49 = vmul.f32 0.2, %v9604_v47  ;;  %v9606_v43 = vld [vmem:[#allocation54_spill] sm:$0xff]  ;;  %v9611_v11 = vld [vmem:[#allocation93_spill] sm:$0xff] }
 0x3b6   : > { %9599 = vst [vmem:[#allocation159_spill] sm:$0xff] %v7903_v2  ;;  %9600 = vst [vmem:[#allocation119_spill] sm:$0xff] %v7906_v17  ;;  %v9607_v2 = vld [vmem:[#allocation114_spill] sm:$0xff]  ;;  %v7931_v31 = vmul.f32 0.2, %v9609_v24  ;;  %v9620_v19 = vld [vmem:[#allocation89_spill] sm:$0xff] }
 0x3b7   : > { %9601 = vst [vmem:[#allocation107_spill] sm:$0xff] %v7912_v12  ;;  %9602 = vst [vmem:[#allocation129_spill] sm:$0xff] %v7915_v23  ;;  %v7927_v17 = vsel %vm2652_vm13, %v9607_v2, %v9606_v43  ;;  %v7934_v12 = vmul.f32 0.2, %v9611_v11  ;;  %v9613_v23 = vld [vmem:[#allocation90_spill] sm:$0xff]  ;;  %v9622_v52 = vld [vmem:[#allocation56_spill] sm:$0xff] }
 0x3b8   : > { %9603 = vst [vmem:[#allocation103_spill] sm:$0xff] %v7918_v8  ;;  %9605 = vst [vmem:[#allocation125_spill] sm:$0xff] %v7921_v49  ;;  %v7937_v10 = vmul.f32 0.2, %v9613_v23  ;;  %v9615_v8 = vld [vmem:[#allocation53_spill] sm:$0xff]  ;;  %v9617_v39 = vld [vmem:[#allocation50_spill] sm:$0xff] }
 0x3b9   : > { %9608 = vst [vmem:[#allocation173_spill] sm:$0xff] %v7927_v17  ;;  %9610 = vst [vmem:[#allocation139_spill] sm:$0xff] %v7931_v31  ;;  %v7943_v49 = vsel %vm2656_vm15, %v7506_v0, %v9615_v8  ;;  %v7946_v43 = vmul.f32 0.2, %v9617_v39  ;;  %v9618_v2 = vld [vmem:[#allocation106_spill] sm:$0xff]  ;;  %vm9628_vm3 = vcmp.gt.f32.partialorder %v9554_v7, 0.0 }
 0x3ba   : > { %9612 = vst [vmem:[#allocation174_spill] sm:$0xff] %v7934_v12  ;;  %9614 = vst [vmem:[#allocation135_spill] sm:$0xff] %v7937_v10  ;;  %v7949_v17 = vmul.f32 0.2, %v9618_v2  ;;  %v7952_v31 = vmul.f32 0.2, %v9620_v19  ;;  %v7958_v10 = vsel %vm2660_vm9, %v7510_v25, %v9622_v52 }
 0x3bb   : > { %9616 = vst [vmem:[#allocation175_spill] sm:$0xff] %v7943_v49  ;;  %9623 = vst [vmem:[#allocation143_spill] sm:$0xff] %v7958_v10  ;;  %v9624_v12 = vld [vmem:[#allocation123_spill] sm:$0xff]  ;;  %v9626_v0 = vld [vmem:[#allocation58_spill] sm:$0xff]  ;;  %vm9630_vm4 = vcmp.gt.f32.partialorder %v9556_v9, 0.0  ;;  %vm9638_vm13 = vcmp.gt.f32.partialorder %v9561_v22, 0.0 }
 0x3bc   : > { %9619 = vst [vmem:[#allocation148_spill] sm:$0xff] %v7949_v17  ;;  %9621 = vst [vmem:[#allocation176_spill] sm:$0xff] %v7952_v31  ;;  %v7961_v37 = vmul.f32 0.2, %v9624_v12  ;;  %v7967_v8 = vsel %vm2664_vm12, %v7514_v54, %v9626_v0  ;;  %v9627_v49 = vld [vmem:[#allocation57_spill] sm:$0xff]  ;;  %v9629_v17 = vld [vmem:[#allocation60_spill] sm:$0xff] }
 0x3bd   : > { %v7973_v31 = vsel %vm9628_vm3, %v9554_v7, %v9627_v49  ;;  %v7979_v25 = vsel %vm9630_vm4, %v9556_v9, %v9629_v17  ;;  %v9632_v52 = vld [vmem:[#allocation17_spill] sm:$0xff]  ;;  %v9633_v10 = vld [vmem:[#allocation172_spill] sm:$0xff]  ;;  %v9635_v54 = vld [vmem:[#allocation86_spill] sm:$0xff]  ;;  %v7997_v9 = vsel %vm9638_vm13, %v9561_v22, %v7744_v63  ;;  %vm9641_vm15 = vcmp.gt.f32.partialorder %v9564_v45, 0.0 }
 0x3be   : > { %9625 = vst [vmem:[#allocation177_spill] sm:$0xff] %v7961_v37  ;;  %9631 = vst [vmem:[#allocation154_spill] sm:$0xff] %v7979_v25  ;;  %vm3186_vm8 = vcmp.eq.s32.totalorder %v9633_v10, %v9632_v52  ;;  %v9634_v37 = vld [vmem:[#allocation85_spill] sm:$0xff]  ;;  %vm3188_vm14 = vcmp.eq.s32.totalorder %v9633_v10, %v9635_v54  ;;  %v9636_v0 = vld [vmem:[#allocation62_spill] sm:$0xff]  ;;  %vm9643_vm9 = vcmp.gt.f32.partialorder %v9566_v46, 0.0  ;;  %vm9649_vm3 = vcmp.gt.f32.partialorder %v7546_v4, 0.0 }
 0x3bf   : > { %vm3187_vm0 = vcmp.eq.s32.totalorder %v9633_v10, %v9634_v37  ;;  %v7991_v7 = vsel %vm2676_vm6, %v9559_v44, %v9636_v0  ;;  %9639 = vst [vmem:[#allocation151_spill] sm:$0xff] %v7997_v9  ;;  %v9640_v49 = vld [vmem:[#allocation64_spill] sm:$0xff]  ;;  %v8009_v25 = vsel %vm9643_vm9, %v9566_v46, %v7757_v13  ;;  %v9645_v44 = vld [vmem:[#allocation19_spill] sm:$0xff]  ;;  %v9648_v63 = vld [vmem:[#allocation65_spill] sm:$0xff]  ;;  %vm9652_vm4 = vcmp.gt.f32.partialorder %v9571_v38, 0.0 }
 0x3c0   : > { %9637 = vst [vmem:[#allocation178_spill] sm:$0xff] %v7991_v7  ;;  %v8003_v17 = vsel %vm9641_vm15, %v9564_v45, %v9640_v49  ;;  %9644 = vst [vmem:[#allocation161_spill] sm:$0xff] %v8009_v25  ;;  %v9646_v0 = vld [vmem:[#allocation63_spill] sm:$0xff]  ;;  %v8024_v45 = vsel %vm9649_vm3, %v7546_v4, %v9648_v63  ;;  %v9651_v49 = vld [vmem:[#allocation68_spill] sm:$0xff]  ;;  %vm9654_vm13 = vcmp.gt.f32.partialorder %v7554_v56, 0.0  ;;  %v8044_v4 = vsel %vm2708_vm5, %v9574_v51, %v7786_v35 }
 0x3c1   : > { %9642 = vst [vmem:[#allocation179_spill] sm:$0xff] %v8003_v17  ;;  %v8018_v22 = vsel %vm2692_vm2, %v9567_v61, %v9646_v0  ;;  %9650 = vst [vmem:[#allocation158_spill] sm:$0xff] %v8024_v45  ;;  %v8030_v13 = vsel %vm9652_vm4, %v9571_v38, %v9651_v49  ;;  %v8036_v46 = vsel %vm9654_vm13, %v7554_v56, %v7775_v42  ;;  %v1942_v61 = vpop.permute.xlu1 %1941  ;;  %v9657_v0 = vld [vmem:[#allocation70_spill] sm:$0xff]  ;;  %v9659_v63 = vld [vmem:[#allocation69_spill] sm:$0xff]  ;;  %vm2699_vm3 = vcmp.gt.f32.partialorder %v9611_v11, 0.0 }
 0x3c2   : > { %9647 = vst [vmem:[#allocation180_spill] sm:$0xff] %v8018_v22  ;;  %9653 = vst [vmem:[#allocation181_spill] sm:$0xff] %v8030_v13  ;;  %v8050_v38 = vsel %vm2712_vm7, %v9575_v60, %v9657_v0  ;;  %v8056_v56 = vsel %vm2716_vm10, %v7566_v30, %v9659_v63  ;;  %v8062_v42 = vsel %vm2603_vm11, %v7570_v50, %v7807_v59  ;;  %v9661_v51 = vld [vmem:[#allocation84_spill] sm:$0xff]  ;;  %v9662_v49 = vld [vmem:[#allocation134_spill] sm:$0xff]  ;;  %vm2703_vm11 = vcmp.gt.f32.partialorder %v9613_v23, 0.0 }
 0x3c3   : > { %9655 = vst [vmem:[#allocation111_spill] sm:$0xff] %v8036_v46  ;;  %9656 = vst [vmem:[#allocation182_spill] sm:$0xff] %v8044_v4  ;;  %v2084_v35 = vadd.f32 %v9661_v51, %v1942_v61  ;;  %v2085_v4 = vadd.f32 %v9662_v49, %v1942_v61  ;;  %v9663_v46 = vld [vmem:[#allocation157_spill] sm:$0xff]  ;;  %v9667_v25 = vld [vmem:[#allocation170_spill] sm:$0xff]  ;;  %vm2707_vm15 = vcmp.gt.f32.partialorder %v9617_v39, 0.0  ;;  %vm2711_vm5 = vcmp.gt.f32.partialorder %v9618_v2, 0.0 }
 0x3c4   : > { %9658 = vst [vmem:[#allocation91_spill] sm:$0xff] %v8050_v38  ;;  %9660 = vst [vmem:[#allocation183_spill] sm:$0xff] %v8056_v56  ;;  %v2086_v13 = vadd.f32 %v9663_v46, %v1942_v61  ;;  %v9664_v60 = vld [vmem:[#allocation117_spill] sm:$0xff]  ;;  %v1937_v38 = vpop.permute.xlu0 %1936  ;;  %v9668_v9 = vld [vmem:[#allocation171_spill] sm:$0xff]  ;;  %vm2715_vm9 = vcmp.gt.f32.partialorder %v9620_v19, 0.0 }
 0x3c5   : > { %v2087_v0 = vadd.f32 %v9664_v60, %v1942_v61  ;;  %v2080_v30 = vadd.f32 %v9661_v51, %v1937_v38  ;;  %v2081_v50 = vadd.f32 %v9662_v49, %v1937_v38  ;;  %v2082_v59 = vadd.f32 %v9663_v46, %v1937_v38  ;;  %v9665_v61 = vld [vmem:[#allocation168_spill] sm:$0xff]  ;;  %v9666_v45 = vld [vmem:[#allocation169_spill] sm:$0xff] }
 0x3c6   : > { %v2083_v63 = vadd.f32 %v9664_v60, %v1937_v38  ;;  %v2596_v56 = vadd.f32 %v9665_v61, %v2084_v35  ;;  %v2597_v22 = vadd.f32 %v9666_v45, %v2085_v4  ;;  %v2598_v17 = vadd.f32 %v9667_v25, %v2086_v13  ;;  %v9669_v46 = vld [vmem:[#allocation101_spill] sm:$0xff]  ;;  %v9671_v49 = vld [vmem:[#allocation52_spill] sm:$0xff]  ;;  %v9672_v4 = vld [vmem:[#allocation51_spill] sm:$0xff] }
 0x3c7   : > { %v2599_v7 = vadd.f32 %v9668_v9, %v2087_v0  ;;  %v2592_v38 = vadd.f32 %v9669_v46, %v2080_v30  ;;  %v9670_v51 = vld [vmem:[#allocation49_spill] sm:$0xff]  ;;  %v2594_v45 = vadd.f32 %v9671_v49, %v2082_v59  ;;  %v8108_v0 = vsel %vm2607_vm1, %v7573_v18, %v7810_v33 }
 0x3c8   : > { %v2593_v35 = vadd.f32 %v9670_v51, %v2081_v50  ;;  %v2595_v25 = vadd.f32 %v9672_v4, %v2083_v63  ;;  %vm2724_vm10 = vcmp.gt.f32.partialorder %v2596_v56, 0.0  ;;  %vm2725_vm4 = vcmp.gt.f32.partialorder %v2597_v22, 0.0 }
 0x3c9   : > { %vm2726_vm7 = vcmp.gt.f32.partialorder %v2598_v17, 0.0  ;;  %vm2727_vm13 = vcmp.gt.f32.partialorder %v2599_v7, 0.0  ;;  %v2852_v9 = vmul.f32 0.2, %v2596_v56  ;;  %v2853_v13 = vmul.f32 0.2, %v2597_v22 }
 0x3ca   : > { %v2854_v60 = vmul.f32 0.2, %v2598_v17  ;;  %v2855_v30 = vmul.f32 0.2, %v2599_v7  ;;  %vm2720_vm6 = vcmp.gt.f32.partialorder %v2592_v38, 0.0  ;;  %vm2721_vm12 = vcmp.gt.f32.partialorder %v2593_v35, 0.0 }
 0x3cb   : > { %vm2722_vm2 = vcmp.gt.f32.partialorder %v2594_v45, 0.0  ;;  %v2980_v50 = vsel %vm2724_vm10, %v2596_v56, %v2852_v9  ;;  %v2981_v18 = vsel %vm2725_vm4, %v2597_v22, %v2853_v13  ;;  %vm2723_vm1 = vcmp.gt.f32.partialorder %v2595_v25, 0.0 }
 0x3cc   : > { %v2982_v33 = vsel %vm2726_vm7, %v2598_v17, %v2854_v60  ;;  %v2983_v59 = vsel %vm2727_vm13, %v2599_v7, %v2855_v30  ;;  %v3314_v56 = vsel %vm3186_vm8, 0.0, %v2980_v50  ;;  %v3315_v17 = vsel %vm3187_vm0, 0.0, %v2981_v18  ;;  %v9679_v60 = vld [vmem:[#allocation76_spill] sm:$0xff]  ;;  %v9693_v18 = vld [vmem:[#allocation109_spill] sm:$0xff] }
 0x3cd   : > { %v3316_v22 = vsel %vm3188_vm14, 0.0, %v2982_v33  ;;  %vm2719_vm7 = vcmp.gt.f32.partialorder %v9624_v12, 0.0  ;;  %vm9673_vm10 = vcmp.eq.s32.totalorder %v9633_v10, %v9645_v44  ;;  %3442 = vst [vmem:[%s6434_s9 + $0x3e0] sm:$0xff] %v3314_v56  ;;  %3443 = vst [vmem:[%s6434_s9 + $0x3e8] sm:$0xff] %v3315_v17  ;;  %v2848_v7 = vmul.f32 0.2, %v2592_v38 }
 0x3ce   : > { %v3317_v63 = vsel %vm9673_vm10, 0.0, %v2983_v59  ;;  %3444 = vst [vmem:[%s6434_s9 + $0x3f0] sm:$0xff] %v3316_v22  ;;  %v2849_v61 = vmul.f32 0.2, %v2593_v35  ;;  %vm9674_vm8 = vcmp.gt.f32.partialorder %v7576_v27, 0.0  ;;  %vm9675_vm0 = vcmp.gt.f32.partialorder %v7579_v21, 0.0 }
 0x3cf   : > { %v2867_v46 = vsel %vm9674_vm8, %v7576_v27, %v7822_v1  ;;  %3445 = vst [vmem:[%s6434_s9 + $0x3f8] sm:$0xff] %v3317_v63  ;;  %v2850_v51 = vmul.f32 0.2, %v2594_v45  ;;  %v2851_v49 = vmul.f32 0.2, %v2595_v25  ;;  %v2871_v10 = vsel %vm9675_vm0, %v7579_v21, %v7825_v14  ;;  %v9677_v1 = vld [vmem:[#allocation73_spill] sm:$0xff] }
 0x3d0   : > { %vm9676_vm14 = vcmp.gt.f32.partialorder %v7582_v16, 0.0  ;;  %v2976_v9 = vsel %vm2720_vm6, %v2592_v38, %v2848_v7  ;;  %v2977_v27 = vsel %vm2721_vm12, %v2593_v35, %v2849_v61  ;;  %vm9678_vm4 = vcmp.gt.f32.partialorder %v7585_v58, 0.0  ;;  %v9685_v38 = vld [vmem:[#allocation75_spill] sm:$0xff]  ;;  %v9695_v33 = vld [vmem:[#allocation145_spill] sm:$0xff]  ;;  %v9699_v56 = vld [vmem:[#allocation116_spill] sm:$0xff] }
 0x3d1   : > { %v2875_v4 = vsel %vm9676_vm14, %v7582_v16, %v7828_v6  ;;  %v2879_v13 = vsel %vm9678_vm4, %v7585_v58, %v9677_v1  ;;  %vm9680_vm13 = vcmp.gt.f32.partialorder %v7588_v3, 0.0  ;;  %v2978_v14 = vsel %vm2722_vm2, %v2594_v45, %v2850_v51  ;;  %v9687_v45 = vld [vmem:[#allocation77_spill] sm:$0xff]  ;;  %v9701_v17 = vld [vmem:[#allocation152_spill] sm:$0xff]  ;;  %v9720_v1 = vld [vmem:[#allocation135_spill] sm:$0xff] }
 0x3d2   : > { %v2883_v21 = vsel %vm9680_vm13, %v7588_v3, %v9679_v60  ;;  %v2979_v30 = vsel %vm2723_vm1, %v2595_v25, %v2851_v49  ;;  %vm9681_vm10 = vcmp.eq.s32.totalorder %v7804_v41, %v9632_v52  ;;  %vm9682_vm12 = vcmp.eq.s32.totalorder %v7804_v41, %v9634_v37  ;;  %v9691_v25 = vld [vmem:[#allocation97_spill] sm:$0xff] }
 0x3d3   : > { %v3310_v16 = vsel %vm9681_vm10, 0.0, %v2976_v9  ;;  %v3311_v6 = vsel %vm9682_vm12, 0.0, %v2977_v27  ;;  %vm9683_vm6 = vcmp.eq.s32.totalorder %v7804_v41, %v9635_v54  ;;  %vm9684_vm8 = vcmp.eq.s32.totalorder %v7804_v41, %v9645_v44  ;;  %v9689_v54 = vld [vmem:[#allocation126_spill] sm:$0xff]  ;;  %v9697_v59 = vld [vmem:[#allocation105_spill] sm:$0xff] }
 0x3d4   : > { %v3312_v58 = vsel %vm9683_vm6, 0.0, %v2978_v14  ;;  %v3313_v3 = vsel %vm9684_vm8, 0.0, %v2979_v30  ;;  %3438 = vst [vmem:[%s6434_s9 + $0x3c0] sm:$0xff] %v3310_v16  ;;  %3439 = vst [vmem:[%s6434_s9 + $0x3c8] sm:$0xff] %v3311_v6  ;;  %vm9686_vm2 = vcmp.gt.f32.partialorder %v7591_v20, 0.0  ;;  %vm9688_vm1 = vcmp.gt.f32.partialorder %v7594_v32, 0.0 }
 0x3d5   : > { %v2887_v35 = vsel %vm9686_vm2, %v7591_v20, %v9685_v38  ;;  %v2891_v37 = vsel %vm9688_vm1, %v7594_v32, %v9687_v45  ;;  %3440 = vst [vmem:[%s6434_s9 + $0x3d0] sm:$0xff] %v3312_v58  ;;  %3441 = vst [vmem:[%s6434_s9 + $0x3d8] sm:$0xff] %v3313_v3  ;;  %vm9690_vm0 = vcmp.gt.f32.partialorder %v7597_v29, 0.0  ;;  %vm9692_vm14 = vcmp.gt.f32.partialorder %v7600_v57, 0.0  ;;  %v9719_v27 = vld [vmem:[#allocation174_spill] sm:$0xff]  ;;  %v9728_v6 = vld [vmem:[#allocation59_spill] sm:$0xff] }
 0x3d6   : > { %v2895_v41 = vsel %vm9690_vm0, %v7597_v29, %v9689_v54  ;;  %v2899_v50 = vsel %vm9692_vm14, %v7600_v57, %v9691_v25  ;;  %vm9694_vm4 = vcmp.gt.f32.partialorder %v7603_v5, 0.0  ;;  %vm9696_vm13 = vcmp.gt.f32.partialorder %v7606_v55, 0.0  ;;  %v9729_v58 = vld [vmem:[#allocation18_spill] sm:$0xff]  ;;  %v9732_v38 = vld [vmem:[#allocation61_spill] sm:$0xff] }
 0x3d7   : > { %v2903_v20 = vsel %vm9694_vm4, %v7603_v5, %v9693_v18  ;;  %v8203_v32 = vsel %vm9696_vm13, %v7606_v55, %v9695_v33  ;;  %vm9698_vm10 = vcmp.gt.f32.partialorder %v7609_v15, 0.0  ;;  %vm9700_vm12 = vcmp.gt.f32.partialorder %v7612_v36, 0.0  ;;  %v9703_v55 = vld [vmem:[#allocation113_spill] sm:$0xff]  ;;  %v9733_v45 = vld [vmem:[#allocation22_spill] sm:$0xff] }
 0x3d8   : > { %v8209_v29 = vsel %vm9698_vm10, %v7609_v15, %v9697_v59  ;;  %v8215_v57 = vsel %vm9700_vm12, %v7612_v36, %v9699_v56  ;;  %vm9702_vm6 = vcmp.gt.f32.partialorder %v7615_v34, 0.0  ;;  %vm9704_vm8 = vcmp.gt.f32.partialorder %v7618_v40, 0.0  ;;  %v9705_v15 = vld [vmem:[#allocation122_spill] sm:$0xff]  ;;  %v9707_v36 = vld [vmem:[#allocation159_spill] sm:$0xff]  ;;  %v9737_v18 = vld [vmem:[#allocation21_spill] sm:$0xff] }
 0x3d9   : > { %v8221_v5 = vsel %vm9702_vm6, %v7615_v34, %v9701_v17  ;;  %v8227_v22 = vsel %vm9704_vm8, %v7618_v40, %v9703_v55  ;;  %vm9706_vm2 = vcmp.gt.f32.partialorder %v7621_v53, 0.0  ;;  %vm9708_vm1 = vcmp.gt.f32.partialorder %v7624_v26, 0.0  ;;  %v9709_v34 = vld [vmem:[#allocation119_spill] sm:$0xff]  ;;  %v9711_v40 = vld [vmem:[#allocation129_spill] sm:$0xff]  ;;  %v9736_v25 = vld [vmem:[#allocation66_spill] sm:$0xff] }
 0x3da   : > { %v8233_v63 = vsel %vm9706_vm2, %v7621_v53, %v9705_v15  ;;  %v8239_v7 = vsel %vm9708_vm1, %v7624_v26, %v9707_v36  ;;  %vm9710_vm0 = vcmp.gt.f32.partialorder %v7627_v48, 0.0  ;;  %vm9712_vm14 = vcmp.gt.f32.partialorder %v7630_v28, 0.0  ;;  %v9713_v53 = vld [vmem:[#allocation103_spill] sm:$0xff]  ;;  %v9715_v26 = vld [vmem:[#allocation125_spill] sm:$0xff]  ;;  %v9741_v56 = vld [vmem:[#allocation24_spill] sm:$0xff] }
 0x3db   : > { %v8245_v61 = vsel %vm9710_vm0, %v7627_v48, %v9709_v34  ;;  %v8251_v51 = vsel %vm9712_vm14, %v7630_v28, %v9711_v40  ;;  %vm9714_vm4 = vcmp.gt.f32.partialorder %v7633_v62, 0.0  ;;  %vm9716_vm13 = vcmp.gt.f32.partialorder %v9604_v47, 0.0  ;;  %v9717_v48 = vld [vmem:[#allocation139_spill] sm:$0xff]  ;;  %v9744_v55 = vld [vmem:[#allocation72_spill] sm:$0xff]  ;;  %v9749_v40 = vld [vmem:[#allocation26_spill] sm:$0xff] }
 0x3dc   : > { %v8257_v49 = vsel %vm9714_vm4, %v7633_v62, %v9713_v53  ;;  %v8263_v9 = vsel %vm9716_vm13, %v9604_v47, %v9715_v26  ;;  %vm9718_vm10 = vcmp.gt.f32.partialorder %v9609_v24, 0.0  ;;  %v8275_v62 = vsel %vm2699_vm3, %v9611_v11, %v9719_v27  ;;  %v9722_v11 = vld [vmem:[#allocation176_spill] sm:$0xff]  ;;  %v9740_v59 = vld [vmem:[#allocation67_spill] sm:$0xff]  ;;  %v9752_v26 = vld [vmem:[#allocation74_spill] sm:$0xff] }
 0x3dd   : > { %v8269_v28 = vsel %vm9718_vm10, %v9609_v24, %v9717_v48  ;;  %v8281_v47 = vsel %vm2703_vm11, %v9613_v23, %v9720_v1  ;;  %v8287_v60 = vsel %vm2707_vm15, %v9617_v39, %v7946_v43  ;;  %v9721_v24 = vld [vmem:[#allocation148_spill] sm:$0xff]  ;;  %v8299_v30 = vsel %vm2715_vm9, %v9620_v19, %v9722_v11  ;;  %v9723_v23 = vld [vmem:[#allocation177_spill] sm:$0xff]  ;;  %v9724_v39 = vld [vmem:[#allocation55_spill] sm:$0xff] }
 0x3de   : > { %v8293_v14 = vsel %vm2711_vm5, %v9618_v2, %v9721_v24  ;;  %v8305_v16 = vsel %vm2719_vm7, %v9624_v12, %v9723_v23  ;;  %v9725_v43 = vld [vmem:[#allocation20_spill] sm:$0xff]  ;;  %vm9730_vm11 = vcmp.eq.s32.totalorder %v9729_v58, %v9632_v52  ;;  %vm9731_vm9 = vcmp.eq.s32.totalorder %v9729_v58, %v9645_v44  ;;  %v9745_v15 = vld [vmem:[#allocation23_spill] sm:$0xff]  ;;  %v9753_v48 = vld [vmem:[#allocation25_spill] sm:$0xff] }
 0x3df   : > { %vm9726_vm15 = vcmp.eq.s32.totalorder %v9725_v43, %v9632_v52  ;;  %vm9727_vm5 = vcmp.eq.s32.totalorder %v9725_v43, %v9645_v44  ;;  %v3194_v3 = vsel %vm9730_vm11, 0.0, %v9728_v6  ;;  %v3197_v12 = vsel %vm9731_vm9, 0.0, %v8108_v0  ;;  %v9748_v34 = vld [vmem:[#allocation71_spill] sm:$0xff]  ;;  %v9756_v1 = vld [vmem:[#allocation78_spill] sm:$0xff]  ;;  %v9757_v24 = vld [vmem:[#allocation28_spill] sm:$0xff] }
 0x3e0   : > { %v3190_v2 = vsel %vm9726_vm15, 0.0, %v9724_v39  ;;  %v3193_v19 = vsel %vm9727_vm5, 0.0, %v8062_v42  ;;  %vm9734_vm3 = vcmp.eq.s32.totalorder %v9733_v45, %v9632_v52  ;;  %vm9735_vm7 = vcmp.eq.s32.totalorder %v9733_v45, %v9645_v44  ;;  %3322 = vst [vmem:[%s6434_s9 + $0x20] sm:$0xff] %v3194_v3  ;;  %3325 = vst [vmem:[%s6434_s9 + $0x38] sm:$0xff] %v3197_v12  ;;  %v9760_v23 = vld [vmem:[#allocation149_spill] sm:$0xff]  ;;  %v9761_v39 = vld [vmem:[#allocation27_spill] sm:$0xff] }
 0x3e1   : > { %v3198_v54 = vsel %vm9734_vm3, 0.0, %v9732_v38  ;;  %v3201_v42 = vsel %vm9735_vm7, 0.0, %v2867_v46  ;;  %vm9738_vm12 = vcmp.eq.s32.totalorder %v9737_v18, %v9632_v52  ;;  %3318 = vst [vmem:[%s6434_s9] sm:$0xff] %v3190_v2  ;;  %3321 = vst [vmem:[%s6434_s9 + $0x18] sm:$0xff] %v3193_v19  ;;  %vm9739_vm6 = vcmp.eq.s32.totalorder %v9737_v18, %v9645_v44  ;;  %v9764_v2 = vld [vmem:[#allocation155_spill] sm:$0xff]  ;;  %v9768_v58 = vld [vmem:[#allocation162_spill] sm:$0xff] }
 0x3e2   : > { %v3202_v33 = vsel %vm9738_vm12, 0.0, %v9736_v25  ;;  %v3205_v0 = vsel %vm9739_vm6, 0.0, %v2871_v10  ;;  %vm9742_vm8 = vcmp.eq.s32.totalorder %v9741_v56, %v9632_v52  ;;  %vm9743_vm2 = vcmp.eq.s32.totalorder %v9741_v56, %v9645_v44  ;;  %3326 = vst [vmem:[%s6434_s9 + $0x40] sm:$0xff] %v3198_v54  ;;  %3329 = vst [vmem:[%s6434_s9 + $0x58] sm:$0xff] %v3201_v42  ;;  %v9769_v3 = vld [vmem:[#allocation29_spill] sm:$0xff]  ;;  %v9772_v38 = vld [vmem:[#allocation107_spill] sm:$0xff] }
 0x3e3   : > { %v3206_v46 = vsel %vm9742_vm8, 0.0, %v9740_v59  ;;  %v3209_v17 = vsel %vm9743_vm2, 0.0, %v2875_v4  ;;  %vm9746_vm1 = vcmp.eq.s32.totalorder %v9745_v15, %v9632_v52  ;;  %3330 = vst [vmem:[%s6434_s9 + $0x60] sm:$0xff] %v3202_v33  ;;  %vm9747_vm0 = vcmp.eq.s32.totalorder %v9745_v15, %v9645_v44  ;;  %3333 = vst [vmem:[%s6434_s9 + $0x78] sm:$0xff] %v3205_v0  ;;  %v9773_v45 = vld [vmem:[#allocation32_spill] sm:$0xff]  ;;  %v9776_v42 = vld [vmem:[#allocation173_spill] sm:$0xff] }
 0x3e4   : > { %v3210_v36 = vsel %vm9746_vm1, 0.0, %v9744_v55  ;;  %v3213_v10 = vsel %vm9747_vm0, 0.0, %v2879_v13  ;;  %vm9750_vm14 = vcmp.eq.s32.totalorder %v9749_v40, %v9632_v52  ;;  %vm9751_vm4 = vcmp.eq.s32.totalorder %v9749_v40, %v9645_v44  ;;  %3334 = vst [vmem:[%s6434_s9 + $0x80] sm:$0xff] %v3206_v46  ;;  %3337 = vst [vmem:[%s6434_s9 + $0x98] sm:$0xff] %v3209_v17  ;;  %v9777_v25 = vld [vmem:[#allocation31_spill] sm:$0xff]  ;;  %v9781_v0 = vld [vmem:[#allocation34_spill] sm:$0xff] }
 0x3e5   : > { %v3214_v4 = vsel %vm9750_vm14, 0.0, %v9748_v34  ;;  %v3217_v53 = vsel %vm9751_vm4, 0.0, %v2883_v21  ;;  %vm9754_vm13 = vcmp.eq.s32.totalorder %v9753_v48, %v9632_v52  ;;  %3338 = vst [vmem:[%s6434_s9 + $0xa0] sm:$0xff] %v3210_v36  ;;  %vm9755_vm10 = vcmp.eq.s32.totalorder %v9753_v48, %v9645_v44  ;;  %3341 = vst [vmem:[%s6434_s9 + $0xb8] sm:$0xff] %v3213_v10  ;;  %v9780_v33 = vld [vmem:[#allocation175_spill] sm:$0xff]  ;;  %v9785_v46 = vld [vmem:[#allocation33_spill] sm:$0xff] }
 0x3e6   : > { %v3218_v27 = vsel %vm9754_vm13, 0.0, %v9752_v26  ;;  %v3221_v13 = vsel %vm9755_vm10, 0.0, %v2887_v35  ;;  %vm9758_vm15 = vcmp.eq.s32.totalorder %v9757_v24, %v9632_v52  ;;  %vm9759_vm5 = vcmp.eq.s32.totalorder %v9757_v24, %v9645_v44  ;;  %3342 = vst [vmem:[%s6434_s9 + $0xc0] sm:$0xff] %v3214_v4  ;;  %3345 = vst [vmem:[%s6434_s9 + $0xd8] sm:$0xff] %v3217_v53  ;;  %v9784_v56 = vld [vmem:[#allocation143_spill] sm:$0xff]  ;;  %v9795_v34 = vld [vmem:[#allocation38_spill] sm:$0xff] }
 0x3e7   : > { %v3222_v21 = vsel %vm9758_vm15, 0.0, %v9756_v1  ;;  %v3225_v11 = vsel %vm9759_vm5, 0.0, %v2891_v37  ;;  %vm9762_vm11 = vcmp.eq.s32.totalorder %v9761_v39, %v9632_v52  ;;  %3346 = vst [vmem:[%s6434_s9 + $0xe0] sm:$0xff] %v3218_v27  ;;  %vm9763_vm9 = vcmp.eq.s32.totalorder %v9761_v39, %v9645_v44  ;;  %v9765_v37 = vld [vmem:[#allocation30_spill] sm:$0xff]  ;;  %3349 = vst [vmem:[%s6434_s9 + $0xf8] sm:$0xff] %v3221_v13  ;;  %v9791_v36 = vld [vmem:[#allocation35_spill] sm:$0xff] }
 0x3e8   : > { %v3226_v43 = vsel %vm9762_vm11, 0.0, %v9760_v23  ;;  %v3229_v35 = vsel %vm9763_vm9, 0.0, %v2895_v41  ;;  %vm9766_vm3 = vcmp.eq.s32.totalorder %v9765_v37, %v9632_v52  ;;  %vm9767_vm7 = vcmp.eq.s32.totalorder %v9765_v37, %v9645_v44  ;;  %3350 = vst [vmem:[%s6434_s9 + $0x100] sm:$0xff] %v3222_v21  ;;  %3353 = vst [vmem:[%s6434_s9 + $0x118] sm:$0xff] %v3225_v11  ;;  %v9798_v40 = vld [vmem:[#allocation178_spill] sm:$0xff]  ;;  %v9799_v4 = vld [vmem:[#allocation37_spill] sm:$0xff] }
 0x3e9   : > { %v3230_v19 = vsel %vm9766_vm3, 0.0, %v9764_v2  ;;  %v3233_v6 = vsel %vm9767_vm7, 0.0, %v2899_v50  ;;  %vm9770_vm12 = vcmp.eq.s32.totalorder %v9769_v3, %v9632_v52  ;;  %3354 = vst [vmem:[%s6434_s9 + $0x120] sm:$0xff] %v3226_v43  ;;  %vm9771_vm6 = vcmp.eq.s32.totalorder %v9769_v3, %v9645_v44  ;;  %3357 = vst [vmem:[%s6434_s9 + $0x138] sm:$0xff] %v3229_v35  ;;  %v9802_v26 = vld [vmem:[#allocation151_spill] sm:$0xff]  ;;  %v9811_v21 = vld [vmem:[#allocation42_spill] sm:$0xff] }
 0x3ea   : > { %v3234_v12 = vsel %vm9770_vm12, 0.0, %v9768_v58  ;;  %v3237_v41 = vsel %vm9771_vm6, 0.0, %v2903_v20  ;;  %vm9774_vm8 = vcmp.eq.s32.totalorder %v9773_v45, %v9632_v52  ;;  %vm9775_vm2 = vcmp.eq.s32.totalorder %v9773_v45, %v9645_v44  ;;  %3358 = vst [vmem:[%s6434_s9 + $0x140] sm:$0xff] %v3230_v19  ;;  %3361 = vst [vmem:[%s6434_s9 + $0x158] sm:$0xff] %v3233_v6  ;;  %v9806_v13 = vld [vmem:[#allocation179_spill] sm:$0xff]  ;;  %v9814_v39 = vld [vmem:[#allocation180_spill] sm:$0xff] }
 0x3eb   : > { %v3238_v50 = vsel %vm9774_vm8, 0.0, %v9772_v38  ;;  %v3241_v54 = vsel %vm9775_vm2, 0.0, %v8203_v32  ;;  %vm9778_vm1 = vcmp.eq.s32.totalorder %v9777_v25, %v9632_v52  ;;  %3362 = vst [vmem:[%s6434_s9 + $0x160] sm:$0xff] %v3234_v12  ;;  %vm9779_vm0 = vcmp.eq.s32.totalorder %v9777_v25, %v9645_v44  ;;  %3365 = vst [vmem:[%s6434_s9 + $0x178] sm:$0xff] %v3237_v41  ;;  %v9807_v1 = vld [vmem:[#allocation39_spill] sm:$0xff]  ;;  %v9815_v43 = vld [vmem:[#allocation41_spill] sm:$0xff] }
 0x3ec   : > { %v3242_v18 = vsel %vm9778_vm1, 0.0, %v9776_v42  ;;  %v3245_v20 = vsel %vm9779_vm0, 0.0, %v8209_v29  ;;  %vm9782_vm14 = vcmp.eq.s32.totalorder %v9781_v0, %v9632_v52  ;;  %vm9783_vm4 = vcmp.eq.s32.totalorder %v9781_v0, %v9645_v44  ;;  %3366 = vst [vmem:[%s6434_s9 + $0x180] sm:$0xff] %v3238_v50  ;;  %3369 = vst [vmem:[%s6434_s9 + $0x198] sm:$0xff] %v3241_v54  ;;  %v9818_v2 = vld [vmem:[#allocation158_spill] sm:$0xff]  ;;  %v9819_v37 = vld [vmem:[#allocation44_spill] sm:$0xff] }
 0x3ed   : > { %v3246_v32 = vsel %vm9782_vm14, 0.0, %v9780_v33  ;;  %v3249_v59 = vsel %vm9783_vm4, 0.0, %v8215_v57  ;;  %vm9786_vm13 = vcmp.eq.s32.totalorder %v9785_v46, %v9632_v52  ;;  %3370 = vst [vmem:[%s6434_s9 + $0x1a0] sm:$0xff] %v3242_v18  ;;  %vm9787_vm10 = vcmp.eq.s32.totalorder %v9785_v46, %v9645_v44  ;;  %v9788_v57 = vld [vmem:[#allocation36_spill] sm:$0xff]  ;;  %3373 = vst [vmem:[%s6434_s9 + $0x1b8] sm:$0xff] %v3245_v20  ;;  %v9822_v6 = vld [vmem:[#allocation181_spill] sm:$0xff] }
 0x3ee   : > { %v3250_v17 = vsel %vm9786_vm13, 0.0, %v9784_v56  ;;  %v3253_v29 = vsel %vm9787_vm10, 0.0, %v8221_v5  ;;  %vm9789_vm15 = vcmp.eq.s32.totalorder %v9788_v57, %v9632_v52  ;;  %vm9790_vm5 = vcmp.eq.s32.totalorder %v9788_v57, %v9645_v44  ;;  %3374 = vst [vmem:[%s6434_s9 + $0x1c0] sm:$0xff] %v3246_v32  ;;  %3377 = vst [vmem:[%s6434_s9 + $0x1d8] sm:$0xff] %v3249_v59  ;;  %v9794_v5 = vld [vmem:[#allocation154_spill] sm:$0xff]  ;;  %v9823_v58 = vld [vmem:[#allocation43_spill] sm:$0xff] }
 0x3ef   : > { %v3254_v55 = vsel %vm9789_vm15, 0.0, %v7967_v8  ;;  %v3257_v15 = vsel %vm9790_vm5, 0.0, %v8227_v22  ;;  %vm9792_vm11 = vcmp.eq.s32.totalorder %v9791_v36, %v9632_v52  ;;  %3378 = vst [vmem:[%s6434_s9 + $0x1e0] sm:$0xff] %v3250_v17  ;;  %vm9793_vm9 = vcmp.eq.s32.totalorder %v9791_v36, %v9645_v44  ;;  %3381 = vst [vmem:[%s6434_s9 + $0x1f8] sm:$0xff] %v3253_v29  ;;  %v9827_v12 = vld [vmem:[#allocation46_spill] sm:$0xff]  ;;  %v9831_v50 = vld [vmem:[#allocation45_spill] sm:$0xff] }
 0x3f0   : > { %v3258_v10 = vsel %vm9792_vm11, 0.0, %v7973_v31  ;;  %v3261_v8 = vsel %vm9793_vm9, 0.0, %v8233_v63  ;;  %vm9796_vm3 = vcmp.eq.s32.totalorder %v9795_v34, %v9632_v52  ;;  %vm9797_vm7 = vcmp.eq.s32.totalorder %v9795_v34, %v9645_v44  ;;  %3382 = vst [vmem:[%s6434_s9 + $0x200] sm:$0xff] %v3254_v55  ;;  %3385 = vst [vmem:[%s6434_s9 + $0x218] sm:$0xff] %v3257_v15  ;;  %v9830_v45 = vld [vmem:[#allocation182_spill] sm:$0xff]  ;;  %v9835_v42 = vld [vmem:[#allocation48_spill] sm:$0xff] }
 0x3f1   : > { %v3262_v22 = vsel %vm9796_vm3, 0.0, %v9794_v5  ;;  %v3265_v31 = vsel %vm9797_vm7, 0.0, %v8239_v7  ;;  %vm9800_vm12 = vcmp.eq.s32.totalorder %v9799_v4, %v9632_v52  ;;  %3386 = vst [vmem:[%s6434_s9 + $0x220] sm:$0xff] %v3258_v10  ;;  %vm9801_vm6 = vcmp.eq.s32.totalorder %v9799_v4, %v9645_v44  ;;  %v9803_v7 = vld [vmem:[#allocation40_spill] sm:$0xff]  ;;  %3389 = vst [vmem:[%s6434_s9 + $0x238] sm:$0xff] %v3261_v8  ;;  %v9838_v20 = vld [vmem:[#allocation183_spill] sm:$0xff] }
 0x3f2   : > { %v3266_v53 = vsel %vm9800_vm12, 0.0, %v9798_v40  ;;  %v3269_v63 = vsel %vm9801_vm6, 0.0, %v8245_v61  ;;  %vm9804_vm8 = vcmp.eq.s32.totalorder %v9803_v7, %v9632_v52  ;;  %vm9805_vm2 = vcmp.eq.s32.totalorder %v9803_v7, %v9645_v44  ;;  %3390 = vst [vmem:[%s6434_s9 + $0x240] sm:$0xff] %v3262_v22  ;;  %3393 = vst [vmem:[%s6434_s9 + $0x258] sm:$0xff] %v3265_v31  ;;  %v9839_v33 = vld [vmem:[#allocation47_spill] sm:$0xff] }
 0x3f3   : > { %v3270_v48 = vsel %vm9804_vm8, 0.0, %v9802_v26  ;;  %v3273_v27 = vsel %vm9805_vm2, 0.0, %v8251_v51  ;;  %vm9808_vm1 = vcmp.eq.s32.totalorder %v9807_v1, %v9632_v52  ;;  %3394 = vst [vmem:[%s6434_s9 + $0x260] sm:$0xff] %v3266_v53  ;;  %vm9809_vm0 = vcmp.eq.s32.totalorder %v9807_v1, %v9645_v44  ;;  %v9810_v51 = vld [vmem:[#allocation161_spill] sm:$0xff]  ;;  %3397 = vst [vmem:[%s6434_s9 + $0x278] sm:$0xff] %v3269_v63 }
 0x3f4   : > { %v3274_v24 = vsel %vm9808_vm1, 0.0, %v9806_v13  ;;  %v3277_v61 = vsel %vm9809_vm0, 0.0, %v8257_v49  ;;  %vm9812_vm14 = vcmp.eq.s32.totalorder %v9811_v21, %v9632_v52  ;;  %vm9813_vm4 = vcmp.eq.s32.totalorder %v9811_v21, %v9645_v44  ;;  %3398 = vst [vmem:[%s6434_s9 + $0x280] sm:$0xff] %v3270_v48  ;;  %3401 = vst [vmem:[%s6434_s9 + $0x298] sm:$0xff] %v3273_v27 }
 0x3f5   : > { %v3278_v11 = vsel %vm9812_vm14, 0.0, %v9810_v51  ;;  %v3281_v23 = vsel %vm9813_vm4, 0.0, %v8263_v9  ;;  %vm9816_vm13 = vcmp.eq.s32.totalorder %v9815_v43, %v9632_v52  ;;  %3402 = vst [vmem:[%s6434_s9 + $0x2a0] sm:$0xff] %v3274_v24  ;;  %vm9817_vm10 = vcmp.eq.s32.totalorder %v9815_v43, %v9645_v44  ;;  %3405 = vst [vmem:[%s6434_s9 + $0x2b8] sm:$0xff] %v3277_v61 }
 0x3f6   : > { %v3282_v35 = vsel %vm9816_vm13, 0.0, %v9814_v39  ;;  %v3285_v49 = vsel %vm9817_vm10, 0.0, %v8269_v28  ;;  %vm9820_vm15 = vcmp.eq.s32.totalorder %v9819_v37, %v9632_v52  ;;  %vm9821_vm5 = vcmp.eq.s32.totalorder %v9819_v37, %v9645_v44  ;;  %3406 = vst [vmem:[%s6434_s9 + $0x2c0] sm:$0xff] %v3278_v11  ;;  %3409 = vst [vmem:[%s6434_s9 + $0x2d8] sm:$0xff] %v3281_v23 }
 0x3f7   : > { %v3286_v9 = vsel %vm9820_vm15, 0.0, %v9818_v2  ;;  %v3289_v19 = vsel %vm9821_vm5, 0.0, %v8275_v62  ;;  %vm9824_vm11 = vcmp.eq.s32.totalorder %v9823_v58, %v9632_v52  ;;  %3410 = vst [vmem:[%s6434_s9 + $0x2e0] sm:$0xff] %v3282_v35  ;;  %vm9825_vm9 = vcmp.eq.s32.totalorder %v9823_v58, %v9645_v44  ;;  %v9826_v62 = vld [vmem:[#allocation111_spill] sm:$0xff]  ;;  %3413 = vst [vmem:[%s6434_s9 + $0x2f8] sm:$0xff] %v3285_v49 }
 0x3f8   : > { %v3290_v3 = vsel %vm9824_vm11, 0.0, %v9822_v6  ;;  %v3293_v28 = vsel %vm9825_vm9, 0.0, %v8281_v47  ;;  %vm9828_vm3 = vcmp.eq.s32.totalorder %v9827_v12, %v9632_v52  ;;  %vm9829_vm7 = vcmp.eq.s32.totalorder %v9827_v12, %v9645_v44  ;;  %3414 = vst [vmem:[%s6434_s9 + $0x300] sm:$0xff] %v3286_v9  ;;  %3417 = vst [vmem:[%s6434_s9 + $0x318] sm:$0xff] %v3289_v19 }
 0x3f9   : > { %v3294_v41 = vsel %vm9828_vm3, 0.0, %v9826_v62  ;;  %v3297_v38 = vsel %vm9829_vm7, 0.0, %v8287_v60  ;;  %vm9832_vm12 = vcmp.eq.s32.totalorder %v9831_v50, %v9632_v52  ;;  %3418 = vst [vmem:[%s6434_s9 + $0x320] sm:$0xff] %v3290_v3  ;;  %vm9833_vm6 = vcmp.eq.s32.totalorder %v9831_v50, %v9645_v44  ;;  %v9834_v60 = vld [vmem:[#allocation91_spill] sm:$0xff]  ;;  %3421 = vst [vmem:[%s6434_s9 + $0x338] sm:$0xff] %v3293_v28 }
 0x3fa   : > { %v3298_v54 = vsel %vm9832_vm12, 0.0, %v9830_v45  ;;  %v3301_v47 = vsel %vm9833_vm6, 0.0, %v8293_v14  ;;  %vm9836_vm8 = vcmp.eq.s32.totalorder %v9835_v42, %v9632_v52  ;;  %vm9837_vm2 = vcmp.eq.s32.totalorder %v9835_v42, %v9645_v44  ;;  %3422 = vst [vmem:[%s6434_s9 + $0x340] sm:$0xff] %v3294_v41  ;;  %3425 = vst [vmem:[%s6434_s9 + $0x358] sm:$0xff] %v3297_v38 }
 0x3fb   : > { %v3302_v25 = vsel %vm9836_vm8, 0.0, %v9834_v60  ;;  %v3305_v18 = vsel %vm9837_vm2, 0.0, %v8299_v30  ;;  %vm9840_vm1 = vcmp.eq.s32.totalorder %v9839_v33, %v9632_v52  ;;  %3426 = vst [vmem:[%s6434_s9 + $0x360] sm:$0xff] %v3298_v54  ;;  %vm9841_vm0 = vcmp.eq.s32.totalorder %v9839_v33, %v9645_v44  ;;  %3429 = vst [vmem:[%s6434_s9 + $0x378] sm:$0xff] %v3301_v47 }
 0x3fc   : > { %v3306_v0 = vsel %vm9840_vm1, 0.0, %v9838_v20  ;;  %v3309_v14 = vsel %vm9841_vm0, 0.0, %v8305_v16  ;;  %3430 = vst [vmem:[%s6434_s9 + $0x380] sm:$0xff] %v3302_v25  ;;  %3433 = vst [vmem:[%s6434_s9 + $0x398] sm:$0xff] %v3305_v18 }
 0x3fd   : > { %3434 = vst [vmem:[%s6434_s9 + $0x3a0] sm:$0xff] %v3306_v0  ;;  %3437 = vst [vmem:[%s6434_s9 + $0x3b8] sm:$0xff] %v3309_v14 }
 0x3fe   : > { %4235 = shalt.err (!%p4232_p8)
}
 0x3ff   : > { %s4236_s15 = scalar_lea.hbm %s8580_s12, 16384  ;;  %s4240_s16 = scalar_lea.hbm %s8671_s6, 131072 }
 0x400   : > { %p4237_p6 = scmp.ne.s32.totalorder %s8580_s12, %s4236_s15  ;;  %p4241_p13 = scmp.lt.u32.totalorder %s8580_s12, %s8671_s6 }
 0x401   : > { %p4242_p10 = scmp.lt.u32.totalorder %s4240_s16, %s4236_s15  ;;  %p4244_p12 = scmp.lt.u32.totalorder %s4236_s15, %s8580_s12 }
 0x402   : > { %p4238_p7 = pnand %p4237_p6, %p9843_p0 }
 0x403   : > { %p4243_p3 = por %p4242_p10, %p4241_p13 }
 0x404   : > { %p4239_p1 = pneg %p4238_p7 }
 0x405   : > { %p4245_p11 = por %p4244_p12, %p4243_p3 }
 0x407   : > { %p4246_p4 = pnand %p4245_p11, %p4239_p1 }
 0x409   : > { %4249 = shalt.err (!%p4246_p4)
}
 0x40a   : > { %s4335_s24 = smov 512   ;;  %s4336_s11 = smov 1024  }
 0x40b   : > { %s4337_s29 = smov 32  }
 0x40c   : > { %4037 = dma.vmem_to_hbm [thread:$0]  (%p9843_p0), %s8555_s25, 16384, %s8580_s12, %s8613_s7, %s4335_s24, %s4336_s11, %s4337_s29  }
 0x40d PF: > { %p4057_p5 = scmp.ge.s32.totalorder %s4324_s28, 2  ;;  %s3478_s5 = sand.u32 1, %s4296_s21  }
 0x40e   : > { %p9844_p2 = scmp.ne.s32.totalorder %s8888_s18, 0  ;;  %s3479_s10 = scalar_lea.sflag [#allocation4], %s3478_s5 }
 0x410   : > { %p4051_p9 = pnand %p4057_p5, %p9844_p2 }
 0x412   : > { %4291 = dma.done.wait (!%p4051_p9), %s3479_s10, 16384  }
 0x413   : > { %4293 = vsyncadd (!%p4051_p9), %s3479_s10, 4294950912  ;;  %s23_s28 = sadd.s32 1, %s4324_s28   ;;  %s9845_s25 = sld [smem:[#allocation12_spill]] }
 0x414   : > { %p20_p8 = scmp.ge.s32.totalorder %s23_s28, 10   ;;  %s9846_s13 = sld [smem:[#allocation13_spill]] }
 0x415   : > { %s9847_s27 = sld [smem:[#allocation14_spill]]  ;;  %s9848_s21 = smov %s4300_s22 }
 0x416   : > { %s9849_s22 = smov %s4304_s23  ;;  %s9850_s23 = smov %s4444_s19 }
 0x417   : > { %s9851_s24 = smov %s4316_s26  ;;  %22 = sbr.rel (!%p20_p8) target bundleno = 11 (0xb), region = 111 }
 0x41a   : > { %s9852_s26 = smov %s9846_s13 }
 0x41e   :  { %3484 = vsyncpa [#allocation3], 1 }
 0x41f   :  { %3486 = vsyncpa [#allocation3 + $0x1], 1 }
 0x420   :  { %3487 = vsyncpa [#allocation6], 1 }
 0x421   :  { %3489 = vsyncpa [#allocation6 + $0x1], 1 }
 0x422   :  { %3490 = vsyncpa [#allocation4], 1 }
 0x423   :  { %3492 = vsyncpa [#allocation4 + $0x1], 1 }

</bundles_post_ra>
